<compile_context>
chip_gen: v7x
topology: tpu7x:2x2x1
jax: 0.10.0
libtpu: 0.0.40
codegen_flags: <defaults>
</compile_context>

<pallas_src>
import jax
import jax.numpy as jnp
from jax.experimental import pallas as pl
from jax.experimental.pallas import tpu as pltpu


# ------------------------- fused Pallas kernel -------------------------

def _conv_stage(in_ref, w_ref, b_ref, patch_ref, out_ref, *, n, k, rw, ho):
    """One stride-2 conv + bias + ReLU, all operands VMEM resident.

    in_ref    : (n, Hp_in, rw)        H-zero-padded input rows, channels fastest
    w_ref     : (k*rw, wo*c_out)      row weight (stride-2 W-selection folded in)
    b_ref     : (1, wo*c_out)
    patch_ref : (ho*n, k*rw)          H-only im2col scratch
    out_ref   : (n, Hp_out, wo*c_out) zero-padded (pad=1) output rows for next stage
    """
    # H-only im2col: conv output row oy needs stored input rows [2*oy, 2*oy + k).
    # Each copy is a full, 128-lane-aligned row slice -> cheap unmasked vector ops.
    for oy in range(ho):
        for i in range(k):
            patch_ref[oy * n:(oy + 1) * n, i * rw:(i + 1) * rw] = in_ref[:, 2 * oy + i, :]
    # One MXU GEMM for the whole layer (f32 accumulation), then bias + ReLU.
    y = jnp.dot(patch_ref[...], w_ref[...], preferred_element_type=jnp.float32)
    y = jnp.maximum(y + b_ref[...], 0.0)                      # (ho*n, wo*c_out)
    # Scatter each output row into the next stage's buffer; untouched rows stay zero
    # and act as that stage's H padding.
    out_ref[...] = jnp.zeros_like(out_ref)
    for oy in range(ho):
        out_ref[:, oy + 1, :] = y[oy * n:(oy + 1) * n, :]


def _encoder_kernel(x_ref, w1_ref, b1_ref, w2_ref, b2_ref, w3_ref, b3_ref,
                    out_ref, a1_ref, a2_ref, a3_ref, p1_ref, p2_ref, p3_ref):
    n = x_ref.shape[0]
    # conv1: 3 -> 16, k5 s2 p2 : (n, 36, 128) -> (n, 18, 256)
    _conv_stage(x_ref, w1_ref, b1_ref, p1_ref, a1_ref, n=n, k=5, rw=128, ho=16)
    # conv2: 16 -> 32, k3 s2 p1 : (n, 18, 256) -> (n, 10, 256)
    _conv_stage(a1_ref, w2_ref, b2_ref, p2_ref, a2_ref, n=n, k=3, rw=256, ho=8)
    # conv3: 32 -> 64, k3 s2 p1 : (n, 10, 256) -> (n, 6, 256)
    _conv_stage(a2_ref, w3_ref, b3_ref, p3_ref, a3_ref, n=n, k=3, rw=256, ho=4)

    # maxpool 3x3 s2 p1 on the 4x4x64 conv3 output (rows 1..4 of a3_ref) -> 2x2x64.
    # Padding taps are skipped entirely, which matches PyTorch's MaxPool2d exactly.
    rows = [a3_ref[:, h + 1, :] for h in range(4)]            # the 4 real conv3 rows
    for py in range(2):
        for px in range(2):
            m = None
            for r in range(3):
                rr = 2 * py + r - 1                           # input row index
                if not 0 <= rr < 4:
                    continue
                for c in range(3):
                    cc = 2 * px + c - 1                       # input col index
                    if not 0 <= cc < 4:
                        continue
                    t = rows[rr][:, cc * 64:(cc + 1) * 64]
                    m = t if m is None else jnp.maximum(m, t)
            out_ref[:, (2 * py + px) * 64:(2 * py + px + 1) * 64] = m


def _encoder_pallas(x1, w1, b1, w2, b2, w3, b3):
    n = x1.shape[0]
    f32 = jnp.float32

    def _full(a):
        nd = a.ndim
        return pl.BlockSpec(a.shape, lambda i: (0,) * nd)

    return pl.pallas_call(
        _encoder_kernel,
        out_shape=jax.ShapeDtypeStruct((n, 2 * 2 * 64), f32),
        grid_spec=pltpu.PrefetchScalarGridSpec(
            num_scalar_prefetch=0,
            grid=(1,),
            in_specs=[_full(a) for a in (x1, w1, b1, w2, b2, w3, b3)],
            out_specs=pl.BlockSpec((n, 2 * 2 * 64), lambda i: (0, 0)),
            scratch_shapes=[
                pltpu.VMEM((n, 18, 256), f32),       # conv1 out, H-padded for conv2
                pltpu.VMEM((n, 10, 256), f32),       # conv2 out, H-padded for conv3
                pltpu.VMEM((n, 6, 256), f32),        # conv3 out, H-padded for maxpool
                pltpu.VMEM((16 * n, 5 * 128), f32),  # conv1 H-im2col
                pltpu.VMEM((8 * n, 3 * 256), f32),   # conv2 H-im2col
                pltpu.VMEM((4 * n, 3 * 256), f32),   # conv3 H-im2col
            ],
        ),
        compiler_params=pltpu.CompilerParams(dimension_semantics=("arbitrary",)),
    )(x1, w1, b1, w2, b2, w3, b3)


# ------------------------- one-time parameter re-layout (hoisted) -------------------------

def prepare_params(params):
    """Build per-layer "row weights": W_row[(i*RW + w*Cin + ci), ox*Cout + co] =
    w[co, ci, i, (w - 2*ox + pad)] when that kernel tap exists, else 0.  Multiplying
    the flattened k-row input slab of one conv output row by W_row performs the
    stride-2 window selection, W zero-padding and the conv contraction in one GEMM."""
    (w1, b1, w2, b2, w3, b3) = params

    def row_weight(w, w_in, wo, rw, pad, stride=2):
        co, ci, kh, kw = w.shape
        wcols = jnp.arange(w_in)
        oxs = jnp.arange(wo)
        js = jnp.arange(kw)
        # sel[j, wcol, ox] = 1 iff input column wcol is tap j of output column ox
        sel = (wcols[None, :, None] == stride * oxs[None, None, :] + js[:, None, None] - pad)
        t = jnp.einsum("ocij,jwx->iwcxo", w, sel.astype(w.dtype))  # (kh, w_in, ci, wo, co)
        t = t.reshape(kh, w_in * ci, wo * co)
        t = jnp.pad(t, ((0, 0), (0, rw - w_in * ci), (0, 0)))      # lane-align each tap row
        return t.reshape(kh * rw, wo * co)

    def row_bias(b, wo):
        return jnp.tile(b, (wo,)).reshape(1, -1)

    return (row_weight(w1, 32, 16, 128, 2), row_bias(b1, 16),
            row_weight(w2, 16, 8, 256, 1), row_bias(b2, 8),
            row_weight(w3, 8, 4, 256, 1), row_bias(b3, 4))


# ------------------------- forward wrapper (NCHW in / NCHW out) -------------------------

def feature_encoder(x_nchw, prepared):
    w1r, b1r, w2r, b2r, w3r, b3r = prepared
    n, c, h, w = x_nchw.shape
    assert (c, h, w) == (3, 32, 32), "kernel constants are specialized to 3x32x32 input"
    x = jnp.transpose(x_nchw, (0, 2, 3, 1))          # NHWC, channels fastest
    x = x.reshape(n, 32, 32 * 3)                      # one image row -> 96 lanes
    x = jnp.pad(x, ((0, 0), (2, 2), (0, 128 - 96)))   # conv1 H zero pad + lane align
    out = _encoder_pallas(x, w1r, b1r, w2r, b2r, w3r, b3r)   # (n, 2*2*64)
    out = out.reshape(n, 2, 2, 64)
    return jnp.transpose(out, (0, 3, 1, 2))           # NHWC -> NCHW (match PyTorch)


# ------------------------- deterministic params -------------------------

def init_params(key):
    ks = jax.random.split(key, 6)

    def conv_p(kw_key, kb_key, cout, cin, k):
        fan_in = cin * k * k
        bound = 1.0 / (fan_in ** 0.5)
        w = jax.random.uniform(kw_key, (cout, cin, k, k), jnp.float32, -bound, bound)
        b = jax.random.uniform(kb_key, (cout,), jnp.float32, -bound, bound)
        return w, b

    w1, b1 = conv_p(ks[0], ks[1], 16, 3, 5)
    w2, b2 = conv_p(ks[2], ks[3], 32, 16, 3)
    w3, b3 = conv_p(ks[4], ks[5], 64, 32, 3)
    return (w1, b1, w2, b2, w3, b3)


# ------------------------- pure-JAX reference (correctness check) -------------------------

def reference(x_nchw, params):
    (w1, b1, w2, b2, w3, b3) = params

    def conv(x, w, b, s, p):
        y = jax.lax.conv_general_dilated(
            x, w, (s, s), [(p, p), (p, p)],
            dimension_numbers=("NCHW", "OIHW", "NCHW"))
        return jax.nn.relu(y + b[None, :, None, None])

    x = conv(x_nchw, w1, b1, 2, 2)
    x = conv(x, w2, b2, 2, 1)
    x = conv(x, w3, b3, 2, 1)
    x = jax.lax.reduce_window(
        x, -jnp.inf, jax.lax.max,
        window_dimensions=(1, 1, 3, 3), window_strides=(1, 1, 2, 2),
        padding=[(0, 0), (0, 0), (1, 1), (1, 1)])
    return x


if __name__ == "__main__":
    key = jax.random.PRNGKey(0)
    kx, kp = jax.random.split(key)
    x = jax.random.normal(kx, (2, 3, 32, 32), jnp.float32)   # NCHW, like PyTorch
    params = init_params(kp)
    prepared = prepare_params(params)                        # hoisted weight re-layout

    fwd = jax.jit(feature_encoder)
    out = jax.block_until_ready(fwd(x, prepared))
    ref = jax.block_until_ready(reference(x, params))

    assert out.shape == (2, 64, 2, 2), out.shape
    assert jnp.allclose(out, ref, atol=5e-4, rtol=5e-4), float(jnp.max(jnp.abs(out - ref)))
    print("KERNEL_OK")
</pallas_src>

<mosaic_0001>
module attributes {stable_mosaic.version = 11 : i64} {
  func.func @_encoder_kernel(%arg0: i32, %arg1: memref<2x36x128xf32, #tpu.memory_space<vmem>>, %arg2: memref<640x256xf32, #tpu.memory_space<vmem>>, %arg3: memref<1x256xf32, #tpu.memory_space<vmem>>, %arg4: memref<768x256xf32, #tpu.memory_space<vmem>>, %arg5: memref<1x256xf32, #tpu.memory_space<vmem>>, %arg6: memref<768x256xf32, #tpu.memory_space<vmem>>, %arg7: memref<1x256xf32, #tpu.memory_space<vmem>>, %arg8: memref<2x256xf32, #tpu.memory_space<vmem>>, %arg9: memref<2x18x256xf32, #tpu.memory_space<vmem>>, %arg10: memref<2x10x256xf32, #tpu.memory_space<vmem>>, %arg11: memref<2x6x256xf32, #tpu.memory_space<vmem>>, %arg12: memref<32x640xf32, #tpu.memory_space<vmem>>, %arg13: memref<16x768xf32, #tpu.memory_space<vmem>>, %arg14: memref<8x768xf32, #tpu.memory_space<vmem>>) attributes {dimension_semantics = [#tpu.dimension_semantics<arbitrary>], iteration_bounds = array<i64: 1>, scalar_prefetch = 0 : i64, scratch_operands = 6 : i64, tpu.core_type = #tpu.core_type<tc>, window_params = [{pipeline_mode = #tpu.pipeline_mode<synchronous>, transform_indices = @transform_0, window_bounds = array<i64: 2, 36, 128>}, {pipeline_mode = #tpu.pipeline_mode<synchronous>, transform_indices = @transform_1, window_bounds = array<i64: 640, 256>}, {pipeline_mode = #tpu.pipeline_mode<synchronous>, transform_indices = @transform_2, window_bounds = array<i64: 1, 256>}, {pipeline_mode = #tpu.pipeline_mode<synchronous>, transform_indices = @transform_3, window_bounds = array<i64: 768, 256>}, {pipeline_mode = #tpu.pipeline_mode<synchronous>, transform_indices = @transform_4, window_bounds = array<i64: 1, 256>}, {pipeline_mode = #tpu.pipeline_mode<synchronous>, transform_indices = @transform_5, window_bounds = array<i64: 768, 256>}, {pipeline_mode = #tpu.pipeline_mode<synchronous>, transform_indices = @transform_6, window_bounds = array<i64: 1, 256>}, {pipeline_mode = #tpu.pipeline_mode<synchronous>, transform_indices = @transform_7, window_bounds = array<i64: 2, 256>}]} {
    %c0 = arith.constant 0 : index
    %c0_0 = arith.constant 0 : index
    %c0_1 = arith.constant 0 : index
    %0 = vector.load %arg1[%c0, %c0_0, %c0_1] : memref<2x36x128xf32, #tpu.memory_space<vmem>>, vector<2x1x128xf32>
    %1 = vector.shape_cast %0 : vector<2x1x128xf32> to vector<2x128xf32>
    %c0_2 = arith.constant 0 : index
    %c0_3 = arith.constant 0 : index
    %2 = vector.load %arg12[%c0_2, %c0_3] : memref<32x640xf32, #tpu.memory_space<vmem>>, vector<2x128xf32>
    tpu.vector_store %arg12[%c0_2, %c0_3], %1 {strides = array<i32>} : memref<32x640xf32, #tpu.memory_space<vmem>>, vector<2x128xf32>,
    %c0_4 = arith.constant 0 : index
    %c1 = arith.constant 1 : index
    %c0_5 = arith.constant 0 : index
    %3 = vector.load %arg1[%c0_4, %c1, %c0_5] : memref<2x36x128xf32, #tpu.memory_space<vmem>>, vector<2x1x128xf32>
    %4 = vector.shape_cast %3 : vector<2x1x128xf32> to vector<2x128xf32>
    %c0_6 = arith.constant 0 : index
    %c128 = arith.constant 128 : index
    %5 = vector.load %arg12[%c0_6, %c128] : memref<32x640xf32, #tpu.memory_space<vmem>>, vector<2x128xf32>
    tpu.vector_store %arg12[%c0_6, %c128], %4 {strides = array<i32>} : memref<32x640xf32, #tpu.memory_space<vmem>>, vector<2x128xf32>,
    %c0_7 = arith.constant 0 : index
    %c2 = arith.constant 2 : index
    %c0_8 = arith.constant 0 : index
    %6 = vector.load %arg1[%c0_7, %c2, %c0_8] : memref<2x36x128xf32, #tpu.memory_space<vmem>>, vector<2x1x128xf32>
    %7 = vector.shape_cast %6 : vector<2x1x128xf32> to vector<2x128xf32>
    %c0_9 = arith.constant 0 : index
    %c256 = arith.constant 256 : index
    %8 = vector.load %arg12[%c0_9, %c256] : memref<32x640xf32, #tpu.memory_space<vmem>>, vector<2x128xf32>
    tpu.vector_store %arg12[%c0_9, %c256], %7 {strides = array<i32>} : memref<32x640xf32, #tpu.memory_space<vmem>>, vector<2x128xf32>,
    %c0_10 = arith.constant 0 : index
    %c3 = arith.constant 3 : index
    %c0_11 = arith.constant 0 : index
    %9 = vector.load %arg1[%c0_10, %c3, %c0_11] : memref<2x36x128xf32, #tpu.memory_space<vmem>>, vector<2x1x128xf32>
    %10 = vector.shape_cast %9 : vector<2x1x128xf32> to vector<2x128xf32>
    %c0_12 = arith.constant 0 : index
    %c384 = arith.constant 384 : index
    %11 = vector.load %arg12[%c0_12, %c384] : memref<32x640xf32, #tpu.memory_space<vmem>>, vector<2x128xf32>
    tpu.vector_store %arg12[%c0_12, %c384], %10 {strides = array<i32>} : memref<32x640xf32, #tpu.memory_space<vmem>>, vector<2x128xf32>,
    %c0_13 = arith.constant 0 : index
    %c4 = arith.constant 4 : index
    %c0_14 = arith.constant 0 : index
    %12 = vector.load %arg1[%c0_13, %c4, %c0_14] : memref<2x36x128xf32, #tpu.memory_space<vmem>>, vector<2x1x128xf32>
    %13 = vector.shape_cast %12 : vector<2x1x128xf32> to vector<2x128xf32>
    %c0_15 = arith.constant 0 : index
    %c512 = arith.constant 512 : index
    %14 = vector.load %arg12[%c0_15, %c512] : memref<32x640xf32, #tpu.memory_space<vmem>>, vector<2x128xf32>
    tpu.vector_store %arg12[%c0_15, %c512], %13 {strides = array<i32>} : memref<32x640xf32, #tpu.memory_space<vmem>>, vector<2x128xf32>,
    %c0_16 = arith.constant 0 : index
    %c2_17 = arith.constant 2 : index
    %c0_18 = arith.constant 0 : index
    %15 = vector.load %arg1[%c0_16, %c2_17, %c0_18] : memref<2x36x128xf32, #tpu.memory_space<vmem>>, vector<2x1x128xf32>
    %16 = vector.shape_cast %15 : vector<2x1x128xf32> to vector<2x128xf32>
    %c2_19 = arith.constant 2 : index
    %c0_20 = arith.constant 0 : index
    %17 = vector.load %arg12[%c2_19, %c0_20] : memref<32x640xf32, #tpu.memory_space<vmem>>, vector<2x128xf32>
    tpu.vector_store %arg12[%c2_19, %c0_20], %16 {strides = array<i32>} : memref<32x640xf32, #tpu.memory_space<vmem>>, vector<2x128xf32>,
    %c0_21 = arith.constant 0 : index
    %c3_22 = arith.constant 3 : index
    %c0_23 = arith.constant 0 : index
    %18 = vector.load %arg1[%c0_21, %c3_22, %c0_23] : memref<2x36x128xf32, #tpu.memory_space<vmem>>, vector<2x1x128xf32>
    %19 = vector.shape_cast %18 : vector<2x1x128xf32> to vector<2x128xf32>
    %c2_24 = arith.constant 2 : index
    %c128_25 = arith.constant 128 : index
    %20 = vector.load %arg12[%c2_24, %c128_25] : memref<32x640xf32, #tpu.memory_space<vmem>>, vector<2x128xf32>
    tpu.vector_store %arg12[%c2_24, %c128_25], %19 {strides = array<i32>} : memref<32x640xf32, #tpu.memory_space<vmem>>, vector<2x128xf32>,
    %c0_26 = arith.constant 0 : index
    %c4_27 = arith.constant 4 : index
    %c0_28 = arith.constant 0 : index
    %21 = vector.load %arg1[%c0_26, %c4_27, %c0_28] : memref<2x36x128xf32, #tpu.memory_space<vmem>>, vector<2x1x128xf32>
    %22 = vector.shape_cast %21 : vector<2x1x128xf32> to vector<2x128xf32>
    %c2_29 = arith.constant 2 : index
    %c256_30 = arith.constant 256 : index
    %23 = vector.load %arg12[%c2_29, %c256_30] : memref<32x640xf32, #tpu.memory_space<vmem>>, vector<2x128xf32>
    tpu.vector_store %arg12[%c2_29, %c256_30], %22 {strides = array<i32>} : memref<32x640xf32, #tpu.memory_space<vmem>>, vector<2x128xf32>,
    %c0_31 = arith.constant 0 : index
    %c5 = arith.constant 5 : index
    %c0_32 = arith.constant 0 : index
    %24 = vector.load %arg1[%c0_31, %c5, %c0_32] : memref<2x36x128xf32, #tpu.memory_space<vmem>>, vector<2x1x128xf32>
    %25 = vector.shape_cast %24 : vector<2x1x128xf32> to vector<2x128xf32>
    %c2_33 = arith.constant 2 : index
    %c384_34 = arith.constant 384 : index
    %26 = vector.load %arg12[%c2_33, %c384_34] : memref<32x640xf32, #tpu.memory_space<vmem>>, vector<2x128xf32>
    tpu.vector_store %arg12[%c2_33, %c384_34], %25 {strides = array<i32>} : memref<32x640xf32, #tpu.memory_space<vmem>>, vector<2x128xf32>,
    %c0_35 = arith.constant 0 : index
    %c6 = arith.constant 6 : index
    %c0_36 = arith.constant 0 : index
    %27 = vector.load %arg1[%c0_35, %c6, %c0_36] : memref<2x36x128xf32, #tpu.memory_space<vmem>>, vector<2x1x128xf32>
    %28 = vector.shape_cast %27 : vector<2x1x128xf32> to vector<2x128xf32>
    %c2_37 = arith.constant 2 : index
    %c512_38 = arith.constant 512 : index
    %29 = vector.load %arg12[%c2_37, %c512_38] : memref<32x640xf32, #tpu.memory_space<vmem>>, vector<2x128xf32>
    tpu.vector_store %arg12[%c2_37, %c512_38], %28 {strides = array<i32>} : memref<32x640xf32, #tpu.memory_space<vmem>>, vector<2x128xf32>,
    %c0_39 = arith.constant 0 : index
    %c4_40 = arith.constant 4 : index
    %c0_41 = arith.constant 0 : index
    %30 = vector.load %arg1[%c0_39, %c4_40, %c0_41] : memref<2x36x128xf32, #tpu.memory_space<vmem>>, vector<2x1x128xf32>
    %31 = vector.shape_cast %30 : vector<2x1x128xf32> to vector<2x128xf32>
    %c4_42 = arith.constant 4 : index
    %c0_43 = arith.constant 0 : index
    %32 = vector.load %arg12[%c4_42, %c0_43] : memref<32x640xf32, #tpu.memory_space<vmem>>, vector<2x128xf32>
    tpu.vector_store %arg12[%c4_42, %c0_43], %31 {strides = array<i32>} : memref<32x640xf32, #tpu.memory_space<vmem>>, vector<2x128xf32>,
    %c0_44 = arith.constant 0 : index
    %c5_45 = arith.constant 5 : index
    %c0_46 = arith.constant 0 : index
    %33 = vector.load %arg1[%c0_44, %c5_45, %c0_46] : memref<2x36x128xf32, #tpu.memory_space<vmem>>, vector<2x1x128xf32>
    %34 = vector.shape_cast %33 : vector<2x1x128xf32> to vector<2x128xf32>
    %c4_47 = arith.constant 4 : index
    %c128_48 = arith.constant 128 : index
    %35 = vector.load %arg12[%c4_47, %c128_48] : memref<32x640xf32, #tpu.memory_space<vmem>>, vector<2x128xf32>
    tpu.vector_store %arg12[%c4_47, %c128_48], %34 {strides = array<i32>} : memref<32x640xf32, #tpu.memory_space<vmem>>, vector<2x128xf32>,
    %c0_49 = arith.constant 0 : index
    %c6_50 = arith.constant 6 : index
    %c0_51 = arith.constant 0 : index
    %36 = vector.load %arg1[%c0_49, %c6_50, %c0_51] : memref<2x36x128xf32, #tpu.memory_space<vmem>>, vector<2x1x128xf32>
    %37 = vector.shape_cast %36 : vector<2x1x128xf32> to vector<2x128xf32>
    %c4_52 = arith.constant 4 : index
    %c256_53 = arith.constant 256 : index
    %38 = vector.load %arg12[%c4_52, %c256_53] : memref<32x640xf32, #tpu.memory_space<vmem>>, vector<2x128xf32>
    tpu.vector_store %arg12[%c4_52, %c256_53], %37 {strides = array<i32>} : memref<32x640xf32, #tpu.memory_space<vmem>>, vector<2x128xf32>,
    %c0_54 = arith.constant 0 : index
    %c7 = arith.constant 7 : index
    %c0_55 = arith.constant 0 : index
    %39 = vector.load %arg1[%c0_54, %c7, %c0_55] : memref<2x36x128xf32, #tpu.memory_space<vmem>>, vector<2x1x128xf32>
    %40 = vector.shape_cast %39 : vector<2x1x128xf32> to vector<2x128xf32>
    %c4_56 = arith.constant 4 : index
    %c384_57 = arith.constant 384 : index
    %41 = vector.load %arg12[%c4_56, %c384_57] : memref<32x640xf32, #tpu.memory_space<vmem>>, vector<2x128xf32>
    tpu.vector_store %arg12[%c4_56, %c384_57], %40 {strides = array<i32>} : memref<32x640xf32, #tpu.memory_space<vmem>>, vector<2x128xf32>,
    %c0_58 = arith.constant 0 : index
    %c8 = arith.constant 8 : index
    %c0_59 = arith.constant 0 : index
    %42 = vector.load %arg1[%c0_58, %c8, %c0_59] : memref<2x36x128xf32, #tpu.memory_space<vmem>>, vector<2x1x128xf32>
    %43 = vector.shape_cast %42 : vector<2x1x128xf32> to vector<2x128xf32>
    %c4_60 = arith.constant 4 : index
    %c512_61 = arith.constant 512 : index
    %44 = vector.load %arg12[%c4_60, %c512_61] : memref<32x640xf32, #tpu.memory_space<vmem>>, vector<2x128xf32>
    tpu.vector_store %arg12[%c4_60, %c512_61], %43 {strides = array<i32>} : memref<32x640xf32, #tpu.memory_space<vmem>>, vector<2x128xf32>,
    %c0_62 = arith.constant 0 : index
    %c6_63 = arith.constant 6 : index
    %c0_64 = arith.constant 0 : index
    %45 = vector.load %arg1[%c0_62, %c6_63, %c0_64] : memref<2x36x128xf32, #tpu.memory_space<vmem>>, vector<2x1x128xf32>
    %46 = vector.shape_cast %45 : vector<2x1x128xf32> to vector<2x128xf32>
    %c6_65 = arith.constant 6 : index
    %c0_66 = arith.constant 0 : index
    %47 = vector.load %arg12[%c6_65, %c0_66] : memref<32x640xf32, #tpu.memory_space<vmem>>, vector<2x128xf32>
    tpu.vector_store %arg12[%c6_65, %c0_66], %46 {strides = array<i32>} : memref<32x640xf32, #tpu.memory_space<vmem>>, vector<2x128xf32>,
    %c0_67 = arith.constant 0 : index
    %c7_68 = arith.constant 7 : index
    %c0_69 = arith.constant 0 : index
    %48 = vector.load %arg1[%c0_67, %c7_68, %c0_69] : memref<2x36x128xf32, #tpu.memory_space<vmem>>, vector<2x1x128xf32>
    %49 = vector.shape_cast %48 : vector<2x1x128xf32> to vector<2x128xf32>
    %c6_70 = arith.constant 6 : index
    %c128_71 = arith.constant 128 : index
    %50 = vector.load %arg12[%c6_70, %c128_71] : memref<32x640xf32, #tpu.memory_space<vmem>>, vector<2x128xf32>
    tpu.vector_store %arg12[%c6_70, %c128_71], %49 {strides = array<i32>} : memref<32x640xf32, #tpu.memory_space<vmem>>, vector<2x128xf32>,
    %c0_72 = arith.constant 0 : index
    %c8_73 = arith.constant 8 : index
    %c0_74 = arith.constant 0 : index
    %51 = vector.load %arg1[%c0_72, %c8_73, %c0_74] : memref<2x36x128xf32, #tpu.memory_space<vmem>>, vector<2x1x128xf32>
    %52 = vector.shape_cast %51 : vector<2x1x128xf32> to vector<2x128xf32>
    %c6_75 = arith.constant 6 : index
    %c256_76 = arith.constant 256 : index
    %53 = vector.load %arg12[%c6_75, %c256_76] : memref<32x640xf32, #tpu.memory_space<vmem>>, vector<2x128xf32>
    tpu.vector_store %arg12[%c6_75, %c256_76], %52 {strides = array<i32>} : memref<32x640xf32, #tpu.memory_space<vmem>>, vector<2x128xf32>,
    %c0_77 = arith.constant 0 : index
    %c9 = arith.constant 9 : index
    %c0_78 = arith.constant 0 : index
    %54 = vector.load %arg1[%c0_77, %c9, %c0_78] : memref<2x36x128xf32, #tpu.memory_space<vmem>>, vector<2x1x128xf32>
    %55 = vector.shape_cast %54 : vector<2x1x128xf32> to vector<2x128xf32>
    %c6_79 = arith.constant 6 : index
    %c384_80 = arith.constant 384 : index
    %56 = vector.load %arg12[%c6_79, %c384_80] : memref<32x640xf32, #tpu.memory_space<vmem>>, vector<2x128xf32>
    tpu.vector_store %arg12[%c6_79, %c384_80], %55 {strides = array<i32>} : memref<32x640xf32, #tpu.memory_space<vmem>>, vector<2x128xf32>,
    %c0_81 = arith.constant 0 : index
    %c10 = arith.constant 10 : index
    %c0_82 = arith.constant 0 : index
    %57 = vector.load %arg1[%c0_81, %c10, %c0_82] : memref<2x36x128xf32, #tpu.memory_space<vmem>>, vector<2x1x128xf32>
    %58 = vector.shape_cast %57 : vector<2x1x128xf32> to vector<2x128xf32>
    %c6_83 = arith.constant 6 : index
    %c512_84 = arith.constant 512 : index
    %59 = vector.load %arg12[%c6_83, %c512_84] : memref<32x640xf32, #tpu.memory_space<vmem>>, vector<2x128xf32>
    tpu.vector_store %arg12[%c6_83, %c512_84], %58 {strides = array<i32>} : memref<32x640xf32, #tpu.memory_space<vmem>>, vector<2x128xf32>,
    %c0_85 = arith.constant 0 : index
    %c8_86 = arith.constant 8 : index
    %c0_87 = arith.constant 0 : index
    %60 = vector.load %arg1[%c0_85, %c8_86, %c0_87] : memref<2x36x128xf32, #tpu.memory_space<vmem>>, vector<2x1x128xf32>
    %61 = vector.shape_cast %60 : vector<2x1x128xf32> to vector<2x128xf32>
    %c8_88 = arith.constant 8 : index
    %c0_89 = arith.constant 0 : index
    %62 = vector.load %arg12[%c8_88, %c0_89] : memref<32x640xf32, #tpu.memory_space<vmem>>, vector<2x128xf32>
    tpu.vector_store %arg12[%c8_88, %c0_89], %61 {strides = array<i32>} : memref<32x640xf32, #tpu.memory_space<vmem>>, vector<2x128xf32>,
    %c0_90 = arith.constant 0 : index
    %c9_91 = arith.constant 9 : index
    %c0_92 = arith.constant 0 : index
    %63 = vector.load %arg1[%c0_90, %c9_91, %c0_92] : memref<2x36x128xf32, #tpu.memory_space<vmem>>, vector<2x1x128xf32>
    %64 = vector.shape_cast %63 : vector<2x1x128xf32> to vector<2x128xf32>
    %c8_93 = arith.constant 8 : index
    %c128_94 = arith.constant 128 : index
    %65 = vector.load %arg12[%c8_93, %c128_94] : memref<32x640xf32, #tpu.memory_space<vmem>>, vector<2x128xf32>
    tpu.vector_store %arg12[%c8_93, %c128_94], %64 {strides = array<i32>} : memref<32x640xf32, #tpu.memory_space<vmem>>, vector<2x128xf32>,
    %c0_95 = arith.constant 0 : index
    %c10_96 = arith.constant 10 : index
    %c0_97 = arith.constant 0 : index
    %66 = vector.load %arg1[%c0_95, %c10_96, %c0_97] : memref<2x36x128xf32, #tpu.memory_space<vmem>>, vector<2x1x128xf32>
    %67 = vector.shape_cast %66 : vector<2x1x128xf32> to vector<2x128xf32>
    %c8_98 = arith.constant 8 : index
    %c256_99 = arith.constant 256 : index
    %68 = vector.load %arg12[%c8_98, %c256_99] : memref<32x640xf32, #tpu.memory_space<vmem>>, vector<2x128xf32>
    tpu.vector_store %arg12[%c8_98, %c256_99], %67 {strides = array<i32>} : memref<32x640xf32, #tpu.memory_space<vmem>>, vector<2x128xf32>,
    %c0_100 = arith.constant 0 : index
    %c11 = arith.constant 11 : index
    %c0_101 = arith.constant 0 : index
    %69 = vector.load %arg1[%c0_100, %c11, %c0_101] : memref<2x36x128xf32, #tpu.memory_space<vmem>>, vector<2x1x128xf32>
    %70 = vector.shape_cast %69 : vector<2x1x128xf32> to vector<2x128xf32>
    %c8_102 = arith.constant 8 : index
    %c384_103 = arith.constant 384 : index
    %71 = vector.load %arg12[%c8_102, %c384_103] : memref<32x640xf32, #tpu.memory_space<vmem>>, vector<2x128xf32>
    tpu.vector_store %arg12[%c8_102, %c384_103], %70 {strides = array<i32>} : memref<32x640xf32, #tpu.memory_space<vmem>>, vector<2x128xf32>,
    %c0_104 = arith.constant 0 : index
    %c12 = arith.constant 12 : index
    %c0_105 = arith.constant 0 : index
    %72 = vector.load %arg1[%c0_104, %c12, %c0_105] : memref<2x36x128xf32, #tpu.memory_space<vmem>>, vector<2x1x128xf32>
    %73 = vector.shape_cast %72 : vector<2x1x128xf32> to vector<2x128xf32>
    %c8_106 = arith.constant 8 : index
    %c512_107 = arith.constant 512 : index
    %74 = vector.load %arg12[%c8_106, %c512_107] : memref<32x640xf32, #tpu.memory_space<vmem>>, vector<2x128xf32>
    tpu.vector_store %arg12[%c8_106, %c512_107], %73 {strides = array<i32>} : memref<32x640xf32, #tpu.memory_space<vmem>>, vector<2x128xf32>,
    %c0_108 = arith.constant 0 : index
    %c10_109 = arith.constant 10 : index
    %c0_110 = arith.constant 0 : index
    %75 = vector.load %arg1[%c0_108, %c10_109, %c0_110] : memref<2x36x128xf32, #tpu.memory_space<vmem>>, vector<2x1x128xf32>
    %76 = vector.shape_cast %75 : vector<2x1x128xf32> to vector<2x128xf32>
    %c10_111 = arith.constant 10 : index
    %c0_112 = arith.constant 0 : index
    %77 = vector.load %arg12[%c10_111, %c0_112] : memref<32x640xf32, #tpu.memory_space<vmem>>, vector<2x128xf32>
    tpu.vector_store %arg12[%c10_111, %c0_112], %76 {strides = array<i32>} : memref<32x640xf32, #tpu.memory_space<vmem>>, vector<2x128xf32>,
    %c0_113 = arith.constant 0 : index
    %c11_114 = arith.constant 11 : index
    %c0_115 = arith.constant 0 : index
    %78 = vector.load %arg1[%c0_113, %c11_114, %c0_115] : memref<2x36x128xf32, #tpu.memory_space<vmem>>, vector<2x1x128xf32>
    %79 = vector.shape_cast %78 : vector<2x1x128xf32> to vector<2x128xf32>
    %c10_116 = arith.constant 10 : index
    %c128_117 = arith.constant 128 : index
    %80 = vector.load %arg12[%c10_116, %c128_117] : memref<32x640xf32, #tpu.memory_space<vmem>>, vector<2x128xf32>
    tpu.vector_store %arg12[%c10_116, %c128_117], %79 {strides = array<i32>} : memref<32x640xf32, #tpu.memory_space<vmem>>, vector<2x128xf32>,
    %c0_118 = arith.constant 0 : index
    %c12_119 = arith.constant 12 : index
    %c0_120 = arith.constant 0 : index
    %81 = vector.load %arg1[%c0_118, %c12_119, %c0_120] : memref<2x36x128xf32, #tpu.memory_space<vmem>>, vector<2x1x128xf32>
    %82 = vector.shape_cast %81 : vector<2x1x128xf32> to vector<2x128xf32>
    %c10_121 = arith.constant 10 : index
    %c256_122 = arith.constant 256 : index
    %83 = vector.load %arg12[%c10_121, %c256_122] : memref<32x640xf32, #tpu.memory_space<vmem>>, vector<2x128xf32>
    tpu.vector_store %arg12[%c10_121, %c256_122], %82 {strides = array<i32>} : memref<32x640xf32, #tpu.memory_space<vmem>>, vector<2x128xf32>,
    %c0_123 = arith.constant 0 : index
    %c13 = arith.constant 13 : index
    %c0_124 = arith.constant 0 : index
    %84 = vector.load %arg1[%c0_123, %c13, %c0_124] : memref<2x36x128xf32, #tpu.memory_space<vmem>>, vector<2x1x128xf32>
    %85 = vector.shape_cast %84 : vector<2x1x128xf32> to vector<2x128xf32>
    %c10_125 = arith.constant 10 : index
    %c384_126 = arith.constant 384 : index
    %86 = vector.load %arg12[%c10_125, %c384_126] : memref<32x640xf32, #tpu.memory_space<vmem>>, vector<2x128xf32>
    tpu.vector_store %arg12[%c10_125, %c384_126], %85 {strides = array<i32>} : memref<32x640xf32, #tpu.memory_space<vmem>>, vector<2x128xf32>,
    %c0_127 = arith.constant 0 : index
    %c14 = arith.constant 14 : index
    %c0_128 = arith.constant 0 : index
    %87 = vector.load %arg1[%c0_127, %c14, %c0_128] : memref<2x36x128xf32, #tpu.memory_space<vmem>>, vector<2x1x128xf32>
    %88 = vector.shape_cast %87 : vector<2x1x128xf32> to vector<2x128xf32>
    %c10_129 = arith.constant 10 : index
    %c512_130 = arith.constant 512 : index
    %89 = vector.load %arg12[%c10_129, %c512_130] : memref<32x640xf32, #tpu.memory_space<vmem>>, vector<2x128xf32>
    tpu.vector_store %arg12[%c10_129, %c512_130], %88 {strides = array<i32>} : memref<32x640xf32, #tpu.memory_space<vmem>>, vector<2x128xf32>,
    %c0_131 = arith.constant 0 : index
    %c12_132 = arith.constant 12 : index
    %c0_133 = arith.constant 0 : index
    %90 = vector.load %arg1[%c0_131, %c12_132, %c0_133] : memref<2x36x128xf32, #tpu.memory_space<vmem>>, vector<2x1x128xf32>
    %91 = vector.shape_cast %90 : vector<2x1x128xf32> to vector<2x128xf32>
    %c12_134 = arith.constant 12 : index
    %c0_135 = arith.constant 0 : index
    %92 = vector.load %arg12[%c12_134, %c0_135] : memref<32x640xf32, #tpu.memory_space<vmem>>, vector<2x128xf32>
    tpu.vector_store %arg12[%c12_134, %c0_135], %91 {strides = array<i32>} : memref<32x640xf32, #tpu.memory_space<vmem>>, vector<2x128xf32>,
    %c0_136 = arith.constant 0 : index
    %c13_137 = arith.constant 13 : index
    %c0_138 = arith.constant 0 : index
    %93 = vector.load %arg1[%c0_136, %c13_137, %c0_138] : memref<2x36x128xf32, #tpu.memory_space<vmem>>, vector<2x1x128xf32>
    %94 = vector.shape_cast %93 : vector<2x1x128xf32> to vector<2x128xf32>
    %c12_139 = arith.constant 12 : index
    %c128_140 = arith.constant 128 : index
    %95 = vector.load %arg12[%c12_139, %c128_140] : memref<32x640xf32, #tpu.memory_space<vmem>>, vector<2x128xf32>
    tpu.vector_store %arg12[%c12_139, %c128_140], %94 {strides = array<i32>} : memref<32x640xf32, #tpu.memory_space<vmem>>, vector<2x128xf32>,
    %c0_141 = arith.constant 0 : index
    %c14_142 = arith.constant 14 : index
    %c0_143 = arith.constant 0 : index
    %96 = vector.load %arg1[%c0_141, %c14_142, %c0_143] : memref<2x36x128xf32, #tpu.memory_space<vmem>>, vector<2x1x128xf32>
    %97 = vector.shape_cast %96 : vector<2x1x128xf32> to vector<2x128xf32>
    %c12_144 = arith.constant 12 : index
    %c256_145 = arith.constant 256 : index
    %98 = vector.load %arg12[%c12_144, %c256_145] : memref<32x640xf32, #tpu.memory_space<vmem>>, vector<2x128xf32>
    tpu.vector_store %arg12[%c12_144, %c256_145], %97 {strides = array<i32>} : memref<32x640xf32, #tpu.memory_space<vmem>>, vector<2x128xf32>,
    %c0_146 = arith.constant 0 : index
    %c15 = arith.constant 15 : index
    %c0_147 = arith.constant 0 : index
    %99 = vector.load %arg1[%c0_146, %c15, %c0_147] : memref<2x36x128xf32, #tpu.memory_space<vmem>>, vector<2x1x128xf32>
    %100 = vector.shape_cast %99 : vector<2x1x128xf32> to vector<2x128xf32>
    %c12_148 = arith.constant 12 : index
    %c384_149 = arith.constant 384 : index
    %101 = vector.load %arg12[%c12_148, %c384_149] : memref<32x640xf32, #tpu.memory_space<vmem>>, vector<2x128xf32>
    tpu.vector_store %arg12[%c12_148, %c384_149], %100 {strides = array<i32>} : memref<32x640xf32, #tpu.memory_space<vmem>>, vector<2x128xf32>,
    %c0_150 = arith.constant 0 : index
    %c16 = arith.constant 16 : index
    %c0_151 = arith.constant 0 : index
    %102 = vector.load %arg1[%c0_150, %c16, %c0_151] : memref<2x36x128xf32, #tpu.memory_space<vmem>>, vector<2x1x128xf32>
    %103 = vector.shape_cast %102 : vector<2x1x128xf32> to vector<2x128xf32>
    %c12_152 = arith.constant 12 : index
    %c512_153 = arith.constant 512 : index
    %104 = vector.load %arg12[%c12_152, %c512_153] : memref<32x640xf32, #tpu.memory_space<vmem>>, vector<2x128xf32>
    tpu.vector_store %arg12[%c12_152, %c512_153], %103 {strides = array<i32>} : memref<32x640xf32, #tpu.memory_space<vmem>>, vector<2x128xf32>,
    %c0_154 = arith.constant 0 : index
    %c14_155 = arith.constant 14 : index
    %c0_156 = arith.constant 0 : index
    %105 = vector.load %arg1[%c0_154, %c14_155, %c0_156] : memref<2x36x128xf32, #tpu.memory_space<vmem>>, vector<2x1x128xf32>
    %106 = vector.shape_cast %105 : vector<2x1x128xf32> to vector<2x128xf32>
    %c14_157 = arith.constant 14 : index
    %c0_158 = arith.constant 0 : index
    %107 = vector.load %arg12[%c14_157, %c0_158] : memref<32x640xf32, #tpu.memory_space<vmem>>, vector<2x128xf32>
    tpu.vector_store %arg12[%c14_157, %c0_158], %106 {strides = array<i32>} : memref<32x640xf32, #tpu.memory_space<vmem>>, vector<2x128xf32>,
    %c0_159 = arith.constant 0 : index
    %c15_160 = arith.constant 15 : index
    %c0_161 = arith.constant 0 : index
    %108 = vector.load %arg1[%c0_159, %c15_160, %c0_161] : memref<2x36x128xf32, #tpu.memory_space<vmem>>, vector<2x1x128xf32>
    %109 = vector.shape_cast %108 : vector<2x1x128xf32> to vector<2x128xf32>
    %c14_162 = arith.constant 14 : index
    %c128_163 = arith.constant 128 : index
    %110 = vector.load %arg12[%c14_162, %c128_163] : memref<32x640xf32, #tpu.memory_space<vmem>>, vector<2x128xf32>
    tpu.vector_store %arg12[%c14_162, %c128_163], %109 {strides = array<i32>} : memref<32x640xf32, #tpu.memory_space<vmem>>, vector<2x128xf32>,
    %c0_164 = arith.constant 0 : index
    %c16_165 = arith.constant 16 : index
    %c0_166 = arith.constant 0 : index
    %111 = vector.load %arg1[%c0_164, %c16_165, %c0_166] : memref<2x36x128xf32, #tpu.memory_space<vmem>>, vector<2x1x128xf32>
    %112 = vector.shape_cast %111 : vector<2x1x128xf32> to vector<2x128xf32>
    %c14_167 = arith.constant 14 : index
    %c256_168 = arith.constant 256 : index
    %113 = vector.load %arg12[%c14_167, %c256_168] : memref<32x640xf32, #tpu.memory_space<vmem>>, vector<2x128xf32>
    tpu.vector_store %arg12[%c14_167, %c256_168], %112 {strides = array<i32>} : memref<32x640xf32, #tpu.memory_space<vmem>>, vector<2x128xf32>,
    %c0_169 = arith.constant 0 : index
    %c17 = arith.constant 17 : index
    %c0_170 = arith.constant 0 : index
    %114 = vector.load %arg1[%c0_169, %c17, %c0_170] : memref<2x36x128xf32, #tpu.memory_space<vmem>>, vector<2x1x128xf32>
    %115 = vector.shape_cast %114 : vector<2x1x128xf32> to vector<2x128xf32>
    %c14_171 = arith.constant 14 : index
    %c384_172 = arith.constant 384 : index
    %116 = vector.load %arg12[%c14_171, %c384_172] : memref<32x640xf32, #tpu.memory_space<vmem>>, vector<2x128xf32>
    tpu.vector_store %arg12[%c14_171, %c384_172], %115 {strides = array<i32>} : memref<32x640xf32, #tpu.memory_space<vmem>>, vector<2x128xf32>,
    %c0_173 = arith.constant 0 : index
    %c18 = arith.constant 18 : index
    %c0_174 = arith.constant 0 : index
    %117 = vector.load %arg1[%c0_173, %c18, %c0_174] : memref<2x36x128xf32, #tpu.memory_space<vmem>>, vector<2x1x128xf32>
    %118 = vector.shape_cast %117 : vector<2x1x128xf32> to vector<2x128xf32>
    %c14_175 = arith.constant 14 : index
    %c512_176 = arith.constant 512 : index
    %119 = vector.load %arg12[%c14_175, %c512_176] : memref<32x640xf32, #tpu.memory_space<vmem>>, vector<2x128xf32>
    tpu.vector_store %arg12[%c14_175, %c512_176], %118 {strides = array<i32>} : memref<32x640xf32, #tpu.memory_space<vmem>>, vector<2x128xf32>,
    %c0_177 = arith.constant 0 : index
    %c16_178 = arith.constant 16 : index
    %c0_179 = arith.constant 0 : index
    %120 = vector.load %arg1[%c0_177, %c16_178, %c0_179] : memref<2x36x128xf32, #tpu.memory_space<vmem>>, vector<2x1x128xf32>
    %121 = vector.shape_cast %120 : vector<2x1x128xf32> to vector<2x128xf32>
    %c16_180 = arith.constant 16 : index
    %c0_181 = arith.constant 0 : index
    %122 = vector.load %arg12[%c16_180, %c0_181] : memref<32x640xf32, #tpu.memory_space<vmem>>, vector<2x128xf32>
    tpu.vector_store %arg12[%c16_180, %c0_181], %121 {strides = array<i32>} : memref<32x640xf32, #tpu.memory_space<vmem>>, vector<2x128xf32>,
    %c0_182 = arith.constant 0 : index
    %c17_183 = arith.constant 17 : index
    %c0_184 = arith.constant 0 : index
    %123 = vector.load %arg1[%c0_182, %c17_183, %c0_184] : memref<2x36x128xf32, #tpu.memory_space<vmem>>, vector<2x1x128xf32>
    %124 = vector.shape_cast %123 : vector<2x1x128xf32> to vector<2x128xf32>
    %c16_185 = arith.constant 16 : index
    %c128_186 = arith.constant 128 : index
    %125 = vector.load %arg12[%c16_185, %c128_186] : memref<32x640xf32, #tpu.memory_space<vmem>>, vector<2x128xf32>
    tpu.vector_store %arg12[%c16_185, %c128_186], %124 {strides = array<i32>} : memref<32x640xf32, #tpu.memory_space<vmem>>, vector<2x128xf32>,
    %c0_187 = arith.constant 0 : index
    %c18_188 = arith.constant 18 : index
    %c0_189 = arith.constant 0 : index
    %126 = vector.load %arg1[%c0_187, %c18_188, %c0_189] : memref<2x36x128xf32, #tpu.memory_space<vmem>>, vector<2x1x128xf32>
    %127 = vector.shape_cast %126 : vector<2x1x128xf32> to vector<2x128xf32>
    %c16_190 = arith.constant 16 : index
    %c256_191 = arith.constant 256 : index
    %128 = vector.load %arg12[%c16_190, %c256_191] : memref<32x640xf32, #tpu.memory_space<vmem>>, vector<2x128xf32>
    tpu.vector_store %arg12[%c16_190, %c256_191], %127 {strides = array<i32>} : memref<32x640xf32, #tpu.memory_space<vmem>>, vector<2x128xf32>,
    %c0_192 = arith.constant 0 : index
    %c19 = arith.constant 19 : index
    %c0_193 = arith.constant 0 : index
    %129 = vector.load %arg1[%c0_192, %c19, %c0_193] : memref<2x36x128xf32, #tpu.memory_space<vmem>>, vector<2x1x128xf32>
    %130 = vector.shape_cast %129 : vector<2x1x128xf32> to vector<2x128xf32>
    %c16_194 = arith.constant 16 : index
    %c384_195 = arith.constant 384 : index
    %131 = vector.load %arg12[%c16_194, %c384_195] : memref<32x640xf32, #tpu.memory_space<vmem>>, vector<2x128xf32>
    tpu.vector_store %arg12[%c16_194, %c384_195], %130 {strides = array<i32>} : memref<32x640xf32, #tpu.memory_space<vmem>>, vector<2x128xf32>,
    %c0_196 = arith.constant 0 : index
    %c20 = arith.constant 20 : index
    %c0_197 = arith.constant 0 : index
    %132 = vector.load %arg1[%c0_196, %c20, %c0_197] : memref<2x36x128xf32, #tpu.memory_space<vmem>>, vector<2x1x128xf32>
    %133 = vector.shape_cast %132 : vector<2x1x128xf32> to vector<2x128xf32>
    %c16_198 = arith.constant 16 : index
    %c512_199 = arith.constant 512 : index
    %134 = vector.load %arg12[%c16_198, %c512_199] : memref<32x640xf32, #tpu.memory_space<vmem>>, vector<2x128xf32>
    tpu.vector_store %arg12[%c16_198, %c512_199], %133 {strides = array<i32>} : memref<32x640xf32, #tpu.memory_space<vmem>>, vector<2x128xf32>,
    %c0_200 = arith.constant 0 : index
    %c18_201 = arith.constant 18 : index
    %c0_202 = arith.constant 0 : index
    %135 = vector.load %arg1[%c0_200, %c18_201, %c0_202] : memref<2x36x128xf32, #tpu.memory_space<vmem>>, vector<2x1x128xf32>
    %136 = vector.shape_cast %135 : vector<2x1x128xf32> to vector<2x128xf32>
    %c18_203 = arith.constant 18 : index
    %c0_204 = arith.constant 0 : index
    %137 = vector.load %arg12[%c18_203, %c0_204] : memref<32x640xf32, #tpu.memory_space<vmem>>, vector<2x128xf32>
    tpu.vector_store %arg12[%c18_203, %c0_204], %136 {strides = array<i32>} : memref<32x640xf32, #tpu.memory_space<vmem>>, vector<2x128xf32>,
    %c0_205 = arith.constant 0 : index
    %c19_206 = arith.constant 19 : index
    %c0_207 = arith.constant 0 : index
    %138 = vector.load %arg1[%c0_205, %c19_206, %c0_207] : memref<2x36x128xf32, #tpu.memory_space<vmem>>, vector<2x1x128xf32>
    %139 = vector.shape_cast %138 : vector<2x1x128xf32> to vector<2x128xf32>
    %c18_208 = arith.constant 18 : index
    %c128_209 = arith.constant 128 : index
    %140 = vector.load %arg12[%c18_208, %c128_209] : memref<32x640xf32, #tpu.memory_space<vmem>>, vector<2x128xf32>
    tpu.vector_store %arg12[%c18_208, %c128_209], %139 {strides = array<i32>} : memref<32x640xf32, #tpu.memory_space<vmem>>, vector<2x128xf32>,
    %c0_210 = arith.constant 0 : index
    %c20_211 = arith.constant 20 : index
    %c0_212 = arith.constant 0 : index
    %141 = vector.load %arg1[%c0_210, %c20_211, %c0_212] : memref<2x36x128xf32, #tpu.memory_space<vmem>>, vector<2x1x128xf32>
    %142 = vector.shape_cast %141 : vector<2x1x128xf32> to vector<2x128xf32>
    %c18_213 = arith.constant 18 : index
    %c256_214 = arith.constant 256 : index
    %143 = vector.load %arg12[%c18_213, %c256_214] : memref<32x640xf32, #tpu.memory_space<vmem>>, vector<2x128xf32>
    tpu.vector_store %arg12[%c18_213, %c256_214], %142 {strides = array<i32>} : memref<32x640xf32, #tpu.memory_space<vmem>>, vector<2x128xf32>,
    %c0_215 = arith.constant 0 : index
    %c21 = arith.constant 21 : index
    %c0_216 = arith.constant 0 : index
    %144 = vector.load %arg1[%c0_215, %c21, %c0_216] : memref<2x36x128xf32, #tpu.memory_space<vmem>>, vector<2x1x128xf32>
    %145 = vector.shape_cast %144 : vector<2x1x128xf32> to vector<2x128xf32>
    %c18_217 = arith.constant 18 : index
    %c384_218 = arith.constant 384 : index
    %146 = vector.load %arg12[%c18_217, %c384_218] : memref<32x640xf32, #tpu.memory_space<vmem>>, vector<2x128xf32>
    tpu.vector_store %arg12[%c18_217, %c384_218], %145 {strides = array<i32>} : memref<32x640xf32, #tpu.memory_space<vmem>>, vector<2x128xf32>,
    %c0_219 = arith.constant 0 : index
    %c22 = arith.constant 22 : index
    %c0_220 = arith.constant 0 : index
    %147 = vector.load %arg1[%c0_219, %c22, %c0_220] : memref<2x36x128xf32, #tpu.memory_space<vmem>>, vector<2x1x128xf32>
    %148 = vector.shape_cast %147 : vector<2x1x128xf32> to vector<2x128xf32>
    %c18_221 = arith.constant 18 : index
    %c512_222 = arith.constant 512 : index
    %149 = vector.load %arg12[%c18_221, %c512_222] : memref<32x640xf32, #tpu.memory_space<vmem>>, vector<2x128xf32>
    tpu.vector_store %arg12[%c18_221, %c512_222], %148 {strides = array<i32>} : memref<32x640xf32, #tpu.memory_space<vmem>>, vector<2x128xf32>,
    %c0_223 = arith.constant 0 : index
    %c20_224 = arith.constant 20 : index
    %c0_225 = arith.constant 0 : index
    %150 = vector.load %arg1[%c0_223, %c20_224, %c0_225] : memref<2x36x128xf32, #tpu.memory_space<vmem>>, vector<2x1x128xf32>
    %151 = vector.shape_cast %150 : vector<2x1x128xf32> to vector<2x128xf32>
    %c20_226 = arith.constant 20 : index
    %c0_227 = arith.constant 0 : index
    %152 = vector.load %arg12[%c20_226, %c0_227] : memref<32x640xf32, #tpu.memory_space<vmem>>, vector<2x128xf32>
    tpu.vector_store %arg12[%c20_226, %c0_227], %151 {strides = array<i32>} : memref<32x640xf32, #tpu.memory_space<vmem>>, vector<2x128xf32>,
    %c0_228 = arith.constant 0 : index
    %c21_229 = arith.constant 21 : index
    %c0_230 = arith.constant 0 : index
    %153 = vector.load %arg1[%c0_228, %c21_229, %c0_230] : memref<2x36x128xf32, #tpu.memory_space<vmem>>, vector<2x1x128xf32>
    %154 = vector.shape_cast %153 : vector<2x1x128xf32> to vector<2x128xf32>
    %c20_231 = arith.constant 20 : index
    %c128_232 = arith.constant 128 : index
    %155 = vector.load %arg12[%c20_231, %c128_232] : memref<32x640xf32, #tpu.memory_space<vmem>>, vector<2x128xf32>
    tpu.vector_store %arg12[%c20_231, %c128_232], %154 {strides = array<i32>} : memref<32x640xf32, #tpu.memory_space<vmem>>, vector<2x128xf32>,
    %c0_233 = arith.constant 0 : index
    %c22_234 = arith.constant 22 : index
    %c0_235 = arith.constant 0 : index
    %156 = vector.load %arg1[%c0_233, %c22_234, %c0_235] : memref<2x36x128xf32, #tpu.memory_space<vmem>>, vector<2x1x128xf32>
    %157 = vector.shape_cast %156 : vector<2x1x128xf32> to vector<2x128xf32>
    %c20_236 = arith.constant 20 : index
    %c256_237 = arith.constant 256 : index
    %158 = vector.load %arg12[%c20_236, %c256_237] : memref<32x640xf32, #tpu.memory_space<vmem>>, vector<2x128xf32>
    tpu.vector_store %arg12[%c20_236, %c256_237], %157 {strides = array<i32>} : memref<32x640xf32, #tpu.memory_space<vmem>>, vector<2x128xf32>,
    %c0_238 = arith.constant 0 : index
    %c23 = arith.constant 23 : index
    %c0_239 = arith.constant 0 : index
    %159 = vector.load %arg1[%c0_238, %c23, %c0_239] : memref<2x36x128xf32, #tpu.memory_space<vmem>>, vector<2x1x128xf32>
    %160 = vector.shape_cast %159 : vector<2x1x128xf32> to vector<2x128xf32>
    %c20_240 = arith.constant 20 : index
    %c384_241 = arith.constant 384 : index
    %161 = vector.load %arg12[%c20_240, %c384_241] : memref<32x640xf32, #tpu.memory_space<vmem>>, vector<2x128xf32>
    tpu.vector_store %arg12[%c20_240, %c384_241], %160 {strides = array<i32>} : memref<32x640xf32, #tpu.memory_space<vmem>>, vector<2x128xf32>,
    %c0_242 = arith.constant 0 : index
    %c24 = arith.constant 24 : index
    %c0_243 = arith.constant 0 : index
    %162 = vector.load %arg1[%c0_242, %c24, %c0_243] : memref<2x36x128xf32, #tpu.memory_space<vmem>>, vector<2x1x128xf32>
    %163 = vector.shape_cast %162 : vector<2x1x128xf32> to vector<2x128xf32>
    %c20_244 = arith.constant 20 : index
    %c512_245 = arith.constant 512 : index
    %164 = vector.load %arg12[%c20_244, %c512_245] : memref<32x640xf32, #tpu.memory_space<vmem>>, vector<2x128xf32>
    tpu.vector_store %arg12[%c20_244, %c512_245], %163 {strides = array<i32>} : memref<32x640xf32, #tpu.memory_space<vmem>>, vector<2x128xf32>,
    %c0_246 = arith.constant 0 : index
    %c22_247 = arith.constant 22 : index
    %c0_248 = arith.constant 0 : index
    %165 = vector.load %arg1[%c0_246, %c22_247, %c0_248] : memref<2x36x128xf32, #tpu.memory_space<vmem>>, vector<2x1x128xf32>
    %166 = vector.shape_cast %165 : vector<2x1x128xf32> to vector<2x128xf32>
    %c22_249 = arith.constant 22 : index
    %c0_250 = arith.constant 0 : index
    %167 = vector.load %arg12[%c22_249, %c0_250] : memref<32x640xf32, #tpu.memory_space<vmem>>, vector<2x128xf32>
    tpu.vector_store %arg12[%c22_249, %c0_250], %166 {strides = array<i32>} : memref<32x640xf32, #tpu.memory_space<vmem>>, vector<2x128xf32>,
    %c0_251 = arith.constant 0 : index
    %c23_252 = arith.constant 23 : index
    %c0_253 = arith.constant 0 : index
    %168 = vector.load %arg1[%c0_251, %c23_252, %c0_253] : memref<2x36x128xf32, #tpu.memory_space<vmem>>, vector<2x1x128xf32>
    %169 = vector.shape_cast %168 : vector<2x1x128xf32> to vector<2x128xf32>
    %c22_254 = arith.constant 22 : index
    %c128_255 = arith.constant 128 : index
    %170 = vector.load %arg12[%c22_254, %c128_255] : memref<32x640xf32, #tpu.memory_space<vmem>>, vector<2x128xf32>
    tpu.vector_store %arg12[%c22_254, %c128_255], %169 {strides = array<i32>} : memref<32x640xf32, #tpu.memory_space<vmem>>, vector<2x128xf32>,
    %c0_256 = arith.constant 0 : index
    %c24_257 = arith.constant 24 : index
    %c0_258 = arith.constant 0 : index
    %171 = vector.load %arg1[%c0_256, %c24_257, %c0_258] : memref<2x36x128xf32, #tpu.memory_space<vmem>>, vector<2x1x128xf32>
    %172 = vector.shape_cast %171 : vector<2x1x128xf32> to vector<2x128xf32>
    %c22_259 = arith.constant 22 : index
    %c256_260 = arith.constant 256 : index
    %173 = vector.load %arg12[%c22_259, %c256_260] : memref<32x640xf32, #tpu.memory_space<vmem>>, vector<2x128xf32>
    tpu.vector_store %arg12[%c22_259, %c256_260], %172 {strides = array<i32>} : memref<32x640xf32, #tpu.memory_space<vmem>>, vector<2x128xf32>,
    %c0_261 = arith.constant 0 : index
    %c25 = arith.constant 25 : index
    %c0_262 = arith.constant 0 : index
    %174 = vector.load %arg1[%c0_261, %c25, %c0_262] : memref<2x36x128xf32, #tpu.memory_space<vmem>>, vector<2x1x128xf32>
    %175 = vector.shape_cast %174 : vector<2x1x128xf32> to vector<2x128xf32>
    %c22_263 = arith.constant 22 : index
    %c384_264 = arith.constant 384 : index
    %176 = vector.load %arg12[%c22_263, %c384_264] : memref<32x640xf32, #tpu.memory_space<vmem>>, vector<2x128xf32>
    tpu.vector_store %arg12[%c22_263, %c384_264], %175 {strides = array<i32>} : memref<32x640xf32, #tpu.memory_space<vmem>>, vector<2x128xf32>,
    %c0_265 = arith.constant 0 : index
    %c26 = arith.constant 26 : index
    %c0_266 = arith.constant 0 : index
    %177 = vector.load %arg1[%c0_265, %c26, %c0_266] : memref<2x36x128xf32, #tpu.memory_space<vmem>>, vector<2x1x128xf32>
    %178 = vector.shape_cast %177 : vector<2x1x128xf32> to vector<2x128xf32>
    %c22_267 = arith.constant 22 : index
    %c512_268 = arith.constant 512 : index
    %179 = vector.load %arg12[%c22_267, %c512_268] : memref<32x640xf32, #tpu.memory_space<vmem>>, vector<2x128xf32>
    tpu.vector_store %arg12[%c22_267, %c512_268], %178 {strides = array<i32>} : memref<32x640xf32, #tpu.memory_space<vmem>>, vector<2x128xf32>,
    %c0_269 = arith.constant 0 : index
    %c24_270 = arith.constant 24 : index
    %c0_271 = arith.constant 0 : index
    %180 = vector.load %arg1[%c0_269, %c24_270, %c0_271] : memref<2x36x128xf32, #tpu.memory_space<vmem>>, vector<2x1x128xf32>
    %181 = vector.shape_cast %180 : vector<2x1x128xf32> to vector<2x128xf32>
    %c24_272 = arith.constant 24 : index
    %c0_273 = arith.constant 0 : index
    %182 = vector.load %arg12[%c24_272, %c0_273] : memref<32x640xf32, #tpu.memory_space<vmem>>, vector<2x128xf32>
    tpu.vector_store %arg12[%c24_272, %c0_273], %181 {strides = array<i32>} : memref<32x640xf32, #tpu.memory_space<vmem>>, vector<2x128xf32>,
    %c0_274 = arith.constant 0 : index
    %c25_275 = arith.constant 25 : index
    %c0_276 = arith.constant 0 : index
    %183 = vector.load %arg1[%c0_274, %c25_275, %c0_276] : memref<2x36x128xf32, #tpu.memory_space<vmem>>, vector<2x1x128xf32>
    %184 = vector.shape_cast %183 : vector<2x1x128xf32> to vector<2x128xf32>
    %c24_277 = arith.constant 24 : index
    %c128_278 = arith.constant 128 : index
    %185 = vector.load %arg12[%c24_277, %c128_278] : memref<32x640xf32, #tpu.memory_space<vmem>>, vector<2x128xf32>
    tpu.vector_store %arg12[%c24_277, %c128_278], %184 {strides = array<i32>} : memref<32x640xf32, #tpu.memory_space<vmem>>, vector<2x128xf32>,
    %c0_279 = arith.constant 0 : index
    %c26_280 = arith.constant 26 : index
    %c0_281 = arith.constant 0 : index
    %186 = vector.load %arg1[%c0_279, %c26_280, %c0_281] : memref<2x36x128xf32, #tpu.memory_space<vmem>>, vector<2x1x128xf32>
    %187 = vector.shape_cast %186 : vector<2x1x128xf32> to vector<2x128xf32>
    %c24_282 = arith.constant 24 : index
    %c256_283 = arith.constant 256 : index
    %188 = vector.load %arg12[%c24_282, %c256_283] : memref<32x640xf32, #tpu.memory_space<vmem>>, vector<2x128xf32>
    tpu.vector_store %arg12[%c24_282, %c256_283], %187 {strides = array<i32>} : memref<32x640xf32, #tpu.memory_space<vmem>>, vector<2x128xf32>,
    %c0_284 = arith.constant 0 : index
    %c27 = arith.constant 27 : index
    %c0_285 = arith.constant 0 : index
    %189 = vector.load %arg1[%c0_284, %c27, %c0_285] : memref<2x36x128xf32, #tpu.memory_space<vmem>>, vector<2x1x128xf32>
    %190 = vector.shape_cast %189 : vector<2x1x128xf32> to vector<2x128xf32>
    %c24_286 = arith.constant 24 : index
    %c384_287 = arith.constant 384 : index
    %191 = vector.load %arg12[%c24_286, %c384_287] : memref<32x640xf32, #tpu.memory_space<vmem>>, vector<2x128xf32>
    tpu.vector_store %arg12[%c24_286, %c384_287], %190 {strides = array<i32>} : memref<32x640xf32, #tpu.memory_space<vmem>>, vector<2x128xf32>,
    %c0_288 = arith.constant 0 : index
    %c28 = arith.constant 28 : index
    %c0_289 = arith.constant 0 : index
    %192 = vector.load %arg1[%c0_288, %c28, %c0_289] : memref<2x36x128xf32, #tpu.memory_space<vmem>>, vector<2x1x128xf32>
    %193 = vector.shape_cast %192 : vector<2x1x128xf32> to vector<2x128xf32>
    %c24_290 = arith.constant 24 : index
    %c512_291 = arith.constant 512 : index
    %194 = vector.load %arg12[%c24_290, %c512_291] : memref<32x640xf32, #tpu.memory_space<vmem>>, vector<2x128xf32>
    tpu.vector_store %arg12[%c24_290, %c512_291], %193 {strides = array<i32>} : memref<32x640xf32, #tpu.memory_space<vmem>>, vector<2x128xf32>,
    %c0_292 = arith.constant 0 : index
    %c26_293 = arith.constant 26 : index
    %c0_294 = arith.constant 0 : index
    %195 = vector.load %arg1[%c0_292, %c26_293, %c0_294] : memref<2x36x128xf32, #tpu.memory_space<vmem>>, vector<2x1x128xf32>
    %196 = vector.shape_cast %195 : vector<2x1x128xf32> to vector<2x128xf32>
    %c26_295 = arith.constant 26 : index
    %c0_296 = arith.constant 0 : index
    %197 = vector.load %arg12[%c26_295, %c0_296] : memref<32x640xf32, #tpu.memory_space<vmem>>, vector<2x128xf32>
    tpu.vector_store %arg12[%c26_295, %c0_296], %196 {strides = array<i32>} : memref<32x640xf32, #tpu.memory_space<vmem>>, vector<2x128xf32>,
    %c0_297 = arith.constant 0 : index
    %c27_298 = arith.constant 27 : index
    %c0_299 = arith.constant 0 : index
    %198 = vector.load %arg1[%c0_297, %c27_298, %c0_299] : memref<2x36x128xf32, #tpu.memory_space<vmem>>, vector<2x1x128xf32>
    %199 = vector.shape_cast %198 : vector<2x1x128xf32> to vector<2x128xf32>
    %c26_300 = arith.constant 26 : index
    %c128_301 = arith.constant 128 : index
    %200 = vector.load %arg12[%c26_300, %c128_301] : memref<32x640xf32, #tpu.memory_space<vmem>>, vector<2x128xf32>
    tpu.vector_store %arg12[%c26_300, %c128_301], %199 {strides = array<i32>} : memref<32x640xf32, #tpu.memory_space<vmem>>, vector<2x128xf32>,
    %c0_302 = arith.constant 0 : index
    %c28_303 = arith.constant 28 : index
    %c0_304 = arith.constant 0 : index
    %201 = vector.load %arg1[%c0_302, %c28_303, %c0_304] : memref<2x36x128xf32, #tpu.memory_space<vmem>>, vector<2x1x128xf32>
    %202 = vector.shape_cast %201 : vector<2x1x128xf32> to vector<2x128xf32>
    %c26_305 = arith.constant 26 : index
    %c256_306 = arith.constant 256 : index
    %203 = vector.load %arg12[%c26_305, %c256_306] : memref<32x640xf32, #tpu.memory_space<vmem>>, vector<2x128xf32>
    tpu.vector_store %arg12[%c26_305, %c256_306], %202 {strides = array<i32>} : memref<32x640xf32, #tpu.memory_space<vmem>>, vector<2x128xf32>,
    %c0_307 = arith.constant 0 : index
    %c29 = arith.constant 29 : index
    %c0_308 = arith.constant 0 : index
    %204 = vector.load %arg1[%c0_307, %c29, %c0_308] : memref<2x36x128xf32, #tpu.memory_space<vmem>>, vector<2x1x128xf32>
    %205 = vector.shape_cast %204 : vector<2x1x128xf32> to vector<2x128xf32>
    %c26_309 = arith.constant 26 : index
    %c384_310 = arith.constant 384 : index
    %206 = vector.load %arg12[%c26_309, %c384_310] : memref<32x640xf32, #tpu.memory_space<vmem>>, vector<2x128xf32>
    tpu.vector_store %arg12[%c26_309, %c384_310], %205 {strides = array<i32>} : memref<32x640xf32, #tpu.memory_space<vmem>>, vector<2x128xf32>,
    %c0_311 = arith.constant 0 : index
    %c30 = arith.constant 30 : index
    %c0_312 = arith.constant 0 : index
    %207 = vector.load %arg1[%c0_311, %c30, %c0_312] : memref<2x36x128xf32, #tpu.memory_space<vmem>>, vector<2x1x128xf32>
    %208 = vector.shape_cast %207 : vector<2x1x128xf32> to vector<2x128xf32>
    %c26_313 = arith.constant 26 : index
    %c512_314 = arith.constant 512 : index
    %209 = vector.load %arg12[%c26_313, %c512_314] : memref<32x640xf32, #tpu.memory_space<vmem>>, vector<2x128xf32>
    tpu.vector_store %arg12[%c26_313, %c512_314], %208 {strides = array<i32>} : memref<32x640xf32, #tpu.memory_space<vmem>>, vector<2x128xf32>,
    %c0_315 = arith.constant 0 : index
    %c28_316 = arith.constant 28 : index
    %c0_317 = arith.constant 0 : index
    %210 = vector.load %arg1[%c0_315, %c28_316, %c0_317] : memref<2x36x128xf32, #tpu.memory_space<vmem>>, vector<2x1x128xf32>
    %211 = vector.shape_cast %210 : vector<2x1x128xf32> to vector<2x128xf32>
    %c28_318 = arith.constant 28 : index
    %c0_319 = arith.constant 0 : index
    %212 = vector.load %arg12[%c28_318, %c0_319] : memref<32x640xf32, #tpu.memory_space<vmem>>, vector<2x128xf32>
    tpu.vector_store %arg12[%c28_318, %c0_319], %211 {strides = array<i32>} : memref<32x640xf32, #tpu.memory_space<vmem>>, vector<2x128xf32>,
    %c0_320 = arith.constant 0 : index
    %c29_321 = arith.constant 29 : index
    %c0_322 = arith.constant 0 : index
    %213 = vector.load %arg1[%c0_320, %c29_321, %c0_322] : memref<2x36x128xf32, #tpu.memory_space<vmem>>, vector<2x1x128xf32>
    %214 = vector.shape_cast %213 : vector<2x1x128xf32> to vector<2x128xf32>
    %c28_323 = arith.constant 28 : index
    %c128_324 = arith.constant 128 : index
    %215 = vector.load %arg12[%c28_323, %c128_324] : memref<32x640xf32, #tpu.memory_space<vmem>>, vector<2x128xf32>
    tpu.vector_store %arg12[%c28_323, %c128_324], %214 {strides = array<i32>} : memref<32x640xf32, #tpu.memory_space<vmem>>, vector<2x128xf32>,
    %c0_325 = arith.constant 0 : index
    %c30_326 = arith.constant 30 : index
    %c0_327 = arith.constant 0 : index
    %216 = vector.load %arg1[%c0_325, %c30_326, %c0_327] : memref<2x36x128xf32, #tpu.memory_space<vmem>>, vector<2x1x128xf32>
    %217 = vector.shape_cast %216 : vector<2x1x128xf32> to vector<2x128xf32>
    %c28_328 = arith.constant 28 : index
    %c256_329 = arith.constant 256 : index
    %218 = vector.load %arg12[%c28_328, %c256_329] : memref<32x640xf32, #tpu.memory_space<vmem>>, vector<2x128xf32>
    tpu.vector_store %arg12[%c28_328, %c256_329], %217 {strides = array<i32>} : memref<32x640xf32, #tpu.memory_space<vmem>>, vector<2x128xf32>,
    %c0_330 = arith.constant 0 : index
    %c31 = arith.constant 31 : index
    %c0_331 = arith.constant 0 : index
    %219 = vector.load %arg1[%c0_330, %c31, %c0_331] : memref<2x36x128xf32, #tpu.memory_space<vmem>>, vector<2x1x128xf32>
    %220 = vector.shape_cast %219 : vector<2x1x128xf32> to vector<2x128xf32>
    %c28_332 = arith.constant 28 : index
    %c384_333 = arith.constant 384 : index
    %221 = vector.load %arg12[%c28_332, %c384_333] : memref<32x640xf32, #tpu.memory_space<vmem>>, vector<2x128xf32>
    tpu.vector_store %arg12[%c28_332, %c384_333], %220 {strides = array<i32>} : memref<32x640xf32, #tpu.memory_space<vmem>>, vector<2x128xf32>,
    %c0_334 = arith.constant 0 : index
    %c32 = arith.constant 32 : index
    %c0_335 = arith.constant 0 : index
    %222 = vector.load %arg1[%c0_334, %c32, %c0_335] : memref<2x36x128xf32, #tpu.memory_space<vmem>>, vector<2x1x128xf32>
    %223 = vector.shape_cast %222 : vector<2x1x128xf32> to vector<2x128xf32>
    %c28_336 = arith.constant 28 : index
    %c512_337 = arith.constant 512 : index
    %224 = vector.load %arg12[%c28_336, %c512_337] : memref<32x640xf32, #tpu.memory_space<vmem>>, vector<2x128xf32>
    tpu.vector_store %arg12[%c28_336, %c512_337], %223 {strides = array<i32>} : memref<32x640xf32, #tpu.memory_space<vmem>>, vector<2x128xf32>,
    %c0_338 = arith.constant 0 : index
    %c30_339 = arith.constant 30 : index
    %c0_340 = arith.constant 0 : index
    %225 = vector.load %arg1[%c0_338, %c30_339, %c0_340] : memref<2x36x128xf32, #tpu.memory_space<vmem>>, vector<2x1x128xf32>
    %226 = vector.shape_cast %225 : vector<2x1x128xf32> to vector<2x128xf32>
    %c30_341 = arith.constant 30 : index
    %c0_342 = arith.constant 0 : index
    %227 = vector.load %arg12[%c30_341, %c0_342] : memref<32x640xf32, #tpu.memory_space<vmem>>, vector<2x128xf32>
    tpu.vector_store %arg12[%c30_341, %c0_342], %226 {strides = array<i32>} : memref<32x640xf32, #tpu.memory_space<vmem>>, vector<2x128xf32>,
    %c0_343 = arith.constant 0 : index
    %c31_344 = arith.constant 31 : index
    %c0_345 = arith.constant 0 : index
    %228 = vector.load %arg1[%c0_343, %c31_344, %c0_345] : memref<2x36x128xf32, #tpu.memory_space<vmem>>, vector<2x1x128xf32>
    %229 = vector.shape_cast %228 : vector<2x1x128xf32> to vector<2x128xf32>
    %c30_346 = arith.constant 30 : index
    %c128_347 = arith.constant 128 : index
    %230 = vector.load %arg12[%c30_346, %c128_347] : memref<32x640xf32, #tpu.memory_space<vmem>>, vector<2x128xf32>
    tpu.vector_store %arg12[%c30_346, %c128_347], %229 {strides = array<i32>} : memref<32x640xf32, #tpu.memory_space<vmem>>, vector<2x128xf32>,
    %c0_348 = arith.constant 0 : index
    %c32_349 = arith.constant 32 : index
    %c0_350 = arith.constant 0 : index
    %231 = vector.load %arg1[%c0_348, %c32_349, %c0_350] : memref<2x36x128xf32, #tpu.memory_space<vmem>>, vector<2x1x128xf32>
    %232 = vector.shape_cast %231 : vector<2x1x128xf32> to vector<2x128xf32>
    %c30_351 = arith.constant 30 : index
    %c256_352 = arith.constant 256 : index
    %233 = vector.load %arg12[%c30_351, %c256_352] : memref<32x640xf32, #tpu.memory_space<vmem>>, vector<2x128xf32>
    tpu.vector_store %arg12[%c30_351, %c256_352], %232 {strides = array<i32>} : memref<32x640xf32, #tpu.memory_space<vmem>>, vector<2x128xf32>,
    %c0_353 = arith.constant 0 : index
    %c33 = arith.constant 33 : index
    %c0_354 = arith.constant 0 : index
    %234 = vector.load %arg1[%c0_353, %c33, %c0_354] : memref<2x36x128xf32, #tpu.memory_space<vmem>>, vector<2x1x128xf32>
    %235 = vector.shape_cast %234 : vector<2x1x128xf32> to vector<2x128xf32>
    %c30_355 = arith.constant 30 : index
    %c384_356 = arith.constant 384 : index
    %236 = vector.load %arg12[%c30_355, %c384_356] : memref<32x640xf32, #tpu.memory_space<vmem>>, vector<2x128xf32>
    tpu.vector_store %arg12[%c30_355, %c384_356], %235 {strides = array<i32>} : memref<32x640xf32, #tpu.memory_space<vmem>>, vector<2x128xf32>,
    %c0_357 = arith.constant 0 : index
    %c34 = arith.constant 34 : index
    %c0_358 = arith.constant 0 : index
    %237 = vector.load %arg1[%c0_357, %c34, %c0_358] : memref<2x36x128xf32, #tpu.memory_space<vmem>>, vector<2x1x128xf32>
    %238 = vector.shape_cast %237 : vector<2x1x128xf32> to vector<2x128xf32>
    %c30_359 = arith.constant 30 : index
    %c512_360 = arith.constant 512 : index
    %239 = vector.load %arg12[%c30_359, %c512_360] : memref<32x640xf32, #tpu.memory_space<vmem>>, vector<2x128xf32>
    tpu.vector_store %arg12[%c30_359, %c512_360], %238 {strides = array<i32>} : memref<32x640xf32, #tpu.memory_space<vmem>>, vector<2x128xf32>,
    %c0_361 = arith.constant 0 : index
    %c0_362 = arith.constant 0 : index
    %240 = vector.load %arg12[%c0_361, %c0_362] : memref<32x640xf32, #tpu.memory_space<vmem>>, vector<32x640xf32>
    %c0_363 = arith.constant 0 : index
    %c0_364 = arith.constant 0 : index
    %241 = vector.load %arg2[%c0_363, %c0_364] : memref<640x256xf32, #tpu.memory_space<vmem>>, vector<640x256xf32>
    %cst = arith.constant dense<0.000000e+00> : vector<32x256xf32>
    %242 = tpu.matmul %240, %241, %cst {dimension_numbers = #tpu.dot_dimension_numbers<[1], [0], [0], [1], [0, 0, 1, 1], [], []>} : vector<32x640xf32>, vector<640x256xf32>, vector<32x256xf32> -> vector<32x256xf32>
    %c0_365 = arith.constant 0 : index
    %c0_366 = arith.constant 0 : index
    %243 = vector.load %arg3[%c0_365, %c0_366] : memref<1x256xf32, #tpu.memory_space<vmem>>, vector<1x256xf32>
    %244 = vector.broadcast %243 : vector<1x256xf32> to vector<32x256xf32>
    %245 = arith.addf %242, %244 : vector<32x256xf32>
    %cst_367 = arith.constant 0.000000e+00 : f32
    %246 = vector.broadcast %cst_367 : f32 to vector<32x256xf32>
    %247 = arith.maximumf %245, %246 : vector<32x256xf32>
    %cst_368 = arith.constant 0.000000e+00 : f32
    %248 = vector.broadcast %cst_368 : f32 to vector<2x18x256xf32>
    %c0_369 = arith.constant 0 : index
    %c0_370 = arith.constant 0 : index
    %c0_371 = arith.constant 0 : index
    %249 = vector.load %arg9[%c0_369, %c0_370, %c0_371] : memref<2x18x256xf32, #tpu.memory_space<vmem>>, vector<2x18x256xf32>
    tpu.vector_store %arg9[%c0_369, %c0_370, %c0_371], %248 {strides = array<i32>} : memref<2x18x256xf32, #tpu.memory_space<vmem>>, vector<2x18x256xf32>,
    %250 = vector.extract_strided_slice %247 {offsets = [0, 0], sizes = [2, 256], strides = [1, 1]} : vector<32x256xf32> to vector<2x256xf32>
    %c0_372 = arith.constant 0 : index
    %c1_373 = arith.constant 1 : index
    %c0_374 = arith.constant 0 : index
    %251 = vector.load %arg9[%c0_372, %c1_373, %c0_374] : memref<2x18x256xf32, #tpu.memory_space<vmem>>, vector<2x1x256xf32>
    %252 = vector.shape_cast %251 : vector<2x1x256xf32> to vector<2x256xf32>
    %253 = vector.shape_cast %250 : vector<2x256xf32> to vector<2x1x256xf32>
    tpu.vector_store %arg9[%c0_372, %c1_373, %c0_374], %253 {strides = array<i32>} : memref<2x18x256xf32, #tpu.memory_space<vmem>>, vector<2x1x256xf32>,
    %254 = vector.extract_strided_slice %247 {offsets = [2, 0], sizes = [2, 256], strides = [1, 1]} : vector<32x256xf32> to vector<2x256xf32>
    %c0_375 = arith.constant 0 : index
    %c2_376 = arith.constant 2 : index
    %c0_377 = arith.constant 0 : index
    %255 = vector.load %arg9[%c0_375, %c2_376, %c0_377] : memref<2x18x256xf32, #tpu.memory_space<vmem>>, vector<2x1x256xf32>
    %256 = vector.shape_cast %255 : vector<2x1x256xf32> to vector<2x256xf32>
    %257 = vector.shape_cast %254 : vector<2x256xf32> to vector<2x1x256xf32>
    tpu.vector_store %arg9[%c0_375, %c2_376, %c0_377], %257 {strides = array<i32>} : memref<2x18x256xf32, #tpu.memory_space<vmem>>, vector<2x1x256xf32>,
    %258 = vector.extract_strided_slice %247 {offsets = [4, 0], sizes = [2, 256], strides = [1, 1]} : vector<32x256xf32> to vector<2x256xf32>
    %c0_378 = arith.constant 0 : index
    %c3_379 = arith.constant 3 : index
    %c0_380 = arith.constant 0 : index
    %259 = vector.load %arg9[%c0_378, %c3_379, %c0_380] : memref<2x18x256xf32, #tpu.memory_space<vmem>>, vector<2x1x256xf32>
    %260 = vector.shape_cast %259 : vector<2x1x256xf32> to vector<2x256xf32>
    %261 = vector.shape_cast %258 : vector<2x256xf32> to vector<2x1x256xf32>
    tpu.vector_store %arg9[%c0_378, %c3_379, %c0_380], %261 {strides = array<i32>} : memref<2x18x256xf32, #tpu.memory_space<vmem>>, vector<2x1x256xf32>,
    %262 = vector.extract_strided_slice %247 {offsets = [6, 0], sizes = [2, 256], strides = [1, 1]} : vector<32x256xf32> to vector<2x256xf32>
    %c0_381 = arith.constant 0 : index
    %c4_382 = arith.constant 4 : index
    %c0_383 = arith.constant 0 : index
    %263 = vector.load %arg9[%c0_381, %c4_382, %c0_383] : memref<2x18x256xf32, #tpu.memory_space<vmem>>, vector<2x1x256xf32>
    %264 = vector.shape_cast %263 : vector<2x1x256xf32> to vector<2x256xf32>
    %265 = vector.shape_cast %262 : vector<2x256xf32> to vector<2x1x256xf32>
    tpu.vector_store %arg9[%c0_381, %c4_382, %c0_383], %265 {strides = array<i32>} : memref<2x18x256xf32, #tpu.memory_space<vmem>>, vector<2x1x256xf32>,
    %266 = vector.extract_strided_slice %247 {offsets = [8, 0], sizes = [2, 256], strides = [1, 1]} : vector<32x256xf32> to vector<2x256xf32>
    %c0_384 = arith.constant 0 : index
    %c5_385 = arith.constant 5 : index
    %c0_386 = arith.constant 0 : index
    %267 = vector.load %arg9[%c0_384, %c5_385, %c0_386] : memref<2x18x256xf32, #tpu.memory_space<vmem>>, vector<2x1x256xf32>
    %268 = vector.shape_cast %267 : vector<2x1x256xf32> to vector<2x256xf32>
    %269 = vector.shape_cast %266 : vector<2x256xf32> to vector<2x1x256xf32>
    tpu.vector_store %arg9[%c0_384, %c5_385, %c0_386], %269 {strides = array<i32>} : memref<2x18x256xf32, #tpu.memory_space<vmem>>, vector<2x1x256xf32>,
    %270 = vector.extract_strided_slice %247 {offsets = [10, 0], sizes = [2, 256], strides = [1, 1]} : vector<32x256xf32> to vector<2x256xf32>
    %c0_387 = arith.constant 0 : index
    %c6_388 = arith.constant 6 : index
    %c0_389 = arith.constant 0 : index
    %271 = vector.load %arg9[%c0_387, %c6_388, %c0_389] : memref<2x18x256xf32, #tpu.memory_space<vmem>>, vector<2x1x256xf32>
    %272 = vector.shape_cast %271 : vector<2x1x256xf32> to vector<2x256xf32>
    %273 = vector.shape_cast %270 : vector<2x256xf32> to vector<2x1x256xf32>
    tpu.vector_store %arg9[%c0_387, %c6_388, %c0_389], %273 {strides = array<i32>} : memref<2x18x256xf32, #tpu.memory_space<vmem>>, vector<2x1x256xf32>,
    %274 = vector.extract_strided_slice %247 {offsets = [12, 0], sizes = [2, 256], strides = [1, 1]} : vector<32x256xf32> to vector<2x256xf32>
    %c0_390 = arith.constant 0 : index
    %c7_391 = arith.constant 7 : index
    %c0_392 = arith.constant 0 : index
    %275 = vector.load %arg9[%c0_390, %c7_391, %c0_392] : memref<2x18x256xf32, #tpu.memory_space<vmem>>, vector<2x1x256xf32>
    %276 = vector.shape_cast %275 : vector<2x1x256xf32> to vector<2x256xf32>
    %277 = vector.shape_cast %274 : vector<2x256xf32> to vector<2x1x256xf32>
    tpu.vector_store %arg9[%c0_390, %c7_391, %c0_392], %277 {strides = array<i32>} : memref<2x18x256xf32, #tpu.memory_space<vmem>>, vector<2x1x256xf32>,
    %278 = vector.extract_strided_slice %247 {offsets = [14, 0], sizes = [2, 256], strides = [1, 1]} : vector<32x256xf32> to vector<2x256xf32>
    %c0_393 = arith.constant 0 : index
    %c8_394 = arith.constant 8 : index
    %c0_395 = arith.constant 0 : index
    %279 = vector.load %arg9[%c0_393, %c8_394, %c0_395] : memref<2x18x256xf32, #tpu.memory_space<vmem>>, vector<2x1x256xf32>
    %280 = vector.shape_cast %279 : vector<2x1x256xf32> to vector<2x256xf32>
    %281 = vector.shape_cast %278 : vector<2x256xf32> to vector<2x1x256xf32>
    tpu.vector_store %arg9[%c0_393, %c8_394, %c0_395], %281 {strides = array<i32>} : memref<2x18x256xf32, #tpu.memory_space<vmem>>, vector<2x1x256xf32>,
    %282 = vector.extract_strided_slice %247 {offsets = [16, 0], sizes = [2, 256], strides = [1, 1]} : vector<32x256xf32> to vector<2x256xf32>
    %c0_396 = arith.constant 0 : index
    %c9_397 = arith.constant 9 : index
    %c0_398 = arith.constant 0 : index
    %283 = vector.load %arg9[%c0_396, %c9_397, %c0_398] : memref<2x18x256xf32, #tpu.memory_space<vmem>>, vector<2x1x256xf32>
    %284 = vector.shape_cast %283 : vector<2x1x256xf32> to vector<2x256xf32>
    %285 = vector.shape_cast %282 : vector<2x256xf32> to vector<2x1x256xf32>
    tpu.vector_store %arg9[%c0_396, %c9_397, %c0_398], %285 {strides = array<i32>} : memref<2x18x256xf32, #tpu.memory_space<vmem>>, vector<2x1x256xf32>,
    %286 = vector.extract_strided_slice %247 {offsets = [18, 0], sizes = [2, 256], strides = [1, 1]} : vector<32x256xf32> to vector<2x256xf32>
    %c0_399 = arith.constant 0 : index
    %c10_400 = arith.constant 10 : index
    %c0_401 = arith.constant 0 : index
    %287 = vector.load %arg9[%c0_399, %c10_400, %c0_401] : memref<2x18x256xf32, #tpu.memory_space<vmem>>, vector<2x1x256xf32>
    %288 = vector.shape_cast %287 : vector<2x1x256xf32> to vector<2x256xf32>
    %289 = vector.shape_cast %286 : vector<2x256xf32> to vector<2x1x256xf32>
    tpu.vector_store %arg9[%c0_399, %c10_400, %c0_401], %289 {strides = array<i32>} : memref<2x18x256xf32, #tpu.memory_space<vmem>>, vector<2x1x256xf32>,
    %290 = vector.extract_strided_slice %247 {offsets = [20, 0], sizes = [2, 256], strides = [1, 1]} : vector<32x256xf32> to vector<2x256xf32>
    %c0_402 = arith.constant 0 : index
    %c11_403 = arith.constant 11 : index
    %c0_404 = arith.constant 0 : index
    %291 = vector.load %arg9[%c0_402, %c11_403, %c0_404] : memref<2x18x256xf32, #tpu.memory_space<vmem>>, vector<2x1x256xf32>
    %292 = vector.shape_cast %291 : vector<2x1x256xf32> to vector<2x256xf32>
    %293 = vector.shape_cast %290 : vector<2x256xf32> to vector<2x1x256xf32>
    tpu.vector_store %arg9[%c0_402, %c11_403, %c0_404], %293 {strides = array<i32>} : memref<2x18x256xf32, #tpu.memory_space<vmem>>, vector<2x1x256xf32>,
    %294 = vector.extract_strided_slice %247 {offsets = [22, 0], sizes = [2, 256], strides = [1, 1]} : vector<32x256xf32> to vector<2x256xf32>
    %c0_405 = arith.constant 0 : index
    %c12_406 = arith.constant 12 : index
    %c0_407 = arith.constant 0 : index
    %295 = vector.load %arg9[%c0_405, %c12_406, %c0_407] : memref<2x18x256xf32, #tpu.memory_space<vmem>>, vector<2x1x256xf32>
    %296 = vector.shape_cast %295 : vector<2x1x256xf32> to vector<2x256xf32>
    %297 = vector.shape_cast %294 : vector<2x256xf32> to vector<2x1x256xf32>
    tpu.vector_store %arg9[%c0_405, %c12_406, %c0_407], %297 {strides = array<i32>} : memref<2x18x256xf32, #tpu.memory_space<vmem>>, vector<2x1x256xf32>,
    %298 = vector.extract_strided_slice %247 {offsets = [24, 0], sizes = [2, 256], strides = [1, 1]} : vector<32x256xf32> to vector<2x256xf32>
    %c0_408 = arith.constant 0 : index
    %c13_409 = arith.constant 13 : index
    %c0_410 = arith.constant 0 : index
    %299 = vector.load %arg9[%c0_408, %c13_409, %c0_410] : memref<2x18x256xf32, #tpu.memory_space<vmem>>, vector<2x1x256xf32>
    %300 = vector.shape_cast %299 : vector<2x1x256xf32> to vector<2x256xf32>
    %301 = vector.shape_cast %298 : vector<2x256xf32> to vector<2x1x256xf32>
    tpu.vector_store %arg9[%c0_408, %c13_409, %c0_410], %301 {strides = array<i32>} : memref<2x18x256xf32, #tpu.memory_space<vmem>>, vector<2x1x256xf32>,
    %302 = vector.extract_strided_slice %247 {offsets = [26, 0], sizes = [2, 256], strides = [1, 1]} : vector<32x256xf32> to vector<2x256xf32>
    %c0_411 = arith.constant 0 : index
    %c14_412 = arith.constant 14 : index
    %c0_413 = arith.constant 0 : index
    %303 = vector.load %arg9[%c0_411, %c14_412, %c0_413] : memref<2x18x256xf32, #tpu.memory_space<vmem>>, vector<2x1x256xf32>
    %304 = vector.shape_cast %303 : vector<2x1x256xf32> to vector<2x256xf32>
    %305 = vector.shape_cast %302 : vector<2x256xf32> to vector<2x1x256xf32>
    tpu.vector_store %arg9[%c0_411, %c14_412, %c0_413], %305 {strides = array<i32>} : memref<2x18x256xf32, #tpu.memory_space<vmem>>, vector<2x1x256xf32>,
    %306 = vector.extract_strided_slice %247 {offsets = [28, 0], sizes = [2, 256], strides = [1, 1]} : vector<32x256xf32> to vector<2x256xf32>
    %c0_414 = arith.constant 0 : index
    %c15_415 = arith.constant 15 : index
    %c0_416 = arith.constant 0 : index
    %307 = vector.load %arg9[%c0_414, %c15_415, %c0_416] : memref<2x18x256xf32, #tpu.memory_space<vmem>>, vector<2x1x256xf32>
    %308 = vector.shape_cast %307 : vector<2x1x256xf32> to vector<2x256xf32>
    %309 = vector.shape_cast %306 : vector<2x256xf32> to vector<2x1x256xf32>
    tpu.vector_store %arg9[%c0_414, %c15_415, %c0_416], %309 {strides = array<i32>} : memref<2x18x256xf32, #tpu.memory_space<vmem>>, vector<2x1x256xf32>,
    %310 = vector.extract_strided_slice %247 {offsets = [30, 0], sizes = [2, 256], strides = [1, 1]} : vector<32x256xf32> to vector<2x256xf32>
    %c0_417 = arith.constant 0 : index
    %c16_418 = arith.constant 16 : index
    %c0_419 = arith.constant 0 : index
    %311 = vector.load %arg9[%c0_417, %c16_418, %c0_419] : memref<2x18x256xf32, #tpu.memory_space<vmem>>, vector<2x1x256xf32>
    %312 = vector.shape_cast %311 : vector<2x1x256xf32> to vector<2x256xf32>
    %313 = vector.shape_cast %310 : vector<2x256xf32> to vector<2x1x256xf32>
    tpu.vector_store %arg9[%c0_417, %c16_418, %c0_419], %313 {strides = array<i32>} : memref<2x18x256xf32, #tpu.memory_space<vmem>>, vector<2x1x256xf32>,
    %c0_420 = arith.constant 0 : index
    %c0_421 = arith.constant 0 : index
    %c0_422 = arith.constant 0 : index
    %314 = vector.load %arg9[%c0_420, %c0_421, %c0_422] : memref<2x18x256xf32, #tpu.memory_space<vmem>>, vector<2x1x256xf32>
    %315 = vector.shape_cast %314 : vector<2x1x256xf32> to vector<2x256xf32>
    %c0_423 = arith.constant 0 : index
    %c0_424 = arith.constant 0 : index
    %316 = vector.load %arg13[%c0_423, %c0_424] : memref<16x768xf32, #tpu.memory_space<vmem>>, vector<2x256xf32>
    tpu.vector_store %arg13[%c0_423, %c0_424], %315 {strides = array<i32>} : memref<16x768xf32, #tpu.memory_space<vmem>>, vector<2x256xf32>,
    %c0_425 = arith.constant 0 : index
    %c1_426 = arith.constant 1 : index
    %c0_427 = arith.constant 0 : index
    %317 = vector.load %arg9[%c0_425, %c1_426, %c0_427] : memref<2x18x256xf32, #tpu.memory_space<vmem>>, vector<2x1x256xf32>
    %318 = vector.shape_cast %317 : vector<2x1x256xf32> to vector<2x256xf32>
    %c0_428 = arith.constant 0 : index
    %c256_429 = arith.constant 256 : index
    %319 = vector.load %arg13[%c0_428, %c256_429] : memref<16x768xf32, #tpu.memory_space<vmem>>, vector<2x256xf32>
    tpu.vector_store %arg13[%c0_428, %c256_429], %318 {strides = array<i32>} : memref<16x768xf32, #tpu.memory_space<vmem>>, vector<2x256xf32>,
    %c0_430 = arith.constant 0 : index
    %c2_431 = arith.constant 2 : index
    %c0_432 = arith.constant 0 : index
    %320 = vector.load %arg9[%c0_430, %c2_431, %c0_432] : memref<2x18x256xf32, #tpu.memory_space<vmem>>, vector<2x1x256xf32>
    %321 = vector.shape_cast %320 : vector<2x1x256xf32> to vector<2x256xf32>
    %c0_433 = arith.constant 0 : index
    %c512_434 = arith.constant 512 : index
    %322 = vector.load %arg13[%c0_433, %c512_434] : memref<16x768xf32, #tpu.memory_space<vmem>>, vector<2x256xf32>
    tpu.vector_store %arg13[%c0_433, %c512_434], %321 {strides = array<i32>} : memref<16x768xf32, #tpu.memory_space<vmem>>, vector<2x256xf32>,
    %c0_435 = arith.constant 0 : index
    %c2_436 = arith.constant 2 : index
    %c0_437 = arith.constant 0 : index
    %323 = vector.load %arg9[%c0_435, %c2_436, %c0_437] : memref<2x18x256xf32, #tpu.memory_space<vmem>>, vector<2x1x256xf32>
    %324 = vector.shape_cast %323 : vector<2x1x256xf32> to vector<2x256xf32>
    %c2_438 = arith.constant 2 : index
    %c0_439 = arith.constant 0 : index
    %325 = vector.load %arg13[%c2_438, %c0_439] : memref<16x768xf32, #tpu.memory_space<vmem>>, vector<2x256xf32>
    tpu.vector_store %arg13[%c2_438, %c0_439], %324 {strides = array<i32>} : memref<16x768xf32, #tpu.memory_space<vmem>>, vector<2x256xf32>,
    %c0_440 = arith.constant 0 : index
    %c3_441 = arith.constant 3 : index
    %c0_442 = arith.constant 0 : index
    %326 = vector.load %arg9[%c0_440, %c3_441, %c0_442] : memref<2x18x256xf32, #tpu.memory_space<vmem>>, vector<2x1x256xf32>
    %327 = vector.shape_cast %326 : vector<2x1x256xf32> to vector<2x256xf32>
    %c2_443 = arith.constant 2 : index
    %c256_444 = arith.constant 256 : index
    %328 = vector.load %arg13[%c2_443, %c256_444] : memref<16x768xf32, #tpu.memory_space<vmem>>, vector<2x256xf32>
    tpu.vector_store %arg13[%c2_443, %c256_444], %327 {strides = array<i32>} : memref<16x768xf32, #tpu.memory_space<vmem>>, vector<2x256xf32>,
    %c0_445 = arith.constant 0 : index
    %c4_446 = arith.constant 4 : index
    %c0_447 = arith.constant 0 : index
    %329 = vector.load %arg9[%c0_445, %c4_446, %c0_447] : memref<2x18x256xf32, #tpu.memory_space<vmem>>, vector<2x1x256xf32>
    %330 = vector.shape_cast %329 : vector<2x1x256xf32> to vector<2x256xf32>
    %c2_448 = arith.constant 2 : index
    %c512_449 = arith.constant 512 : index
    %331 = vector.load %arg13[%c2_448, %c512_449] : memref<16x768xf32, #tpu.memory_space<vmem>>, vector<2x256xf32>
    tpu.vector_store %arg13[%c2_448, %c512_449], %330 {strides = array<i32>} : memref<16x768xf32, #tpu.memory_space<vmem>>, vector<2x256xf32>,
    %c0_450 = arith.constant 0 : index
    %c4_451 = arith.constant 4 : index
    %c0_452 = arith.constant 0 : index
    %332 = vector.load %arg9[%c0_450, %c4_451, %c0_452] : memref<2x18x256xf32, #tpu.memory_space<vmem>>, vector<2x1x256xf32>
    %333 = vector.shape_cast %332 : vector<2x1x256xf32> to vector<2x256xf32>
    %c4_453 = arith.constant 4 : index
    %c0_454 = arith.constant 0 : index
    %334 = vector.load %arg13[%c4_453, %c0_454] : memref<16x768xf32, #tpu.memory_space<vmem>>, vector<2x256xf32>
    tpu.vector_store %arg13[%c4_453, %c0_454], %333 {strides = array<i32>} : memref<16x768xf32, #tpu.memory_space<vmem>>, vector<2x256xf32>,
    %c0_455 = arith.constant 0 : index
    %c5_456 = arith.constant 5 : index
    %c0_457 = arith.constant 0 : index
    %335 = vector.load %arg9[%c0_455, %c5_456, %c0_457] : memref<2x18x256xf32, #tpu.memory_space<vmem>>, vector<2x1x256xf32>
    %336 = vector.shape_cast %335 : vector<2x1x256xf32> to vector<2x256xf32>
    %c4_458 = arith.constant 4 : index
    %c256_459 = arith.constant 256 : index
    %337 = vector.load %arg13[%c4_458, %c256_459] : memref<16x768xf32, #tpu.memory_space<vmem>>, vector<2x256xf32>
    tpu.vector_store %arg13[%c4_458, %c256_459], %336 {strides = array<i32>} : memref<16x768xf32, #tpu.memory_space<vmem>>, vector<2x256xf32>,
    %c0_460 = arith.constant 0 : index
    %c6_461 = arith.constant 6 : index
    %c0_462 = arith.constant 0 : index
    %338 = vector.load %arg9[%c0_460, %c6_461, %c0_462] : memref<2x18x256xf32, #tpu.memory_space<vmem>>, vector<2x1x256xf32>
    %339 = vector.shape_cast %338 : vector<2x1x256xf32> to vector<2x256xf32>
    %c4_463 = arith.constant 4 : index
    %c512_464 = arith.constant 512 : index
    %340 = vector.load %arg13[%c4_463, %c512_464] : memref<16x768xf32, #tpu.memory_space<vmem>>, vector<2x256xf32>
    tpu.vector_store %arg13[%c4_463, %c512_464], %339 {strides = array<i32>} : memref<16x768xf32, #tpu.memory_space<vmem>>, vector<2x256xf32>,
    %c0_465 = arith.constant 0 : index
    %c6_466 = arith.constant 6 : index
    %c0_467 = arith.constant 0 : index
    %341 = vector.load %arg9[%c0_465, %c6_466, %c0_467] : memref<2x18x256xf32, #tpu.memory_space<vmem>>, vector<2x1x256xf32>
    %342 = vector.shape_cast %341 : vector<2x1x256xf32> to vector<2x256xf32>
    %c6_468 = arith.constant 6 : index
    %c0_469 = arith.constant 0 : index
    %343 = vector.load %arg13[%c6_468, %c0_469] : memref<16x768xf32, #tpu.memory_space<vmem>>, vector<2x256xf32>
    tpu.vector_store %arg13[%c6_468, %c0_469], %342 {strides = array<i32>} : memref<16x768xf32, #tpu.memory_space<vmem>>, vector<2x256xf32>,
    %c0_470 = arith.constant 0 : index
    %c7_471 = arith.constant 7 : index
    %c0_472 = arith.constant 0 : index
    %344 = vector.load %arg9[%c0_470, %c7_471, %c0_472] : memref<2x18x256xf32, #tpu.memory_space<vmem>>, vector<2x1x256xf32>
    %345 = vector.shape_cast %344 : vector<2x1x256xf32> to vector<2x256xf32>
    %c6_473 = arith.constant 6 : index
    %c256_474 = arith.constant 256 : index
    %346 = vector.load %arg13[%c6_473, %c256_474] : memref<16x768xf32, #tpu.memory_space<vmem>>, vector<2x256xf32>
    tpu.vector_store %arg13[%c6_473, %c256_474], %345 {strides = array<i32>} : memref<16x768xf32, #tpu.memory_space<vmem>>, vector<2x256xf32>,
    %c0_475 = arith.constant 0 : index
    %c8_476 = arith.constant 8 : index
    %c0_477 = arith.constant 0 : index
    %347 = vector.load %arg9[%c0_475, %c8_476, %c0_477] : memref<2x18x256xf32, #tpu.memory_space<vmem>>, vector<2x1x256xf32>
    %348 = vector.shape_cast %347 : vector<2x1x256xf32> to vector<2x256xf32>
    %c6_478 = arith.constant 6 : index
    %c512_479 = arith.constant 512 : index
    %349 = vector.load %arg13[%c6_478, %c512_479] : memref<16x768xf32, #tpu.memory_space<vmem>>, vector<2x256xf32>
    tpu.vector_store %arg13[%c6_478, %c512_479], %348 {strides = array<i32>} : memref<16x768xf32, #tpu.memory_space<vmem>>, vector<2x256xf32>,
    %c0_480 = arith.constant 0 : index
    %c8_481 = arith.constant 8 : index
    %c0_482 = arith.constant 0 : index
    %350 = vector.load %arg9[%c0_480, %c8_481, %c0_482] : memref<2x18x256xf32, #tpu.memory_space<vmem>>, vector<2x1x256xf32>
    %351 = vector.shape_cast %350 : vector<2x1x256xf32> to vector<2x256xf32>
    %c8_483 = arith.constant 8 : index
    %c0_484 = arith.constant 0 : index
    %352 = vector.load %arg13[%c8_483, %c0_484] : memref<16x768xf32, #tpu.memory_space<vmem>>, vector<2x256xf32>
    tpu.vector_store %arg13[%c8_483, %c0_484], %351 {strides = array<i32>} : memref<16x768xf32, #tpu.memory_space<vmem>>, vector<2x256xf32>,
    %c0_485 = arith.constant 0 : index
    %c9_486 = arith.constant 9 : index
    %c0_487 = arith.constant 0 : index
    %353 = vector.load %arg9[%c0_485, %c9_486, %c0_487] : memref<2x18x256xf32, #tpu.memory_space<vmem>>, vector<2x1x256xf32>
    %354 = vector.shape_cast %353 : vector<2x1x256xf32> to vector<2x256xf32>
    %c8_488 = arith.constant 8 : index
    %c256_489 = arith.constant 256 : index
    %355 = vector.load %arg13[%c8_488, %c256_489] : memref<16x768xf32, #tpu.memory_space<vmem>>, vector<2x256xf32>
    tpu.vector_store %arg13[%c8_488, %c256_489], %354 {strides = array<i32>} : memref<16x768xf32, #tpu.memory_space<vmem>>, vector<2x256xf32>,
    %c0_490 = arith.constant 0 : index
    %c10_491 = arith.constant 10 : index
    %c0_492 = arith.constant 0 : index
    %356 = vector.load %arg9[%c0_490, %c10_491, %c0_492] : memref<2x18x256xf32, #tpu.memory_space<vmem>>, vector<2x1x256xf32>
    %357 = vector.shape_cast %356 : vector<2x1x256xf32> to vector<2x256xf32>
    %c8_493 = arith.constant 8 : index
    %c512_494 = arith.constant 512 : index
    %358 = vector.load %arg13[%c8_493, %c512_494] : memref<16x768xf32, #tpu.memory_space<vmem>>, vector<2x256xf32>
    tpu.vector_store %arg13[%c8_493, %c512_494], %357 {strides = array<i32>} : memref<16x768xf32, #tpu.memory_space<vmem>>, vector<2x256xf32>,
    %c0_495 = arith.constant 0 : index
    %c10_496 = arith.constant 10 : index
    %c0_497 = arith.constant 0 : index
    %359 = vector.load %arg9[%c0_495, %c10_496, %c0_497] : memref<2x18x256xf32, #tpu.memory_space<vmem>>, vector<2x1x256xf32>
    %360 = vector.shape_cast %359 : vector<2x1x256xf32> to vector<2x256xf32>
    %c10_498 = arith.constant 10 : index
    %c0_499 = arith.constant 0 : index
    %361 = vector.load %arg13[%c10_498, %c0_499] : memref<16x768xf32, #tpu.memory_space<vmem>>, vector<2x256xf32>
    tpu.vector_store %arg13[%c10_498, %c0_499], %360 {strides = array<i32>} : memref<16x768xf32, #tpu.memory_space<vmem>>, vector<2x256xf32>,
    %c0_500 = arith.constant 0 : index
    %c11_501 = arith.constant 11 : index
    %c0_502 = arith.constant 0 : index
    %362 = vector.load %arg9[%c0_500, %c11_501, %c0_502] : memref<2x18x256xf32, #tpu.memory_space<vmem>>, vector<2x1x256xf32>
    %363 = vector.shape_cast %362 : vector<2x1x256xf32> to vector<2x256xf32>
    %c10_503 = arith.constant 10 : index
    %c256_504 = arith.constant 256 : index
    %364 = vector.load %arg13[%c10_503, %c256_504] : memref<16x768xf32, #tpu.memory_space<vmem>>, vector<2x256xf32>
    tpu.vector_store %arg13[%c10_503, %c256_504], %363 {strides = array<i32>} : memref<16x768xf32, #tpu.memory_space<vmem>>, vector<2x256xf32>,
    %c0_505 = arith.constant 0 : index
    %c12_506 = arith.constant 12 : index
    %c0_507 = arith.constant 0 : index
    %365 = vector.load %arg9[%c0_505, %c12_506, %c0_507] : memref<2x18x256xf32, #tpu.memory_space<vmem>>, vector<2x1x256xf32>
    %366 = vector.shape_cast %365 : vector<2x1x256xf32> to vector<2x256xf32>
    %c10_508 = arith.constant 10 : index
    %c512_509 = arith.constant 512 : index
    %367 = vector.load %arg13[%c10_508, %c512_509] : memref<16x768xf32, #tpu.memory_space<vmem>>, vector<2x256xf32>
    tpu.vector_store %arg13[%c10_508, %c512_509], %366 {strides = array<i32>} : memref<16x768xf32, #tpu.memory_space<vmem>>, vector<2x256xf32>,
    %c0_510 = arith.constant 0 : index
    %c12_511 = arith.constant 12 : index
    %c0_512 = arith.constant 0 : index
    %368 = vector.load %arg9[%c0_510, %c12_511, %c0_512] : memref<2x18x256xf32, #tpu.memory_space<vmem>>, vector<2x1x256xf32>
    %369 = vector.shape_cast %368 : vector<2x1x256xf32> to vector<2x256xf32>
    %c12_513 = arith.constant 12 : index
    %c0_514 = arith.constant 0 : index
    %370 = vector.load %arg13[%c12_513, %c0_514] : memref<16x768xf32, #tpu.memory_space<vmem>>, vector<2x256xf32>
    tpu.vector_store %arg13[%c12_513, %c0_514], %369 {strides = array<i32>} : memref<16x768xf32, #tpu.memory_space<vmem>>, vector<2x256xf32>,
    %c0_515 = arith.constant 0 : index
    %c13_516 = arith.constant 13 : index
    %c0_517 = arith.constant 0 : index
    %371 = vector.load %arg9[%c0_515, %c13_516, %c0_517] : memref<2x18x256xf32, #tpu.memory_space<vmem>>, vector<2x1x256xf32>
    %372 = vector.shape_cast %371 : vector<2x1x256xf32> to vector<2x256xf32>
    %c12_518 = arith.constant 12 : index
    %c256_519 = arith.constant 256 : index
    %373 = vector.load %arg13[%c12_518, %c256_519] : memref<16x768xf32, #tpu.memory_space<vmem>>, vector<2x256xf32>
    tpu.vector_store %arg13[%c12_518, %c256_519], %372 {strides = array<i32>} : memref<16x768xf32, #tpu.memory_space<vmem>>, vector<2x256xf32>,
    %c0_520 = arith.constant 0 : index
    %c14_521 = arith.constant 14 : index
    %c0_522 = arith.constant 0 : index
    %374 = vector.load %arg9[%c0_520, %c14_521, %c0_522] : memref<2x18x256xf32, #tpu.memory_space<vmem>>, vector<2x1x256xf32>
    %375 = vector.shape_cast %374 : vector<2x1x256xf32> to vector<2x256xf32>
    %c12_523 = arith.constant 12 : index
    %c512_524 = arith.constant 512 : index
    %376 = vector.load %arg13[%c12_523, %c512_524] : memref<16x768xf32, #tpu.memory_space<vmem>>, vector<2x256xf32>
    tpu.vector_store %arg13[%c12_523, %c512_524], %375 {strides = array<i32>} : memref<16x768xf32, #tpu.memory_space<vmem>>, vector<2x256xf32>,
    %c0_525 = arith.constant 0 : index
    %c14_526 = arith.constant 14 : index
    %c0_527 = arith.constant 0 : index
    %377 = vector.load %arg9[%c0_525, %c14_526, %c0_527] : memref<2x18x256xf32, #tpu.memory_space<vmem>>, vector<2x1x256xf32>
    %378 = vector.shape_cast %377 : vector<2x1x256xf32> to vector<2x256xf32>
    %c14_528 = arith.constant 14 : index
    %c0_529 = arith.constant 0 : index
    %379 = vector.load %arg13[%c14_528, %c0_529] : memref<16x768xf32, #tpu.memory_space<vmem>>, vector<2x256xf32>
    tpu.vector_store %arg13[%c14_528, %c0_529], %378 {strides = array<i32>} : memref<16x768xf32, #tpu.memory_space<vmem>>, vector<2x256xf32>,
    %c0_530 = arith.constant 0 : index
    %c15_531 = arith.constant 15 : index
    %c0_532 = arith.constant 0 : index
    %380 = vector.load %arg9[%c0_530, %c15_531, %c0_532] : memref<2x18x256xf32, #tpu.memory_space<vmem>>, vector<2x1x256xf32>
    %381 = vector.shape_cast %380 : vector<2x1x256xf32> to vector<2x256xf32>
    %c14_533 = arith.constant 14 : index
    %c256_534 = arith.constant 256 : index
    %382 = vector.load %arg13[%c14_533, %c256_534] : memref<16x768xf32, #tpu.memory_space<vmem>>, vector<2x256xf32>
    tpu.vector_store %arg13[%c14_533, %c256_534], %381 {strides = array<i32>} : memref<16x768xf32, #tpu.memory_space<vmem>>, vector<2x256xf32>,
    %c0_535 = arith.constant 0 : index
    %c16_536 = arith.constant 16 : index
    %c0_537 = arith.constant 0 : index
    %383 = vector.load %arg9[%c0_535, %c16_536, %c0_537] : memref<2x18x256xf32, #tpu.memory_space<vmem>>, vector<2x1x256xf32>
    %384 = vector.shape_cast %383 : vector<2x1x256xf32> to vector<2x256xf32>
    %c14_538 = arith.constant 14 : index
    %c512_539 = arith.constant 512 : index
    %385 = vector.load %arg13[%c14_538, %c512_539] : memref<16x768xf32, #tpu.memory_space<vmem>>, vector<2x256xf32>
    tpu.vector_store %arg13[%c14_538, %c512_539], %384 {strides = array<i32>} : memref<16x768xf32, #tpu.memory_space<vmem>>, vector<2x256xf32>,
    %c0_540 = arith.constant 0 : index
    %c0_541 = arith.constant 0 : index
    %386 = vector.load %arg13[%c0_540, %c0_541] : memref<16x768xf32, #tpu.memory_space<vmem>>, vector<16x768xf32>
    %c0_542 = arith.constant 0 : index
    %c0_543 = arith.constant 0 : index
    %387 = vector.load %arg4[%c0_542, %c0_543] : memref<768x256xf32, #tpu.memory_space<vmem>>, vector<768x256xf32>
    %cst_544 = arith.constant dense<0.000000e+00> : vector<16x256xf32>
    %388 = tpu.matmul %386, %387, %cst_544 {dimension_numbers = #tpu.dot_dimension_numbers<[1], [0], [0], [1], [0, 0, 1, 1], [], []>} : vector<16x768xf32>, vector<768x256xf32>, vector<16x256xf32> -> vector<16x256xf32>
    %c0_545 = arith.constant 0 : index
    %c0_546 = arith.constant 0 : index
    %389 = vector.load %arg5[%c0_545, %c0_546] : memref<1x256xf32, #tpu.memory_space<vmem>>, vector<1x256xf32>
    %390 = vector.broadcast %389 : vector<1x256xf32> to vector<16x256xf32>
    %391 = arith.addf %388, %390 : vector<16x256xf32>
    %cst_547 = arith.constant 0.000000e+00 : f32
    %392 = vector.broadcast %cst_547 : f32 to vector<16x256xf32>
    %393 = arith.maximumf %391, %392 : vector<16x256xf32>
    %cst_548 = arith.constant 0.000000e+00 : f32
    %394 = vector.broadcast %cst_548 : f32 to vector<2x10x256xf32>
    %c0_549 = arith.constant 0 : index
    %c0_550 = arith.constant 0 : index
    %c0_551 = arith.constant 0 : index
    %395 = vector.load %arg10[%c0_549, %c0_550, %c0_551] : memref<2x10x256xf32, #tpu.memory_space<vmem>>, vector<2x10x256xf32>
    tpu.vector_store %arg10[%c0_549, %c0_550, %c0_551], %394 {strides = array<i32>} : memref<2x10x256xf32, #tpu.memory_space<vmem>>, vector<2x10x256xf32>,
    %396 = vector.extract_strided_slice %393 {offsets = [0, 0], sizes = [2, 256], strides = [1, 1]} : vector<16x256xf32> to vector<2x256xf32>
    %c0_552 = arith.constant 0 : index
    %c1_553 = arith.constant 1 : index
    %c0_554 = arith.constant 0 : index
    %397 = vector.load %arg10[%c0_552, %c1_553, %c0_554] : memref<2x10x256xf32, #tpu.memory_space<vmem>>, vector<2x1x256xf32>
    %398 = vector.shape_cast %397 : vector<2x1x256xf32> to vector<2x256xf32>
    %399 = vector.shape_cast %396 : vector<2x256xf32> to vector<2x1x256xf32>
    tpu.vector_store %arg10[%c0_552, %c1_553, %c0_554], %399 {strides = array<i32>} : memref<2x10x256xf32, #tpu.memory_space<vmem>>, vector<2x1x256xf32>,
    %400 = vector.extract_strided_slice %393 {offsets = [2, 0], sizes = [2, 256], strides = [1, 1]} : vector<16x256xf32> to vector<2x256xf32>
    %c0_555 = arith.constant 0 : index
    %c2_556 = arith.constant 2 : index
    %c0_557 = arith.constant 0 : index
    %401 = vector.load %arg10[%c0_555, %c2_556, %c0_557] : memref<2x10x256xf32, #tpu.memory_space<vmem>>, vector<2x1x256xf32>
    %402 = vector.shape_cast %401 : vector<2x1x256xf32> to vector<2x256xf32>
    %403 = vector.shape_cast %400 : vector<2x256xf32> to vector<2x1x256xf32>
    tpu.vector_store %arg10[%c0_555, %c2_556, %c0_557], %403 {strides = array<i32>} : memref<2x10x256xf32, #tpu.memory_space<vmem>>, vector<2x1x256xf32>,
    %404 = vector.extract_strided_slice %393 {offsets = [4, 0], sizes = [2, 256], strides = [1, 1]} : vector<16x256xf32> to vector<2x256xf32>
    %c0_558 = arith.constant 0 : index
    %c3_559 = arith.constant 3 : index
    %c0_560 = arith.constant 0 : index
    %405 = vector.load %arg10[%c0_558, %c3_559, %c0_560] : memref<2x10x256xf32, #tpu.memory_space<vmem>>, vector<2x1x256xf32>
    %406 = vector.shape_cast %405 : vector<2x1x256xf32> to vector<2x256xf32>
    %407 = vector.shape_cast %404 : vector<2x256xf32> to vector<2x1x256xf32>
    tpu.vector_store %arg10[%c0_558, %c3_559, %c0_560], %407 {strides = array<i32>} : memref<2x10x256xf32, #tpu.memory_space<vmem>>, vector<2x1x256xf32>,
    %408 = vector.extract_strided_slice %393 {offsets = [6, 0], sizes = [2, 256], strides = [1, 1]} : vector<16x256xf32> to vector<2x256xf32>
    %c0_561 = arith.constant 0 : index
    %c4_562 = arith.constant 4 : index
    %c0_563 = arith.constant 0 : index
    %409 = vector.load %arg10[%c0_561, %c4_562, %c0_563] : memref<2x10x256xf32, #tpu.memory_space<vmem>>, vector<2x1x256xf32>
    %410 = vector.shape_cast %409 : vector<2x1x256xf32> to vector<2x256xf32>
    %411 = vector.shape_cast %408 : vector<2x256xf32> to vector<2x1x256xf32>
    tpu.vector_store %arg10[%c0_561, %c4_562, %c0_563], %411 {strides = array<i32>} : memref<2x10x256xf32, #tpu.memory_space<vmem>>, vector<2x1x256xf32>,
    %412 = vector.extract_strided_slice %393 {offsets = [8, 0], sizes = [2, 256], strides = [1, 1]} : vector<16x256xf32> to vector<2x256xf32>
    %c0_564 = arith.constant 0 : index
    %c5_565 = arith.constant 5 : index
    %c0_566 = arith.constant 0 : index
    %413 = vector.load %arg10[%c0_564, %c5_565, %c0_566] : memref<2x10x256xf32, #tpu.memory_space<vmem>>, vector<2x1x256xf32>
    %414 = vector.shape_cast %413 : vector<2x1x256xf32> to vector<2x256xf32>
    %415 = vector.shape_cast %412 : vector<2x256xf32> to vector<2x1x256xf32>
    tpu.vector_store %arg10[%c0_564, %c5_565, %c0_566], %415 {strides = array<i32>} : memref<2x10x256xf32, #tpu.memory_space<vmem>>, vector<2x1x256xf32>,
    %416 = vector.extract_strided_slice %393 {offsets = [10, 0], sizes = [2, 256], strides = [1, 1]} : vector<16x256xf32> to vector<2x256xf32>
    %c0_567 = arith.constant 0 : index
    %c6_568 = arith.constant 6 : index
    %c0_569 = arith.constant 0 : index
    %417 = vector.load %arg10[%c0_567, %c6_568, %c0_569] : memref<2x10x256xf32, #tpu.memory_space<vmem>>, vector<2x1x256xf32>
    %418 = vector.shape_cast %417 : vector<2x1x256xf32> to vector<2x256xf32>
    %419 = vector.shape_cast %416 : vector<2x256xf32> to vector<2x1x256xf32>
    tpu.vector_store %arg10[%c0_567, %c6_568, %c0_569], %419 {strides = array<i32>} : memref<2x10x256xf32, #tpu.memory_space<vmem>>, vector<2x1x256xf32>,
    %420 = vector.extract_strided_slice %393 {offsets = [12, 0], sizes = [2, 256], strides = [1, 1]} : vector<16x256xf32> to vector<2x256xf32>
    %c0_570 = arith.constant 0 : index
    %c7_571 = arith.constant 7 : index
    %c0_572 = arith.constant 0 : index
    %421 = vector.load %arg10[%c0_570, %c7_571, %c0_572] : memref<2x10x256xf32, #tpu.memory_space<vmem>>, vector<2x1x256xf32>
    %422 = vector.shape_cast %421 : vector<2x1x256xf32> to vector<2x256xf32>
    %423 = vector.shape_cast %420 : vector<2x256xf32> to vector<2x1x256xf32>
    tpu.vector_store %arg10[%c0_570, %c7_571, %c0_572], %423 {strides = array<i32>} : memref<2x10x256xf32, #tpu.memory_space<vmem>>, vector<2x1x256xf32>,
    %424 = vector.extract_strided_slice %393 {offsets = [14, 0], sizes = [2, 256], strides = [1, 1]} : vector<16x256xf32> to vector<2x256xf32>
    %c0_573 = arith.constant 0 : index
    %c8_574 = arith.constant 8 : index
    %c0_575 = arith.constant 0 : index
    %425 = vector.load %arg10[%c0_573, %c8_574, %c0_575] : memref<2x10x256xf32, #tpu.memory_space<vmem>>, vector<2x1x256xf32>
    %426 = vector.shape_cast %425 : vector<2x1x256xf32> to vector<2x256xf32>
    %427 = vector.shape_cast %424 : vector<2x256xf32> to vector<2x1x256xf32>
    tpu.vector_store %arg10[%c0_573, %c8_574, %c0_575], %427 {strides = array<i32>} : memref<2x10x256xf32, #tpu.memory_space<vmem>>, vector<2x1x256xf32>,
    %c0_576 = arith.constant 0 : index
    %c0_577 = arith.constant 0 : index
    %c0_578 = arith.constant 0 : index
    %428 = vector.load %arg10[%c0_576, %c0_577, %c0_578] : memref<2x10x256xf32, #tpu.memory_space<vmem>>, vector<2x1x256xf32>
    %429 = vector.shape_cast %428 : vector<2x1x256xf32> to vector<2x256xf32>
    %c0_579 = arith.constant 0 : index
    %c0_580 = arith.constant 0 : index
    %430 = vector.load %arg14[%c0_579, %c0_580] : memref<8x768xf32, #tpu.memory_space<vmem>>, vector<2x256xf32>
    tpu.vector_store %arg14[%c0_579, %c0_580], %429 {strides = array<i32>} : memref<8x768xf32, #tpu.memory_space<vmem>>, vector<2x256xf32>,
    %c0_581 = arith.constant 0 : index
    %c1_582 = arith.constant 1 : index
    %c0_583 = arith.constant 0 : index
    %431 = vector.load %arg10[%c0_581, %c1_582, %c0_583] : memref<2x10x256xf32, #tpu.memory_space<vmem>>, vector<2x1x256xf32>
    %432 = vector.shape_cast %431 : vector<2x1x256xf32> to vector<2x256xf32>
    %c0_584 = arith.constant 0 : index
    %c256_585 = arith.constant 256 : index
    %433 = vector.load %arg14[%c0_584, %c256_585] : memref<8x768xf32, #tpu.memory_space<vmem>>, vector<2x256xf32>
    tpu.vector_store %arg14[%c0_584, %c256_585], %432 {strides = array<i32>} : memref<8x768xf32, #tpu.memory_space<vmem>>, vector<2x256xf32>,
    %c0_586 = arith.constant 0 : index
    %c2_587 = arith.constant 2 : index
    %c0_588 = arith.constant 0 : index
    %434 = vector.load %arg10[%c0_586, %c2_587, %c0_588] : memref<2x10x256xf32, #tpu.memory_space<vmem>>, vector<2x1x256xf32>
    %435 = vector.shape_cast %434 : vector<2x1x256xf32> to vector<2x256xf32>
    %c0_589 = arith.constant 0 : index
    %c512_590 = arith.constant 512 : index
    %436 = vector.load %arg14[%c0_589, %c512_590] : memref<8x768xf32, #tpu.memory_space<vmem>>, vector<2x256xf32>
    tpu.vector_store %arg14[%c0_589, %c512_590], %435 {strides = array<i32>} : memref<8x768xf32, #tpu.memory_space<vmem>>, vector<2x256xf32>,
    %c0_591 = arith.constant 0 : index
    %c2_592 = arith.constant 2 : index
    %c0_593 = arith.constant 0 : index
    %437 = vector.load %arg10[%c0_591, %c2_592, %c0_593] : memref<2x10x256xf32, #tpu.memory_space<vmem>>, vector<2x1x256xf32>
    %438 = vector.shape_cast %437 : vector<2x1x256xf32> to vector<2x256xf32>
    %c2_594 = arith.constant 2 : index
    %c0_595 = arith.constant 0 : index
    %439 = vector.load %arg14[%c2_594, %c0_595] : memref<8x768xf32, #tpu.memory_space<vmem>>, vector<2x256xf32>
    tpu.vector_store %arg14[%c2_594, %c0_595], %438 {strides = array<i32>} : memref<8x768xf32, #tpu.memory_space<vmem>>, vector<2x256xf32>,
    %c0_596 = arith.constant 0 : index
    %c3_597 = arith.constant 3 : index
    %c0_598 = arith.constant 0 : index
    %440 = vector.load %arg10[%c0_596, %c3_597, %c0_598] : memref<2x10x256xf32, #tpu.memory_space<vmem>>, vector<2x1x256xf32>
    %441 = vector.shape_cast %440 : vector<2x1x256xf32> to vector<2x256xf32>
    %c2_599 = arith.constant 2 : index
    %c256_600 = arith.constant 256 : index
    %442 = vector.load %arg14[%c2_599, %c256_600] : memref<8x768xf32, #tpu.memory_space<vmem>>, vector<2x256xf32>
    tpu.vector_store %arg14[%c2_599, %c256_600], %441 {strides = array<i32>} : memref<8x768xf32, #tpu.memory_space<vmem>>, vector<2x256xf32>,
    %c0_601 = arith.constant 0 : index
    %c4_602 = arith.constant 4 : index
    %c0_603 = arith.constant 0 : index
    %443 = vector.load %arg10[%c0_601, %c4_602, %c0_603] : memref<2x10x256xf32, #tpu.memory_space<vmem>>, vector<2x1x256xf32>
    %444 = vector.shape_cast %443 : vector<2x1x256xf32> to vector<2x256xf32>
    %c2_604 = arith.constant 2 : index
    %c512_605 = arith.constant 512 : index
    %445 = vector.load %arg14[%c2_604, %c512_605] : memref<8x768xf32, #tpu.memory_space<vmem>>, vector<2x256xf32>
    tpu.vector_store %arg14[%c2_604, %c512_605], %444 {strides = array<i32>} : memref<8x768xf32, #tpu.memory_space<vmem>>, vector<2x256xf32>,
    %c0_606 = arith.constant 0 : index
    %c4_607 = arith.constant 4 : index
    %c0_608 = arith.constant 0 : index
    %446 = vector.load %arg10[%c0_606, %c4_607, %c0_608] : memref<2x10x256xf32, #tpu.memory_space<vmem>>, vector<2x1x256xf32>
    %447 = vector.shape_cast %446 : vector<2x1x256xf32> to vector<2x256xf32>
    %c4_609 = arith.constant 4 : index
    %c0_610 = arith.constant 0 : index
    %448 = vector.load %arg14[%c4_609, %c0_610] : memref<8x768xf32, #tpu.memory_space<vmem>>, vector<2x256xf32>
    tpu.vector_store %arg14[%c4_609, %c0_610], %447 {strides = array<i32>} : memref<8x768xf32, #tpu.memory_space<vmem>>, vector<2x256xf32>,
    %c0_611 = arith.constant 0 : index
    %c5_612 = arith.constant 5 : index
    %c0_613 = arith.constant 0 : index
    %449 = vector.load %arg10[%c0_611, %c5_612, %c0_613] : memref<2x10x256xf32, #tpu.memory_space<vmem>>, vector<2x1x256xf32>
    %450 = vector.shape_cast %449 : vector<2x1x256xf32> to vector<2x256xf32>
    %c4_614 = arith.constant 4 : index
    %c256_615 = arith.constant 256 : index
    %451 = vector.load %arg14[%c4_614, %c256_615] : memref<8x768xf32, #tpu.memory_space<vmem>>, vector<2x256xf32>
    tpu.vector_store %arg14[%c4_614, %c256_615], %450 {strides = array<i32>} : memref<8x768xf32, #tpu.memory_space<vmem>>, vector<2x256xf32>,
    %c0_616 = arith.constant 0 : index
    %c6_617 = arith.constant 6 : index
    %c0_618 = arith.constant 0 : index
    %452 = vector.load %arg10[%c0_616, %c6_617, %c0_618] : memref<2x10x256xf32, #tpu.memory_space<vmem>>, vector<2x1x256xf32>
    %453 = vector.shape_cast %452 : vector<2x1x256xf32> to vector<2x256xf32>
    %c4_619 = arith.constant 4 : index
    %c512_620 = arith.constant 512 : index
    %454 = vector.load %arg14[%c4_619, %c512_620] : memref<8x768xf32, #tpu.memory_space<vmem>>, vector<2x256xf32>
    tpu.vector_store %arg14[%c4_619, %c512_620], %453 {strides = array<i32>} : memref<8x768xf32, #tpu.memory_space<vmem>>, vector<2x256xf32>,
    %c0_621 = arith.constant 0 : index
    %c6_622 = arith.constant 6 : index
    %c0_623 = arith.constant 0 : index
    %455 = vector.load %arg10[%c0_621, %c6_622, %c0_623] : memref<2x10x256xf32, #tpu.memory_space<vmem>>, vector<2x1x256xf32>
    %456 = vector.shape_cast %455 : vector<2x1x256xf32> to vector<2x256xf32>
    %c6_624 = arith.constant 6 : index
    %c0_625 = arith.constant 0 : index
    %457 = vector.load %arg14[%c6_624, %c0_625] : memref<8x768xf32, #tpu.memory_space<vmem>>, vector<2x256xf32>
    tpu.vector_store %arg14[%c6_624, %c0_625], %456 {strides = array<i32>} : memref<8x768xf32, #tpu.memory_space<vmem>>, vector<2x256xf32>,
    %c0_626 = arith.constant 0 : index
    %c7_627 = arith.constant 7 : index
    %c0_628 = arith.constant 0 : index
    %458 = vector.load %arg10[%c0_626, %c7_627, %c0_628] : memref<2x10x256xf32, #tpu.memory_space<vmem>>, vector<2x1x256xf32>
    %459 = vector.shape_cast %458 : vector<2x1x256xf32> to vector<2x256xf32>
    %c6_629 = arith.constant 6 : index
    %c256_630 = arith.constant 256 : index
    %460 = vector.load %arg14[%c6_629, %c256_630] : memref<8x768xf32, #tpu.memory_space<vmem>>, vector<2x256xf32>
    tpu.vector_store %arg14[%c6_629, %c256_630], %459 {strides = array<i32>} : memref<8x768xf32, #tpu.memory_space<vmem>>, vector<2x256xf32>,
    %c0_631 = arith.constant 0 : index
    %c8_632 = arith.constant 8 : index
    %c0_633 = arith.constant 0 : index
    %461 = vector.load %arg10[%c0_631, %c8_632, %c0_633] : memref<2x10x256xf32, #tpu.memory_space<vmem>>, vector<2x1x256xf32>
    %462 = vector.shape_cast %461 : vector<2x1x256xf32> to vector<2x256xf32>
    %c6_634 = arith.constant 6 : index
    %c512_635 = arith.constant 512 : index
    %463 = vector.load %arg14[%c6_634, %c512_635] : memref<8x768xf32, #tpu.memory_space<vmem>>, vector<2x256xf32>
    tpu.vector_store %arg14[%c6_634, %c512_635], %462 {strides = array<i32>} : memref<8x768xf32, #tpu.memory_space<vmem>>, vector<2x256xf32>,
    %c0_636 = arith.constant 0 : index
    %c0_637 = arith.constant 0 : index
    %464 = vector.load %arg14[%c0_636, %c0_637] : memref<8x768xf32, #tpu.memory_space<vmem>>, vector<8x768xf32>
    %c0_638 = arith.constant 0 : index
    %c0_639 = arith.constant 0 : index
    %465 = vector.load %arg6[%c0_638, %c0_639] : memref<768x256xf32, #tpu.memory_space<vmem>>, vector<768x256xf32>
    %cst_640 = arith.constant dense<0.000000e+00> : vector<8x256xf32>
    %466 = tpu.matmul %464, %465, %cst_640 {dimension_numbers = #tpu.dot_dimension_numbers<[1], [0], [0], [1], [0, 0, 1, 1], [], []>} : vector<8x768xf32>, vector<768x256xf32>, vector<8x256xf32> -> vector<8x256xf32>
    %c0_641 = arith.constant 0 : index
    %c0_642 = arith.constant 0 : index
    %467 = vector.load %arg7[%c0_641, %c0_642] : memref<1x256xf32, #tpu.memory_space<vmem>>, vector<1x256xf32>
    %468 = vector.broadcast %467 : vector<1x256xf32> to vector<8x256xf32>
    %469 = arith.addf %466, %468 : vector<8x256xf32>
    %cst_643 = arith.constant 0.000000e+00 : f32
    %470 = vector.broadcast %cst_643 : f32 to vector<8x256xf32>
    %471 = arith.maximumf %469, %470 : vector<8x256xf32>
    %cst_644 = arith.constant 0.000000e+00 : f32
    %472 = vector.broadcast %cst_644 : f32 to vector<2x6x256xf32>
    %c0_645 = arith.constant 0 : index
    %c0_646 = arith.constant 0 : index
    %c0_647 = arith.constant 0 : index
    %473 = vector.load %arg11[%c0_645, %c0_646, %c0_647] : memref<2x6x256xf32, #tpu.memory_space<vmem>>, vector<2x6x256xf32>
    tpu.vector_store %arg11[%c0_645, %c0_646, %c0_647], %472 {strides = array<i32>} : memref<2x6x256xf32, #tpu.memory_space<vmem>>, vector<2x6x256xf32>,
    %474 = vector.extract_strided_slice %471 {offsets = [0, 0], sizes = [2, 256], strides = [1, 1]} : vector<8x256xf32> to vector<2x256xf32>
    %c0_648 = arith.constant 0 : index
    %c1_649 = arith.constant 1 : index
    %c0_650 = arith.constant 0 : index
    %475 = vector.load %arg11[%c0_648, %c1_649, %c0_650] : memref<2x6x256xf32, #tpu.memory_space<vmem>>, vector<2x1x256xf32>
    %476 = vector.shape_cast %475 : vector<2x1x256xf32> to vector<2x256xf32>
    %477 = vector.shape_cast %474 : vector<2x256xf32> to vector<2x1x256xf32>
    tpu.vector_store %arg11[%c0_648, %c1_649, %c0_650], %477 {strides = array<i32>} : memref<2x6x256xf32, #tpu.memory_space<vmem>>, vector<2x1x256xf32>,
    %478 = vector.extract_strided_slice %471 {offsets = [2, 0], sizes = [2, 256], strides = [1, 1]} : vector<8x256xf32> to vector<2x256xf32>
    %c0_651 = arith.constant 0 : index
    %c2_652 = arith.constant 2 : index
    %c0_653 = arith.constant 0 : index
    %479 = vector.load %arg11[%c0_651, %c2_652, %c0_653] : memref<2x6x256xf32, #tpu.memory_space<vmem>>, vector<2x1x256xf32>
    %480 = vector.shape_cast %479 : vector<2x1x256xf32> to vector<2x256xf32>
    %481 = vector.shape_cast %478 : vector<2x256xf32> to vector<2x1x256xf32>
    tpu.vector_store %arg11[%c0_651, %c2_652, %c0_653], %481 {strides = array<i32>} : memref<2x6x256xf32, #tpu.memory_space<vmem>>, vector<2x1x256xf32>,
    %482 = vector.extract_strided_slice %471 {offsets = [4, 0], sizes = [2, 256], strides = [1, 1]} : vector<8x256xf32> to vector<2x256xf32>
    %c0_654 = arith.constant 0 : index
    %c3_655 = arith.constant 3 : index
    %c0_656 = arith.constant 0 : index
    %483 = vector.load %arg11[%c0_654, %c3_655, %c0_656] : memref<2x6x256xf32, #tpu.memory_space<vmem>>, vector<2x1x256xf32>
    %484 = vector.shape_cast %483 : vector<2x1x256xf32> to vector<2x256xf32>
    %485 = vector.shape_cast %482 : vector<2x256xf32> to vector<2x1x256xf32>
    tpu.vector_store %arg11[%c0_654, %c3_655, %c0_656], %485 {strides = array<i32>} : memref<2x6x256xf32, #tpu.memory_space<vmem>>, vector<2x1x256xf32>,
    %486 = vector.extract_strided_slice %471 {offsets = [6, 0], sizes = [2, 256], strides = [1, 1]} : vector<8x256xf32> to vector<2x256xf32>
    %c0_657 = arith.constant 0 : index
    %c4_658 = arith.constant 4 : index
    %c0_659 = arith.constant 0 : index
    %487 = vector.load %arg11[%c0_657, %c4_658, %c0_659] : memref<2x6x256xf32, #tpu.memory_space<vmem>>, vector<2x1x256xf32>
    %488 = vector.shape_cast %487 : vector<2x1x256xf32> to vector<2x256xf32>
    %489 = vector.shape_cast %486 : vector<2x256xf32> to vector<2x1x256xf32>
    tpu.vector_store %arg11[%c0_657, %c4_658, %c0_659], %489 {strides = array<i32>} : memref<2x6x256xf32, #tpu.memory_space<vmem>>, vector<2x1x256xf32>,
    %c0_660 = arith.constant 0 : index
    %c1_661 = arith.constant 1 : index
    %c0_662 = arith.constant 0 : index
    %490 = vector.load %arg11[%c0_660, %c1_661, %c0_662] : memref<2x6x256xf32, #tpu.memory_space<vmem>>, vector<2x1x256xf32>
    %491 = vector.shape_cast %490 : vector<2x1x256xf32> to vector<2x256xf32>
    %c0_663 = arith.constant 0 : index
    %c2_664 = arith.constant 2 : index
    %c0_665 = arith.constant 0 : index
    %492 = vector.load %arg11[%c0_663, %c2_664, %c0_665] : memref<2x6x256xf32, #tpu.memory_space<vmem>>, vector<2x1x256xf32>
    %493 = vector.shape_cast %492 : vector<2x1x256xf32> to vector<2x256xf32>
    %c0_666 = arith.constant 0 : index
    %c3_667 = arith.constant 3 : index
    %c0_668 = arith.constant 0 : index
    %494 = vector.load %arg11[%c0_666, %c3_667, %c0_668] : memref<2x6x256xf32, #tpu.memory_space<vmem>>, vector<2x1x256xf32>
    %495 = vector.shape_cast %494 : vector<2x1x256xf32> to vector<2x256xf32>
    %c0_669 = arith.constant 0 : index
    %c4_670 = arith.constant 4 : index
    %c0_671 = arith.constant 0 : index
    %496 = vector.load %arg11[%c0_669, %c4_670, %c0_671] : memref<2x6x256xf32, #tpu.memory_space<vmem>>, vector<2x1x256xf32>
    %497 = vector.shape_cast %496 : vector<2x1x256xf32> to vector<2x256xf32>
    %498 = vector.extract_strided_slice %491 {offsets = [0, 0], sizes = [2, 64], strides = [1, 1]} : vector<2x256xf32> to vector<2x64xf32>
    %499 = vector.extract_strided_slice %491 {offsets = [0, 64], sizes = [2, 64], strides = [1, 1]} : vector<2x256xf32> to vector<2x64xf32>
    %500 = arith.maximumf %498, %499 : vector<2x64xf32>
    %501 = vector.extract_strided_slice %493 {offsets = [0, 0], sizes = [2, 64], strides = [1, 1]} : vector<2x256xf32> to vector<2x64xf32>
    %502 = arith.maximumf %500, %501 : vector<2x64xf32>
    %503 = vector.extract_strided_slice %493 {offsets = [0, 64], sizes = [2, 64], strides = [1, 1]} : vector<2x256xf32> to vector<2x64xf32>
    %504 = arith.maximumf %502, %503 : vector<2x64xf32>
    %c0_672 = arith.constant 0 : index
    %c0_673 = arith.constant 0 : index
    %505 = vector.load %arg8[%c0_672, %c0_673] : memref<2x256xf32, #tpu.memory_space<vmem>>, vector<2x64xf32>
    tpu.vector_store %arg8[%c0_672, %c0_673], %504 {strides = array<i32>} : memref<2x256xf32, #tpu.memory_space<vmem>>, vector<2x64xf32>,
    %506 = vector.extract_strided_slice %491 {offsets = [0, 64], sizes = [2, 64], strides = [1, 1]} : vector<2x256xf32> to vector<2x64xf32>
    %507 = vector.extract_strided_slice %491 {offsets = [0, 128], sizes = [2, 64], strides = [1, 1]} : vector<2x256xf32> to vector<2x64xf32>
    %508 = arith.maximumf %506, %507 : vector<2x64xf32>
    %509 = vector.extract_strided_slice %491 {offsets = [0, 192], sizes = [2, 64], strides = [1, 1]} : vector<2x256xf32> to vector<2x64xf32>
    %510 = arith.maximumf %508, %509 : vector<2x64xf32>
    %511 = vector.extract_strided_slice %493 {offsets = [0, 64], sizes = [2, 64], strides = [1, 1]} : vector<2x256xf32> to vector<2x64xf32>
    %512 = arith.maximumf %510, %511 : vector<2x64xf32>
    %513 = vector.extract_strided_slice %493 {offsets = [0, 128], sizes = [2, 64], strides = [1, 1]} : vector<2x256xf32> to vector<2x64xf32>
    %514 = arith.maximumf %512, %513 : vector<2x64xf32>
    %515 = vector.extract_strided_slice %493 {offsets = [0, 192], sizes = [2, 64], strides = [1, 1]} : vector<2x256xf32> to vector<2x64xf32>
    %516 = arith.maximumf %514, %515 : vector<2x64xf32>
    %c0_674 = arith.constant 0 : index
    %c64 = arith.constant 64 : index
    %517 = vector.load %arg8[%c0_674, %c64] : memref<2x256xf32, #tpu.memory_space<vmem>>, vector<2x64xf32>
    tpu.vector_store %arg8[%c0_674, %c64], %516 {strides = array<i32>} : memref<2x256xf32, #tpu.memory_space<vmem>>, vector<2x64xf32>,
    %518 = vector.extract_strided_slice %493 {offsets = [0, 0], sizes = [2, 64], strides = [1, 1]} : vector<2x256xf32> to vector<2x64xf32>
    %519 = vector.extract_strided_slice %493 {offsets = [0, 64], sizes = [2, 64], strides = [1, 1]} : vector<2x256xf32> to vector<2x64xf32>
    %520 = arith.maximumf %518, %519 : vector<2x64xf32>
    %521 = vector.extract_strided_slice %495 {offsets = [0, 0], sizes = [2, 64], strides = [1, 1]} : vector<2x256xf32> to vector<2x64xf32>
    %522 = arith.maximumf %520, %521 : vector<2x64xf32>
    %523 = vector.extract_strided_slice %495 {offsets = [0, 64], sizes = [2, 64], strides = [1, 1]} : vector<2x256xf32> to vector<2x64xf32>
    %524 = arith.maximumf %522, %523 : vector<2x64xf32>
    %525 = vector.extract_strided_slice %497 {offsets = [0, 0], sizes = [2, 64], strides = [1, 1]} : vector<2x256xf32> to vector<2x64xf32>
    %526 = arith.maximumf %524, %525 : vector<2x64xf32>
    %527 = vector.extract_strided_slice %497 {offsets = [0, 64], sizes = [2, 64], strides = [1, 1]} : vector<2x256xf32> to vector<2x64xf32>
    %528 = arith.maximumf %526, %527 : vector<2x64xf32>
    %c0_675 = arith.constant 0 : index
    %c128_676 = arith.constant 128 : index
    %529 = vector.load %arg8[%c0_675, %c128_676] : memref<2x256xf32, #tpu.memory_space<vmem>>, vector<2x64xf32>
    tpu.vector_store %arg8[%c0_675, %c128_676], %528 {strides = array<i32>} : memref<2x256xf32, #tpu.memory_space<vmem>>, vector<2x64xf32>,
    %530 = vector.extract_strided_slice %493 {offsets = [0, 64], sizes = [2, 64], strides = [1, 1]} : vector<2x256xf32> to vector<2x64xf32>
    %531 = vector.extract_strided_slice %493 {offsets = [0, 128], sizes = [2, 64], strides = [1, 1]} : vector<2x256xf32> to vector<2x64xf32>
    %532 = arith.maximumf %530, %531 : vector<2x64xf32>
    %533 = vector.extract_strided_slice %493 {offsets = [0, 192], sizes = [2, 64], strides = [1, 1]} : vector<2x256xf32> to vector<2x64xf32>
    %534 = arith.maximumf %532, %533 : vector<2x64xf32>
    %535 = vector.extract_strided_slice %495 {offsets = [0, 64], sizes = [2, 64], strides = [1, 1]} : vector<2x256xf32> to vector<2x64xf32>
    %536 = arith.maximumf %534, %535 : vector<2x64xf32>
    %537 = vector.extract_strided_slice %495 {offsets = [0, 128], sizes = [2, 64], strides = [1, 1]} : vector<2x256xf32> to vector<2x64xf32>
    %538 = arith.maximumf %536, %537 : vector<2x64xf32>
    %539 = vector.extract_strided_slice %495 {offsets = [0, 192], sizes = [2, 64], strides = [1, 1]} : vector<2x256xf32> to vector<2x64xf32>
    %540 = arith.maximumf %538, %539 : vector<2x64xf32>
    %541 = vector.extract_strided_slice %497 {offsets = [0, 64], sizes = [2, 64], strides = [1, 1]} : vector<2x256xf32> to vector<2x64xf32>
    %542 = arith.maximumf %540, %541 : vector<2x64xf32>
    %543 = vector.extract_strided_slice %497 {offsets = [0, 128], sizes = [2, 64], strides = [1, 1]} : vector<2x256xf32> to vector<2x64xf32>
    %544 = arith.maximumf %542, %543 : vector<2x64xf32>
    %545 = vector.extract_strided_slice %497 {offsets = [0, 192], sizes = [2, 64], strides = [1, 1]} : vector<2x256xf32> to vector<2x64xf32>
    %546 = arith.maximumf %544, %545 : vector<2x64xf32>
    %c0_677 = arith.constant 0 : index
    %c192 = arith.constant 192 : index
    %547 = vector.load %arg8[%c0_677, %c192] : memref<2x256xf32, #tpu.memory_space<vmem>>, vector<2x64xf32>
    tpu.vector_store %arg8[%c0_677, %c192], %546 {strides = array<i32>} : memref<2x256xf32, #tpu.memory_space<vmem>>, vector<2x64xf32>,
    return
  }
  func.func @transform_0(%arg0: i32) -> (i32, i32, i32) {
    %c0_i32 = arith.constant 0 : i32
    %c0_i32_0 = arith.constant 0 : i32
    %c0_i32_1 = arith.constant 0 : i32
    %c0_i32_2 = arith.constant 0 : i32
    return %c0_i32, %c0_i32_0, %c0_i32_1 : i32, i32, i32
  }
  func.func @transform_1(%arg0: i32) -> (i32, i32) {
    %c0_i32 = arith.constant 0 : i32
    %c0_i32_0 = arith.constant 0 : i32
    %c0_i32_1 = arith.constant 0 : i32
    return %c0_i32, %c0_i32_0 : i32, i32
  }
  func.func @transform_2(%arg0: i32) -> (i32, i32) {
    %c0_i32 = arith.constant 0 : i32
    %c0_i32_0 = arith.constant 0 : i32
    %c0_i32_1 = arith.constant 0 : i32
    return %c0_i32, %c0_i32_0 : i32, i32
  }
  func.func @transform_3(%arg0: i32) -> (i32, i32) {
    %c0_i32 = arith.constant 0 : i32
    %c0_i32_0 = arith.constant 0 : i32
    %c0_i32_1 = arith.constant 0 : i32
    return %c0_i32, %c0_i32_0 : i32, i32
  }
  func.func @transform_4(%arg0: i32) -> (i32, i32) {
    %c0_i32 = arith.constant 0 : i32
    %c0_i32_0 = arith.constant 0 : i32
    %c0_i32_1 = arith.constant 0 : i32
    return %c0_i32, %c0_i32_0 : i32, i32
  }
  func.func @transform_5(%arg0: i32) -> (i32, i32) {
    %c0_i32 = arith.constant 0 : i32
    %c0_i32_0 = arith.constant 0 : i32
    %c0_i32_1 = arith.constant 0 : i32
    return %c0_i32, %c0_i32_0 : i32, i32
  }
  func.func @transform_6(%arg0: i32) -> (i32, i32) {
    %c0_i32 = arith.constant 0 : i32
    %c0_i32_0 = arith.constant 0 : i32
    %c0_i32_1 = arith.constant 0 : i32
    return %c0_i32, %c0_i32_0 : i32, i32
  }
  func.func @transform_7(%arg0: i32) -> (i32, i32) {
    %c0_i32 = arith.constant 0 : i32
    %c0_i32_0 = arith.constant 0 : i32
    %c0_i32_1 = arith.constant 0 : i32
    return %c0_i32, %c0_i32_0 : i32, i32
  }
}

</mosaic_0001>

<bundles_post_ra>
// kernel: feature_encoder.1
= control target key start
LH: loop header
LB: loop body
LE: loop exit
PB: predicated region body
PF: predicated region fallthrough
CT: control target
= control target key end

     0   :  { %12 = vsyncpa [#allocation9], 0  ;;  %s5996_s0 = inlined_call_operand.vmem [shape: f32[2,36,128], index: 0, kind: input, shape index: {}]   ;;  %s5997_s1 = inlined_call_operand.hbm [shape: f32[640,256], index: 1, kind: input, shape index: {}]   ;;  %s5998_s2 = inlined_call_operand.vmem [shape: f32[1,256], index: 2, kind: input, shape index: {}]   ;;  %s5999_s3 = inlined_call_operand.hbm [shape: f32[768,256], index: 3, kind: input, shape index: {}]   ;;  %s6000_s4 = inlined_call_operand.vmem [shape: f32[1,256], index: 4, kind: input, shape index: {}]   ;;  %s6001_s5 = inlined_call_operand.hbm [shape: f32[768,256], index: 5, kind: input, shape index: {}]   ;;  %s6002_s6 = inlined_call_operand.vmem [shape: f32[1,256], index: 6, kind: input, shape index: {}]   ;;  %s6003_s7 = inlined_call_operand.vmem [shape: f32[2,256], index: 7, kind: output, shape index: {}]  }
   0x1   :  { %13 = vsyncpa [#allocation11], 0  ;;  %s4765_s24 = smov [#allocation10]   ;;  %s4766_s26 = smov [#allocation8]  }
   0x2   :  { %s35_s25 = sshll.u32 %s4765_s24, 4  ;;  %s21_s27 = sshll.u32 %s4766_s26, 4  ;;  %s36_s25 = int_to_ptr.vmem [resolvable:$true] %s35_s25  ;;  %s4814_s27 = int_to_ptr.vmem [resolvable:$true] %s21_s27 }
   0x3   :  { %s4695_s30 = scalar_lea.hbm %s5999_s3, 24576 }
   0x4   :  { %p4696_p0 = scmp.ne.s32.totalorder %s5999_s3, %s4695_s30  ;;  %p4699_p1 = scmp.lt.u32.totalorder %s4695_s30, %s5999_s3 }
   0x6   :  { %p4701_p2 = pnand %p4699_p1, %p4696_p0 }
   0x8   :  { %4704 = shalt.err (!%p4701_p2)
}
   0x9   :  { %s4705_s12 = scalar_lea.vmem %s36_s25, 24576  ;;  %p4710_p4 = scmp.lt.s32.totalorder %s36_s25, %s36_s25 }
   0xa   :  { %p4706_p3 = scmp.ne.s32.totalorder %s36_s25, %s4705_s12  ;;  %p4711_p5 = scmp.lt.s32.totalorder %s4705_s12, %s4705_s12 }
   0xc   :  { %p4712_p6 = por %p4711_p5, %p4710_p4 }
   0xe   :  { %p4713_p7 = pnand %p4712_p6, %p4706_p3 }
  0x10   :  { %4716 = shalt.err (!%p4713_p7)
}
  0x11   :  { %s4767_s13 = smov 256   ;;  %s4768_s14 = smov 16  }
  0x12   :  { %41 = dma.hbm_to_vmem [thread:$0]  %s5999_s3, 24576, %s36_s25, [#allocation11], %s4767_s13, %s4767_s13, %s4768_s14  }
  0x13   :  { %s4717_s19 = scalar_lea.hbm %s5997_s1, 20480 }
  0x14   :  { %p4718_p8 = scmp.ne.s32.totalorder %s5997_s1, %s4717_s19  ;;  %p4721_p9 = scmp.lt.u32.totalorder %s4717_s19, %s5997_s1 }
  0x16   :  { %p4723_p10 = pnand %p4721_p9, %p4718_p8 }
  0x18   :  { %4726 = shalt.err (!%p4723_p10)
}
  0x19   :  { %s4727_s24 = scalar_lea.vmem %s4814_s27, 20480  ;;  %p4732_p12 = scmp.lt.s32.totalorder %s4814_s27, %s4814_s27 }
  0x1a   :  { %p4728_p11 = scmp.ne.s32.totalorder %s4814_s27, %s4727_s24  ;;  %p4733_p13 = scmp.lt.s32.totalorder %s4727_s24, %s4727_s24 }
  0x1c   :  { %p4734_p0 = por %p4733_p13, %p4732_p12 }
  0x1e   :  { %p4735_p1 = pnand %p4734_p0, %p4728_p11 }
  0x20   :  { %4738 = shalt.err (!%p4735_p1)
}
  0x21   :  { %27 = dma.hbm_to_vmem [thread:$0]  %s5997_s1, 20480, %s4814_s27, [#allocation9], %s4767_s13, %s4767_s13, %s4768_s14  }
  0x22   :  { %s4769_s26 = smov [#allocation12]   ;;  %s4739_s8 = scalar_lea.hbm %s6001_s5, 24576 }
  0x23   :  { %s49_s28 = sshll.u32 %s4769_s26, 4  ;;  %p4740_p2 = scmp.ne.s32.totalorder %s6001_s5, %s4739_s8  ;;  %s50_s28 = int_to_ptr.vmem [resolvable:$true] %s49_s28 }
  0x24   :  { %p4743_p3 = scmp.lt.u32.totalorder %s4739_s8, %s6001_s5 }
  0x26   :  { %p4745_p4 = pnand %p4743_p3, %p4740_p2 }
  0x28   :  { %4748 = shalt.err (!%p4745_p4)
}
  0x29   :  { %s4749_s15 = scalar_lea.vmem %s50_s28, 24576  ;;  %p4754_p6 = scmp.lt.s32.totalorder %s50_s28, %s50_s28 }
  0x2a   :  { %p4750_p5 = scmp.ne.s32.totalorder %s50_s28, %s4749_s15  ;;  %p4755_p7 = scmp.lt.s32.totalorder %s4749_s15, %s4749_s15 }
  0x2c   :  { %p4756_p8 = por %p4755_p7, %p4754_p6 }
  0x2e   :  { %p4757_p9 = pnand %p4756_p8, %p4750_p5 }
  0x30   :  { %4760 = shalt.err (!%p4757_p9)
}
  0x31   :  { %55 = dma.hbm_to_vmem [thread:$0]  %s6001_s5, 24576, %s50_s28, [#allocation11], %s4767_s13, %s4767_s13, %s4768_s14  }
  0x32   :  { %4761 = dma.done.wait [#allocation9], 20480  }
  0x33   :  { %4762 = vsyncadd [#allocation9], 4294946816 }
  0x34   :  { %4763 = dma.done.wait [#allocation11], 49152  }
  0x35   :  { %4764 = vsyncadd [#allocation11], 4294918144  ;;  %v4770_v0 = vmov 0.0   ;;  %v856_v1 = vld [vmem:[#allocation8 + $0x208] sm:$0xff]  ;;  %v858_v2 = vld [vmem:[#allocation8 + $0x218] sm:$0xff]  ;;  %vm72_vm0 = vcmask 1041409  }
  0x36   :  { %1238 = vst [vmem:[#allocation2] sm:$0xff] %v4770_v0  ;;  %1239 = vst [vmem:[#allocation2 + $0x8] sm:$0xff] %v4770_v0  ;;  %v855_v3 = vld [vmem:[#allocation8 + $0x200] sm:$0xff]  ;;  %v4163_v4 = vpack.c.bf16 %v858_v2, %v856_v1  ;;  %v857_v5 = vld [vmem:[#allocation8 + $0x210] sm:$0xff]  ;;  %vm114_vm1 = vcmask 1043459   ;;  %vm160_vm2 = vcmask 1045509  }
  0x37   :  { %1240 = vst [vmem:[#allocation2 + $0x10] sm:$0xff] %v4770_v0  ;;  %1241 = vst [vmem:[#allocation2 + $0x18] sm:$0xff] %v4770_v0  ;;  %v860_v6 = vld [vmem:[#allocation8 + $0x228] sm:$0xff]  ;;  %v862_v7 = vld [vmem:[#allocation8 + $0x238] sm:$0xff]  ;;  %v4165_v8 = vpack.c.bf16 %v857_v5, %v855_v3  ;;  %vm206_vm3 = vcmask 1047559   ;;  %vm3929_vm5 = vcmask 523264  }
  0x38   :  { %1242 = vst [vmem:[#allocation2 + $0x20] sm:$0x3] %v4770_v0  ;;  %1243 = vst [vmem:[#allocation2 + $0x28] sm:$0x3] %v4770_v0  ;;  %v4167_v9 = vpack.c.bf16 %v862_v7, %v860_v6  ;;  %v859_v10 = vld [vmem:[#allocation8 + $0x220] sm:$0xff]  ;;  %v861_v11 = vld [vmem:[#allocation8 + $0x230] sm:$0xff]  ;;  %4164 = vmatprep.subr.bf16.mxu0 %v4163_v4 }
  0x39   :  { %1244 = vst [vmem:[#allocation2 + $0x30] sm:$0xff] %v4770_v0  ;;  %1245 = vst [vmem:[#allocation2 + $0x38] sm:$0xff] %v4770_v0  ;;  %v864_v12 = vld [vmem:[#allocation8 + $0x248] sm:$0xff]  ;;  %v866_v13 = vld [vmem:[#allocation8 + $0x258] sm:$0xff]  ;;  %4166 = vmatpush1.bf16.msra.mxu0 %v4165_v8  ;;  %v4169_v14 = vpack.c.bf16 %v861_v11, %v859_v10  ;;  %vm3925_vm6 = vcmask 517120   ;;  %vm3969_vm7 = vcmask 1041920  }
  0x3a   :  { %1246 = vst [vmem:[#allocation2 + $0x40] sm:$0xff] %v4770_v0  ;;  %1247 = vst [vmem:[#allocation2 + $0x48] sm:$0xff] %v4770_v0  ;;  %4168 = vmatprep.subr.bf16.mxu0 %v4167_v9  ;;  %v4171_v15 = vpack.c.bf16 %v866_v13, %v864_v12  ;;  %v863_v16 = vld [vmem:[#allocation8 + $0x240] sm:$0xff]  ;;  %v865_v17 = vld [vmem:[#allocation8 + $0x250] sm:$0xff] }
  0x3b   :  { %1248 = vst [vmem:[#allocation2 + $0x50] sm:$0x3] %v4770_v0  ;;  %1249 = vst [vmem:[#allocation2 + $0x58] sm:$0x3] %v4770_v0  ;;  %v868_v18 = vld [vmem:[#allocation8 + $0x268] sm:$0xff]  ;;  %v870_v19 = vld [vmem:[#allocation8 + $0x278] sm:$0xff]  ;;  %v4173_v20 = vpack.c.bf16 %v865_v17, %v863_v16 }
  0x3c   :  { %2810 = vst [vmem:[#allocation3] sm:$0xff] %v4770_v0  ;;  %2811 = vst [vmem:[#allocation3 + $0x8] sm:$0xff] %v4770_v0  ;;  %v4175_v21 = vpack.c.bf16 %v870_v19, %v868_v18  ;;  %v867_v22 = vld [vmem:[#allocation8 + $0x260] sm:$0xff]  ;;  %v869_v23 = vld [vmem:[#allocation8 + $0x270] sm:$0xff] }
  0x3d   :  { %2812 = vst [vmem:[#allocation3 + $0x10] sm:$0x3] %v4770_v0  ;;  %2813 = vst [vmem:[#allocation3 + $0x18] sm:$0x3] %v4770_v0  ;;  %4170 = vmatpush1.bf16.msra.mxu0 %v4169_v14  ;;  %v872_v24 = vld [vmem:[#allocation8 + $0x288] sm:$0xff]  ;;  %v874_v25 = vld [vmem:[#allocation8 + $0x298] sm:$0xff]  ;;  %v4177_v31 = vpack.c.bf16 %v869_v23, %v867_v22 }
  0x3e   :  { %2814 = vst [vmem:[#allocation3 + $0x20] sm:$0xff] %v4770_v0  ;;  %2815 = vst [vmem:[#allocation3 + $0x28] sm:$0xff] %v4770_v0  ;;  %4172 = vmatprep.subr.bf16.mxu0 %v4171_v15  ;;  %v792_v26 = vld [vmem:[#allocation8 + $0x8] sm:$0xff]  ;;  %v794_v27 = vld [vmem:[#allocation8 + $0x18] sm:$0xff]  ;;  %v4179_v35 = vpack.c.bf16 %v874_v25, %v872_v24 }
  0x3f   :  { %2816 = vst [vmem:[#allocation3 + $0x30] sm:$0x3] %v4770_v0  ;;  %2817 = vst [vmem:[#allocation3 + $0x38] sm:$0x3] %v4770_v0  ;;  %v4099_v28 = vpack.c.bf16 %v794_v27, %v792_v26  ;;  %v791_v29 = vld [vmem:[#allocation8] sm:$0xff]  ;;  %v793_v30 = vld [vmem:[#allocation8 + $0x10] sm:$0xff] }
  0x40   :  { %3796 = vst [vmem:[#allocation4] sm:$0x3f] %v4770_v0  ;;  %3797 = vst [vmem:[#allocation4 + $0x8] sm:$0x3f] %v4770_v0  ;;  %v871_v32 = vld [vmem:[#allocation8 + $0x280] sm:$0xff]  ;;  %v4101_v33 = vpack.c.bf16 %v793_v30, %v791_v29  ;;  %v796_v34 = vld [vmem:[#allocation8 + $0x28] sm:$0xff] }
  0x41   :  { %3798 = vst [vmem:[#allocation4 + $0x10] sm:$0x3f] %v4770_v0  ;;  %3799 = vst [vmem:[#allocation4 + $0x18] sm:$0x3f] %v4770_v0  ;;  %4174 = vmatpush1.bf16.msra.mxu0 %v4173_v20  ;;  %v873_v36 = vld [vmem:[#allocation8 + $0x290] sm:$0xff]  ;;  %v876_v37 = vld [vmem:[#allocation8 + $0x2a8] sm:$0xff]  ;;  %4100 = vmatprep.subr.bf16.mxu1 %v4099_v28 }
  0x42   :  { %4176 = vmatprep.subr.bf16.mxu0 %v4175_v21  ;;  %v798_v38 = vld [vmem:[#allocation8 + $0x38] sm:$0xff]  ;;  %4102 = vmatpush1.bf16.msra.mxu1 %v4101_v33  ;;  %v795_v41 = vld [vmem:[#allocation8 + $0x20] sm:$0xff]  ;;  %v797_v42 = vld [vmem:[#allocation8 + $0x30] sm:$0xff]  ;;  %v4181_v46 = vpack.c.bf16 %v873_v36, %v871_v32 }
  0x43   :  { %v878_v39 = vld [vmem:[#allocation8 + $0x2b8] sm:$0xff]  ;;  %v4103_v40 = vpack.c.bf16 %v798_v38, %v796_v34  ;;  %v4105_v43 = vpack.c.bf16 %v797_v42, %v795_v41  ;;  %v800_v44 = vld [vmem:[#allocation8 + $0x48] sm:$0xff]  ;;  %v875_v47 = vld [vmem:[#allocation8 + $0x2a0] sm:$0xff] }
  0x44   :  { %v802_v45 = vld [vmem:[#allocation8 + $0x58] sm:$0xff]  ;;  %v799_v49 = vld [vmem:[#allocation8 + $0x40] sm:$0xff]  ;;  %v4183_v50 = vpack.c.bf16 %v878_v39, %v876_v37  ;;  %v877_v51 = vld [vmem:[#allocation8 + $0x2b0] sm:$0xff] }
  0x45   :  { %4178 = vmatpush1.bf16.msra.mxu0 %v4177_v31  ;;  %4104 = vmatprep.subr.bf16.mxu1 %v4103_v40  ;;  %v4107_v48 = vpack.c.bf16 %v802_v45, %v800_v44  ;;  %v880_v52 = vld [vmem:[#allocation8 + $0x2c8] sm:$0xff]  ;;  %v801_v53 = vld [vmem:[#allocation8 + $0x50] sm:$0xff]  ;;  %v882_v54 = vld [vmem:[#allocation8 + $0x2d8] sm:$0xff]  ;;  %v4185_v61 = vpack.c.bf16 %v877_v51, %v875_v47 }
  0x46   :  { %4180 = vmatprep.subr.bf16.mxu0 %v4179_v35  ;;  %4106 = vmatpush1.bf16.msra.mxu1 %v4105_v43  ;;  %v4109_v55 = vpack.c.bf16 %v801_v53, %v799_v49  ;;  %v804_v56 = vld [vmem:[#allocation8 + $0x68] sm:$0xff]  ;;  %v806_v57 = vld [vmem:[#allocation8 + $0x78] sm:$0xff]  ;;  %v803_v59 = vld [vmem:[#allocation8 + $0x60] sm:$0xff]  ;;  %v4187_v63 = vpack.c.bf16 %v882_v54, %v880_v52 }
  0x47   :  { %4108 = vmatprep.subr.bf16.mxu1 %v4107_v48  ;;  %v4111_v58 = vpack.c.bf16 %v806_v57, %v804_v56  ;;  %v805_v60 = vld [vmem:[#allocation8 + $0x70] sm:$0xff]  ;;  %v808_v62 = vld [vmem:[#allocation8 + $0x88] sm:$0xff]  ;;  %v879_v0 = vld [vmem:[#allocation8 + $0x2c0] sm:$0xff] }
  0x48   :  { %v881_v1 = vld [vmem:[#allocation8 + $0x2d0] sm:$0xff]  ;;  %v810_v2 = vld [vmem:[#allocation8 + $0x98] sm:$0xff]  ;;  %v884_v3 = vld [vmem:[#allocation8 + $0x2e8] sm:$0xff]  ;;  %v4113_v5 = vpack.c.bf16 %v805_v60, %v803_v59 }
  0x49   :  { %4182 = vmatpush1.bf16.msra.mxu0 %v4181_v46  ;;  %v886_v4 = vld [vmem:[#allocation8 + $0x2f8] sm:$0xff]  ;;  %v4115_v6 = vpack.c.bf16 %v810_v2, %v808_v62  ;;  %v807_v7 = vld [vmem:[#allocation8 + $0x80] sm:$0xff]  ;;  %v809_v8 = vld [vmem:[#allocation8 + $0x90] sm:$0xff]  ;;  %v4189_v9 = vpack.c.bf16 %v881_v1, %v879_v0 }
  0x4a   :  { %4184 = vmatprep.subr.bf16.mxu0 %v4183_v50  ;;  %4110 = vmatpush1.bf16.msra.mxu1 %v4109_v55  ;;  %v812_v10 = vld [vmem:[#allocation8 + $0xa8] sm:$0xff]  ;;  %v814_v11 = vld [vmem:[#allocation8 + $0xb8] sm:$0xff]  ;;  %v4191_v12 = vpack.c.bf16 %v886_v4, %v884_v3  ;;  %v883_v13 = vld [vmem:[#allocation8 + $0x2e0] sm:$0xff]  ;;  %v4117_v17 = vpack.c.bf16 %v809_v8, %v807_v7 }
  0x4b   :  { %4112 = vmatprep.subr.bf16.mxu1 %v4111_v58  ;;  %v885_v14 = vld [vmem:[#allocation8 + $0x2f0] sm:$0xff]  ;;  %v888_v15 = vld [vmem:[#allocation8 + $0x308] sm:$0xff]  ;;  %v890_v16 = vld [vmem:[#allocation8 + $0x318] sm:$0xff]  ;;  %v4119_v18 = vpack.c.bf16 %v814_v11, %v812_v10 }
  0x4c   :  { %v811_v19 = vld [vmem:[#allocation8 + $0xa0] sm:$0xff]  ;;  %v813_v20 = vld [vmem:[#allocation8 + $0xb0] sm:$0xff]  ;;  %v4193_v21 = vpack.c.bf16 %v885_v14, %v883_v13  ;;  %v816_v22 = vld [vmem:[#allocation8 + $0xc8] sm:$0xff]  ;;  %v4195_v24 = vpack.c.bf16 %v890_v16, %v888_v15 }
  0x4d   :  { %4186 = vmatpush1.bf16.msra.mxu0 %v4185_v61  ;;  %v818_v23 = vld [vmem:[#allocation8 + $0xd8] sm:$0xff]  ;;  %v887_v25 = vld [vmem:[#allocation8 + $0x300] sm:$0xff]  ;;  %v889_v26 = vld [vmem:[#allocation8 + $0x310] sm:$0xff]  ;;  %v4121_v29 = vpack.c.bf16 %v813_v20, %v811_v19 }
  0x4e   :  { %4188 = vmatprep.subr.bf16.mxu0 %v4187_v63  ;;  %4114 = vmatpush1.bf16.msra.mxu1 %v4113_v5  ;;  %v892_v27 = vld [vmem:[#allocation8 + $0x328] sm:$0xff]  ;;  %v894_v28 = vld [vmem:[#allocation8 + $0x338] sm:$0xff]  ;;  %v4866_v30 = vld [vmem:[#allocation8 + $0x320] sm:$0xff]  ;;  %v4123_v32 = vpack.c.bf16 %v818_v23, %v816_v22  ;;  %v4197_v35 = vpack.c.bf16 %v889_v26, %v887_v25 }
  0x4f   :  { %4116 = vmatprep.subr.bf16.mxu1 %v4115_v6  ;;  %v4868_v31 = vld [vmem:[#allocation8 + $0x330] sm:$0xff]  ;;  %v815_v33 = vld [vmem:[#allocation8 + $0xc0] sm:$0xff]  ;;  %v4870_v36 = vld [vmem:[#allocation8 + $0x348] sm:$0xff]  ;;  %v4199_v40 = vpack.c.bf16 %v894_v28, %v892_v27 }
  0x50   :  { %v817_v34 = vld [vmem:[#allocation8 + $0xd0] sm:$0xff]  ;;  %v4872_v37 = vld [vmem:[#allocation8 + $0x358] sm:$0xff]  ;;  %v820_v38 = vld [vmem:[#allocation8 + $0xe8] sm:$0xff]  ;;  %v4201_v58 = vpack.c.bf16 %v4868_v31, %v4866_v30 }
  0x51   :  { %4190 = vmatpush1.bf16.msra.mxu0 %v4189_v9  ;;  %v822_v39 = vld [vmem:[#allocation8 + $0xf8] sm:$0xff]  ;;  %v4874_v41 = vld [vmem:[#allocation8 + $0xe0] sm:$0xff]  ;;  %v4876_v42 = vld [vmem:[#allocation8 + $0xf0] sm:$0xff]  ;;  %v4125_v45 = vpack.c.bf16 %v817_v34, %v815_v33  ;;  %v4203_v1 = vpack.c.bf16 %v4872_v37, %v4870_v36 }
  0x52   :  { %4192 = vmatprep.subr.bf16.mxu0 %v4191_v12  ;;  %4118 = vmatpush1.bf16.msra.mxu1 %v4117_v17  ;;  %v92_v43 = vld [vmem:[%s5996_s0 + $0x3] sm:$0x1]  ;;  %v93_v44 = vld [vmem:[%s5996_s0 + $0x2b] sm:$0x1]  ;;  %v4884_v46 = vld [vmem:[#allocation8 + $0x108] sm:$0xff]  ;;  %v4127_v53 = vpack.c.bf16 %v822_v39, %v820_v38  ;;  %v4129_v8 = vpack.c.bf16 %v4876_v42, %v4874_v41 }
  0x53   :  { %4120 = vmatprep.subr.bf16.mxu1 %v4119_v18  ;;  %v4886_v47 = vld [vmem:[#allocation8 + $0x118] sm:$0xff]  ;;  %v96_v48 = vrot.slane %v93_v44, 7  ;;  %v136_v49 = vld [vmem:[%s5996_s0 + $0x5] sm:$0x1]  ;;  %v4894_v51 = vld [vmem:[#allocation8 + $0x340] sm:$0xff] }
  0x54   :  { %v137_v50 = vld [vmem:[%s5996_s0 + $0x2d] sm:$0x1]  ;;  %v4896_v52 = vld [vmem:[#allocation8 + $0x350] sm:$0xff]  ;;  %v140_v54 = vrot.slane %v136_v49, 6  ;;  %v183_v57 = vld [vmem:[%s5996_s0 + $0x2f] sm:$0x1]  ;;  %v4131_v15 = vpack.c.bf16 %v4886_v47, %v4884_v46 }
  0x55   :  { %4194 = vmatpush1.bf16.msra.mxu0 %v4193_v21  ;;  %v141_v55 = vrot.slane %v137_v50, 5  ;;  %v182_v56 = vld [vmem:[%s5996_s0 + $0x7] sm:$0x1]  ;;  %v4906_v59 = vld [vmem:[#allocation8 + $0x368] sm:$0xff]  ;;  %v97_v60 = vsel %vm72_vm0, %v96_v48, %v92_v43  ;;  %v187_v62 = vrot.slane %v183_v57, 3  ;;  %v902_v2 = vld [vmem:[#allocation8 + $0x378] sm:$0xff]  ;;  %v4205_v21 = vpack.c.bf16 %v4896_v52, %v4894_v51 }
  0x56   :  { %4196 = vmatprep.subr.bf16.mxu0 %v4195_v24  ;;  %4122 = vmatpush1.bf16.msra.mxu1 %v4121_v29  ;;  %v186_v61 = vrot.slane %v182_v56, 4  ;;  %v228_v63 = vld [vmem:[%s5996_s0 + $0x9] sm:$0x1]  ;;  %v229_v0 = vld [vmem:[%s5996_s0 + $0x31] sm:$0x1]  ;;  %v4919_v4 = vld [vmem:[#allocation8 + $0x110] sm:$0xff]  ;;  %v4207_v26 = vpack.c.bf16 %v902_v2, %v4906_v59 }
  0x57   :  { %4124 = vmatprep.subr.bf16.mxu1 %v4123_v32  ;;  %v4917_v3 = vld [vmem:[#allocation8 + $0x100] sm:$0xff]  ;;  %99 = vst [vmem:[#allocation5 + $0x18] sm:$0x3] %v97_v60  ;;  %v142_v5 = vsel %vm114_vm1, %v141_v55, %v140_v54  ;;  %v232_v6 = vrot.slane %v228_v63, 2  ;;  %v233_v7 = vrot.slane %v229_v0, 1  ;;  %v828_v10 = vld [vmem:[#allocation8 + $0x128] sm:$0xff] }
  0x58   :  { %144 = vst [vmem:[#allocation5 + $0x18] sm:$0xc] %v142_v5  ;;  %v188_v9 = vsel %vm160_vm2, %v187_v62, %v186_v61  ;;  %v830_v11 = vld [vmem:[#allocation8 + $0x138] sm:$0xff]  ;;  %v84_v12 = vld [vmem:[%s5996_s0 + $0x2] sm:$0x1]  ;;  %v899_v27 = vld [vmem:[#allocation8 + $0x360] sm:$0xff] }
  0x59   :  { %4198 = vmatpush1.bf16.msra.mxu0 %v4197_v35  ;;  %v85_v13 = vld [vmem:[%s5996_s0 + $0x2a] sm:$0x1]  ;;  %v127_v14 = vld [vmem:[%s5996_s0 + $0x4] sm:$0x1]  ;;  %190 = vst [vmem:[#allocation5 + $0x18] sm:$0x30] %v188_v9  ;;  %v234_v16 = vsel %vm206_vm3, %v233_v7, %v232_v6  ;;  %v4133_v35 = vpack.c.bf16 %v4919_v4, %v4917_v3  ;;  %v4135_v38 = vpack.c.bf16 %v830_v11, %v828_v10 }
  0x5a   :  { %4200 = vmatprep.subr.bf16.mxu0 %v4199_v40  ;;  %4126 = vmatpush1.bf16.msra.mxu1 %v4125_v45  ;;  %v88_v17 = vrot.slane %v85_v13, 7  ;;  %v128_v18 = vld [vmem:[%s5996_s0 + $0x2c] sm:$0x1]  ;;  %v131_v19 = vrot.slane %v127_v14, 6  ;;  %v173_v20 = vld [vmem:[%s5996_s0 + $0x6] sm:$0x1] }
  0x5b   :  { %4128 = vmatprep.subr.bf16.mxu1 %v4127_v53  ;;  %236 = vst [vmem:[#allocation5 + $0x18] sm:$0xc0] %v234_v16  ;;  %v132_v22 = vrot.slane %v128_v18, 5  ;;  %v174_v23 = vld [vmem:[%s5996_s0 + $0x2e] sm:$0x1]  ;;  %v177_v24 = vrot.slane %v173_v20, 4 }
  0x5c   :  { %v219_v25 = vld [vmem:[%s5996_s0 + $0x8] sm:$0x1]  ;;  %v901_v28 = vld [vmem:[#allocation8 + $0x370] sm:$0xff]  ;;  %v89_v29 = vsel %vm72_vm0, %v88_v17, %v84_v12  ;;  %v178_v30 = vrot.slane %v174_v23, 3  ;;  %v220_v31 = vld [vmem:[%s5996_s0 + $0x30] sm:$0x1] }
  0x5d   :  { %4202 = vmatpush1.bf16.msra.mxu0 %v4201_v58  ;;  %v223_v32 = vrot.slane %v219_v25, 2  ;;  %v904_v33 = vld [vmem:[#allocation8 + $0x388] sm:$0xff]  ;;  %v906_v34 = vld [vmem:[#allocation8 + $0x398] sm:$0xff]  ;;  %91 = vst [vmem:[#allocation5 + $0x10] sm:$0x3] %v89_v29  ;;  %v133_v36 = vsel %vm114_vm1, %v132_v22, %v131_v19  ;;  %v224_v37 = vrot.slane %v220_v31, 1  ;;  %v4209_v42 = vpack.c.bf16 %v901_v28, %v899_v27 }
  0x5e   :  { %4204 = vmatprep.subr.bf16.mxu0 %v4203_v1  ;;  %4130 = vmatpush1.bf16.msra.mxu1 %v4129_v8  ;;  %135 = vst [vmem:[#allocation5 + $0x10] sm:$0xc] %v133_v36  ;;  %v179_v39 = vsel %vm160_vm2, %v178_v30, %v177_v24  ;;  %v827_v40 = vld [vmem:[#allocation8 + $0x120] sm:$0xff]  ;;  %v829_v41 = vld [vmem:[#allocation8 + $0x130] sm:$0xff]  ;;  %v832_v44 = vld [vmem:[#allocation8 + $0x148] sm:$0xff]  ;;  %v4211_v46 = vpack.c.bf16 %v906_v34, %v904_v33 }
  0x5f   :  { %4132 = vmatprep.subr.bf16.mxu1 %v4131_v15  ;;  %181 = vst [vmem:[#allocation5 + $0x10] sm:$0x30] %v179_v39  ;;  %v225_v43 = vsel %vm206_vm3, %v224_v37, %v223_v32  ;;  %v834_v45 = vld [vmem:[#allocation8 + $0x158] sm:$0xff]  ;;  %v903_v47 = vld [vmem:[#allocation8 + $0x380] sm:$0xff]  ;;  %v905_v48 = vld [vmem:[#allocation8 + $0x390] sm:$0xff]  ;;  %v4137_v51 = vpack.c.bf16 %v829_v41, %v827_v40 }
  0x60   :  { %227 = vst [vmem:[#allocation5 + $0x10] sm:$0xc0] %v225_v43  ;;  %v908_v49 = vld [vmem:[#allocation8 + $0x3a8] sm:$0xff]  ;;  %v910_v50 = vld [vmem:[#allocation8 + $0x3b8] sm:$0xff]  ;;  %v4139_v53 = vpack.c.bf16 %v834_v45, %v832_v44  ;;  %v831_v54 = vld [vmem:[#allocation8 + $0x140] sm:$0xff]  ;;  %v4213_v56 = vpack.c.bf16 %v905_v48, %v903_v47 }
  0x61   :  { %4206 = vmatpush1.bf16.msra.mxu0 %v4205_v21  ;;  %v833_v55 = vld [vmem:[#allocation8 + $0x150] sm:$0xff]  ;;  %v836_v57 = vld [vmem:[#allocation8 + $0x168] sm:$0xff]  ;;  %v838_v58 = vld [vmem:[#allocation8 + $0x178] sm:$0xff]  ;;  %v4215_v59 = vpack.c.bf16 %v910_v50, %v908_v49 }
  0x62   :  { %4208 = vmatprep.subr.bf16.mxu0 %v4207_v26  ;;  %4134 = vmatpush1.bf16.msra.mxu1 %v4133_v35  ;;  %v774_v52 = vld [vmem:[#allocation5 + $0x18] sm:$0xff]  ;;  %v907_v60 = vld [vmem:[#allocation8 + $0x3a0] sm:$0xff]  ;;  %v909_v61 = vld [vmem:[#allocation8 + $0x3b0] sm:$0xff]  ;;  %v4141_v0 = vpack.c.bf16 %v833_v55, %v831_v54  ;;  %v4143_v3 = vpack.c.bf16 %v838_v58, %v836_v57 }
  0x63   :  { %4136 = vmatprep.subr.bf16.mxu1 %v4135_v38  ;;  %1116 = vmatprep.mubr.f32.mxu0 %v774_v52  ;;  %v912_v62 = vld [vmem:[#allocation8 + $0x3c8] sm:$0xff]  ;;  %v914_v63 = vld [vmem:[#allocation8 + $0x3d8] sm:$0xff]  ;;  %v4961_v1 = vld [vmem:[#allocation8 + $0x3c0] sm:$0xff]  ;;  %v4217_v6 = vpack.c.bf16 %v909_v61, %v907_v60 }
  0x64   :  { %v4963_v2 = vld [vmem:[#allocation8 + $0x3d0] sm:$0xff]  ;;  %v835_v4 = vld [vmem:[#allocation8 + $0x160] sm:$0xff]  ;;  %v4965_v7 = vld [vmem:[#allocation8 + $0x3e8] sm:$0xff]  ;;  %v4219_v10 = vpack.c.bf16 %v914_v63, %v912_v62 }
  0x65   :  { %4210 = vmatpush1.bf16.msra.mxu0 %v4209_v42  ;;  %v837_v5 = vld [vmem:[#allocation8 + $0x170] sm:$0xff]  ;;  %v840_v8 = vld [vmem:[#allocation8 + $0x188] sm:$0xff]  ;;  %v842_v9 = vld [vmem:[#allocation8 + $0x198] sm:$0xff]  ;;  %v4221_v27 = vpack.c.bf16 %v4963_v2, %v4961_v1 }
  0x66   :  { %4212 = vmatprep.subr.bf16.mxu0 %v4211_v46  ;;  %4138 = vmatpush1.bf16.msra.mxu1 %v4137_v51  ;;  %v918_v11 = vld [vmem:[#allocation8 + $0x3f8] sm:$0xff]  ;;  %v4967_v12 = vld [vmem:[#allocation8 + $0x180] sm:$0xff]  ;;  %v4969_v13 = vld [vmem:[#allocation8 + $0x190] sm:$0xff]  ;;  %v4145_v14 = vpack.c.bf16 %v837_v5, %v835_v4  ;;  %v4147_v22 = vpack.c.bf16 %v842_v9, %v840_v8 }
  0x67   :  { %4140 = vmatprep.subr.bf16.mxu1 %v4139_v53  ;;  %v4971_v15 = vld [vmem:[#allocation8 + $0x1a8] sm:$0xff]  ;;  %v4973_v16 = vld [vmem:[#allocation8 + $0x1b8] sm:$0xff]  ;;  %v271_v18 = vld [vmem:[%s5996_s0 + $0x33] sm:$0x1]  ;;  %v4223_v34 = vpack.c.bf16 %v918_v11, %v4965_v7  ;;  %v4149_v41 = vpack.c.bf16 %v4969_v13, %v4967_v12 }
  0x68   :  { %v270_v17 = vld [vmem:[%s5996_s0 + $0xb] sm:$0x1]  ;;  %v313_v19 = vld [vmem:[%s5996_s0 + $0xd] sm:$0x1]  ;;  %v4984_v20 = vld [vmem:[#allocation8 + $0x3e0] sm:$0xff]  ;;  %v274_v23 = vrot.slane %v271_v18, 7  ;;  %v4151_v49 = vpack.c.bf16 %v4973_v16, %v4971_v15 }
  0x69   :  { %4214 = vmatpush1.bf16.msra.mxu0 %v4213_v56  ;;  %v4986_v21 = vld [vmem:[#allocation8 + $0x3f0] sm:$0xff]  ;;  %v314_v24 = vld [vmem:[%s5996_s0 + $0x35] sm:$0x1]  ;;  %v317_v25 = vrot.slane %v313_v19, 6  ;;  %v358_v26 = vld [vmem:[%s5996_s0 + $0xf] sm:$0x1] }
  0x6a   :  { %4216 = vmatprep.subr.bf16.mxu0 %v4215_v59  ;;  %4142 = vmatpush1.bf16.msra.mxu1 %v4141_v0  ;;  %v4996_v28 = vld [vmem:[#allocation8 + $0x408] sm:$0xff]  ;;  %v4998_v29 = vld [vmem:[#allocation8 + $0x418] sm:$0xff]  ;;  %v318_v30 = vrot.slane %v314_v24, 5  ;;  %v359_v31 = vld [vmem:[%s5996_s0 + $0x37] sm:$0x1]  ;;  %v362_v32 = vrot.slane %v358_v26, 4  ;;  %v275_v36 = vsel %vm72_vm0, %v274_v23, %v270_v17  ;;  %v4225_v55 = vpack.c.bf16 %v4986_v21, %v4984_v20 }
  0x6b   :  { %4144 = vmatprep.subr.bf16.mxu1 %v4143_v3  ;;  %v403_v33 = vld [vmem:[%s5996_s0 + $0x11] sm:$0x1]  ;;  %v363_v37 = vrot.slane %v359_v31, 3  ;;  %v404_v38 = vld [vmem:[%s5996_s0 + $0x39] sm:$0x1]  ;;  %v5018_v42 = vld [vmem:[#allocation8 + $0x1b0] sm:$0xff]  ;;  %v4227_v61 = vpack.c.bf16 %v4998_v29, %v4996_v28 }
  0x6c   :  { %v5007_v35 = vld [vmem:[#allocation8 + $0x1a0] sm:$0xff]  ;;  %v407_v39 = vrot.slane %v403_v33, 2  ;;  %v262_v40 = vld [vmem:[%s5996_s0 + $0xa] sm:$0x1]  ;;  %277 = vst [vmem:[#allocation5 + $0x40] sm:$0x3] %v275_v36  ;;  %v319_v43 = vsel %vm114_vm1, %v318_v30, %v317_v25 }
  0x6d   :  { %4218 = vmatpush1.bf16.msra.mxu0 %v4217_v6  ;;  %v408_v44 = vrot.slane %v404_v38, 1  ;;  %v263_v45 = vld [vmem:[%s5996_s0 + $0x32] sm:$0x1]  ;;  %v304_v46 = vld [vmem:[%s5996_s0 + $0xc] sm:$0x1]  ;;  %v5029_v48 = vld [vmem:[#allocation8 + $0x410] sm:$0xff]  ;;  %v364_v50 = vsel %vm160_vm2, %v363_v37, %v362_v32  ;;  %v4153_v6 = vpack.c.bf16 %v5018_v42, %v5007_v35 }
  0x6e   :  { %4220 = vmatprep.subr.bf16.mxu0 %v4219_v10  ;;  %4146 = vmatpush1.bf16.msra.mxu1 %v4145_v14  ;;  %v5027_v47 = vld [vmem:[#allocation8 + $0x400] sm:$0xff]  ;;  %321 = vst [vmem:[#allocation5 + $0x40] sm:$0xc] %v319_v43  ;;  %v266_v51 = vrot.slane %v263_v45, 7  ;;  %v308_v53 = vrot.slane %v304_v46, 6  ;;  %v5051_v62 = vld [vmem:[#allocation8 + $0x428] sm:$0xff] }
  0x6f   :  { %4148 = vmatprep.subr.bf16.mxu1 %v4147_v22  ;;  %v305_v52 = vld [vmem:[%s5996_s0 + $0x34] sm:$0x1]  ;;  %v349_v54 = vld [vmem:[%s5996_s0 + $0xe] sm:$0x1]  ;;  %366 = vst [vmem:[#allocation5 + $0x40] sm:$0x30] %v364_v50  ;;  %v409_v56 = vsel %vm206_vm3, %v408_v44, %v407_v39  ;;  %v4229_v17 = vpack.c.bf16 %v5029_v48, %v5027_v47 }
  0x70   :  { %v309_v57 = vrot.slane %v305_v52, 5  ;;  %v350_v58 = vld [vmem:[%s5996_s0 + $0x36] sm:$0x1]  ;;  %v353_v59 = vrot.slane %v349_v54, 4  ;;  %v394_v60 = vld [vmem:[%s5996_s0 + $0x10] sm:$0x1]  ;;  %v267_v63 = vsel %vm72_vm0, %v266_v51, %v262_v40 }
  0x71   :  { %4222 = vmatpush1.bf16.msra.mxu0 %v4221_v27  ;;  %411 = vst [vmem:[#allocation5 + $0x40] sm:$0xc0] %v409_v56  ;;  %v354_v0 = vrot.slane %v350_v58, 3  ;;  %v395_v1 = vld [vmem:[%s5996_s0 + $0x38] sm:$0x1]  ;;  %v398_v2 = vrot.slane %v394_v60, 2 }
  0x72   :  { %4224 = vmatprep.subr.bf16.mxu0 %v4223_v34  ;;  %v848_v3 = vld [vmem:[#allocation8 + $0x1c8] sm:$0xff]  ;;  %v773_v4 = vld [vmem:[#allocation5 + $0x10] sm:$0xff]  ;;  %v926_v5 = vld [vmem:[#allocation8 + $0x438] sm:$0xff]  ;;  %4150 = vmatpush1.bf16.msra.mxu1 %v4149_v41  ;;  %269 = vst [vmem:[#allocation5 + $0x38] sm:$0x3] %v267_v63  ;;  %v310_v7 = vsel %vm114_vm1, %v309_v57, %v308_v53  ;;  %v399_v8 = vrot.slane %v395_v1, 1 }
  0x73   :  { %v850_v9 = vld [vmem:[#allocation8 + $0x1d8] sm:$0xff]  ;;  %v5060_v10 = vld [vmem:[#allocation8 + $0x420] sm:$0xff]  ;;  %v5062_v11 = vld [vmem:[#allocation8 + $0x430] sm:$0xff]  ;;  %4152 = vmatprep.subr.bf16.mxu1 %v4151_v49  ;;  %312 = vst [vmem:[#allocation5 + $0x38] sm:$0xc] %v310_v7  ;;  %v355_v12 = vsel %vm160_vm2, %v354_v0, %v353_v59  ;;  %v4231_v22 = vpack.c.bf16 %v926_v5, %v5051_v62 }
  0x74   :  { %v4155_v13 = vpack.c.bf16 %v850_v9, %v848_v3  ;;  %v847_v14 = vld [vmem:[#allocation8 + $0x1c0] sm:$0xff]  ;;  %v849_v15 = vld [vmem:[#allocation8 + $0x1d0] sm:$0xff]  ;;  %357 = vst [vmem:[#allocation5 + $0x38] sm:$0x30] %v355_v12  ;;  %v400_v18 = vsel %vm206_vm3, %v399_v8, %v398_v2  ;;  %v446_v19 = vld [vmem:[%s5996_s0 + $0x3b] sm:$0x1]  ;;  %v4233_v41 = vpack.c.bf16 %v5062_v11, %v5060_v10 }
  0x75   :  { %v445_v16 = vld [vmem:[%s5996_s0 + $0x13] sm:$0x1]  ;;  %4226 = vmatpush1.bf16.msra.mxu0 %v4225_v55  ;;  %v488_v20 = vld [vmem:[%s5996_s0 + $0x15] sm:$0x1]  ;;  %v489_v21 = vld [vmem:[%s5996_s0 + $0x3d] sm:$0x1]  ;;  %v4157_v29 = vpack.c.bf16 %v849_v15, %v847_v14 }
  0x76   :  { %4228 = vmatprep.subr.bf16.mxu0 %v4227_v61  ;;  %v5081_v23 = vld [vmem:[#allocation8 + $0x448] sm:$0xff]  ;;  %402 = vst [vmem:[#allocation5 + $0x38] sm:$0xc0] %v400_v18  ;;  %v449_v24 = vrot.slane %v446_v19, 7  ;;  %v492_v25 = vrot.slane %v488_v20, 6  ;;  %v493_v26 = vrot.slane %v489_v21, 5  ;;  %4154 = vmatpush1.bf16.msra.mxu1 %v4153_v6 }
  0x77   :  { %v533_v27 = vld [vmem:[%s5996_s0 + $0x17] sm:$0x1]  ;;  %v930_v28 = vld [vmem:[#allocation8 + $0x458] sm:$0xff]  ;;  %v534_v30 = vld [vmem:[%s5996_s0 + $0x3f] sm:$0x1]  ;;  %4156 = vmatprep.subr.bf16.mxu1 %v4155_v13 }
  0x78   :  { %v537_v31 = vrot.slane %v533_v27, 4  ;;  %v578_v32 = vld [vmem:[%s5996_s0 + $0x19] sm:$0x1]  ;;  %1117 = vmatmul.mubr.f32.vlgmr.msra.gmra.mrb[0].mxu0 %v773_v4  ;;  %v5092_v33 = vld [vmem:[#allocation8 + $0x440] sm:$0xff]  ;;  %v5094_v34 = vld [vmem:[#allocation8 + $0x450] sm:$0xff]  ;;  %v450_v35 = vsel %vm72_vm0, %v449_v24, %v445_v16  ;;  %v494_v36 = vsel %vm114_vm1, %v493_v26, %v492_v25  ;;  %v538_v37 = vrot.slane %v534_v30, 3 }
  0x79   :  { %v579_v38 = vld [vmem:[%s5996_s0 + $0x41] sm:$0x1]  ;;  %v582_v39 = vrot.slane %v578_v32, 2  ;;  %v437_v40 = vld [vmem:[%s5996_s0 + $0x12] sm:$0x1]  ;;  %4230 = vmatpush1.bf16.msra.mxu0 %v4229_v17  ;;  %v5106_v42 = vld [vmem:[#allocation8 + $0x468] sm:$0xff]  ;;  %v4235_v48 = vpack.c.bf16 %v930_v28, %v5081_v23  ;;  %v4237_v3 = vpack.c.bf16 %v5094_v34, %v5092_v33 }
  0x7a   :  { %v5108_v43 = vld [vmem:[#allocation8 + $0x478] sm:$0xff]  ;;  %v779_v44 = vld [vmem:[#allocation5 + $0x40] sm:$0xff]  ;;  %452 = vst [vmem:[#allocation5 + $0x68] sm:$0x3] %v450_v35  ;;  %496 = vst [vmem:[#allocation5 + $0x68] sm:$0xc] %v494_v36  ;;  %4232 = vmatprep.subr.bf16.mxu0 %v4231_v22  ;;  %v539_v49 = vsel %vm160_vm2, %v538_v37, %v537_v31  ;;  %4158 = vmatpush1.bf16.msra.mxu1 %v4157_v29 }
  0x7b   :  { %v583_v45 = vrot.slane %v579_v38, 1  ;;  %v438_v46 = vld [vmem:[%s5996_s0 + $0x3a] sm:$0x1]  ;;  %v479_v47 = vld [vmem:[%s5996_s0 + $0x14] sm:$0x1]  ;;  %1122 = vmatprep.mubr.f32.mxu0 %v779_v44  ;;  %v5133_v60 = vld [vmem:[#allocation8 + $0x470] sm:$0xff]  ;;  %v4239_v10 = vpack.c.bf16 %v5108_v43, %v5106_v42 }
  0x7c   :  { %v441_v50 = vrot.slane %v438_v46, 7  ;;  %v480_v51 = vld [vmem:[%s5996_s0 + $0x3c] sm:$0x1]  ;;  %v483_v52 = vrot.slane %v479_v47, 6  ;;  %v524_v53 = vld [vmem:[%s5996_s0 + $0x16] sm:$0x1] }
  0x7d   :  { %541 = vst [vmem:[#allocation5 + $0x68] sm:$0x30] %v539_v49  ;;  %v584_v54 = vsel %vm206_vm3, %v583_v45, %v582_v39  ;;  %v484_v55 = vrot.slane %v480_v51, 5  ;;  %v525_v56 = vld [vmem:[%s5996_s0 + $0x3e] sm:$0x1]  ;;  %v528_v57 = vrot.slane %v524_v53, 4  ;;  %4234 = vmatpush1.bf16.msra.mxu0 %v4233_v41 }
  0x7e   :  { %v569_v58 = vld [vmem:[%s5996_s0 + $0x18] sm:$0x1]  ;;  %v5131_v59 = vld [vmem:[#allocation8 + $0x460] sm:$0xff]  ;;  %586 = vst [vmem:[#allocation5 + $0x68] sm:$0xc0] %v584_v54  ;;  %v442_v61 = vsel %vm72_vm0, %v441_v50, %v437_v40  ;;  %v529_v62 = vrot.slane %v525_v56, 3  ;;  %4236 = vmatprep.subr.bf16.mxu0 %v4235_v48 }
  0x7f   :  { %v570_v63 = vld [vmem:[%s5996_s0 + $0x40] sm:$0x1]  ;;  %v573_v0 = vrot.slane %v569_v58, 2  ;;  %v852_v1 = vld [vmem:[#allocation8 + $0x1e8] sm:$0xff]  ;;  %v854_v2 = vld [vmem:[#allocation8 + $0x1f8] sm:$0xff]  ;;  %v485_v7 = vsel %vm114_vm1, %v484_v55, %v483_v52  ;;  %v4241_v26 = vpack.c.bf16 %v5133_v60, %v5131_v59 }
  0x80   :  { %v5141_v4 = vld [vmem:[#allocation8 + $0x488] sm:$0xff]  ;;  %v5143_v5 = vld [vmem:[#allocation8 + $0x498] sm:$0xff]  ;;  %444 = vst [vmem:[#allocation5 + $0x60] sm:$0x3] %v442_v61  ;;  %v574_v8 = vrot.slane %v570_v63, 1  ;;  %v4159_v9 = vpack.c.bf16 %v854_v2, %v852_v1  ;;  %v530_v11 = vsel %vm160_vm2, %v529_v62, %v528_v57  ;;  %v851_v12 = vld [vmem:[#allocation8 + $0x1e0] sm:$0xff] }
  0x81   :  { %v778_v6 = vld [vmem:[#allocation5 + $0x38] sm:$0xff]  ;;  %487 = vst [vmem:[#allocation5 + $0x60] sm:$0xc] %v485_v7  ;;  %v853_v13 = vld [vmem:[#allocation8 + $0x1f0] sm:$0xff]  ;;  %532 = vst [vmem:[#allocation5 + $0x60] sm:$0x30] %v530_v11  ;;  %4238 = vmatpush1.bf16.msra.mxu0 %v4237_v3  ;;  %v4243_v27 = vpack.c.bf16 %v5143_v5, %v5141_v4 }
  0x82   :  { %1123 = vmatmul.mubr.f32.gmra.mrb[2].mxu0 %v778_v6  ;;  %v620_v14 = vld [vmem:[%s5996_s0 + $0x1b] sm:$0x1]  ;;  %v575_v15 = vsel %vm206_vm3, %v574_v8, %v573_v0  ;;  %4160 = vmatprep.subr.bf16.mxu1 %v4159_v9  ;;  %v4161_v16 = vpack.c.bf16 %v853_v13, %v851_v12  ;;  %v621_v17 = vld [vmem:[%s5996_s0 + $0x43] sm:$0x1]  ;;  %v663_v18 = vld [vmem:[%s5996_s0 + $0x1d] sm:$0x1] }
  0x83   :  { %v664_v19 = vld [vmem:[%s5996_s0 + $0x45] sm:$0x1]  ;;  %v5162_v20 = vld [vmem:[#allocation8 + $0x480] sm:$0xff]  ;;  %577 = vst [vmem:[#allocation5 + $0x60] sm:$0xc0] %v575_v15  ;;  %v624_v22 = vrot.slane %v621_v17, 7  ;;  %4240 = vmatprep.subr.bf16.mxu0 %v4239_v10 }
  0x84   :  { %v5164_v21 = vld [vmem:[#allocation8 + $0x490] sm:$0xff]  ;;  %v667_v23 = vrot.slane %v663_v18, 6  ;;  %v668_v24 = vrot.slane %v664_v19, 5  ;;  %v708_v25 = vld [vmem:[%s5996_s0 + $0x1f] sm:$0x1]  ;;  %v5175_v29 = vld [vmem:[#allocation8 + $0x4b8] sm:$0xff]  ;;  %4162 = vmatpush1.bf16.msra.mxu1 %v4161_v16 }
  0x85   :  { %v5173_v28 = vld [vmem:[#allocation8 + $0x4a8] sm:$0xff]  ;;  %v709_v30 = vld [vmem:[%s5996_s0 + $0x47] sm:$0x1]  ;;  %v712_v31 = vrot.slane %v708_v25, 4  ;;  %v753_v32 = vld [vmem:[%s5996_s0 + $0x21] sm:$0x1]  ;;  %v625_v33 = vsel %vm72_vm0, %v624_v22, %v620_v14  ;;  %4242 = vmatpush1.bf16.msra.mxu0 %v4241_v26  ;;  %v4245_v50 = vpack.c.bf16 %v5164_v21, %v5162_v20 }
  0x86   :  { %v669_v34 = vsel %vm114_vm1, %v668_v24, %v667_v23  ;;  %v713_v35 = vrot.slane %v709_v30, 3  ;;  %v754_v36 = vld [vmem:[%s5996_s0 + $0x49] sm:$0x1]  ;;  %v757_v37 = vrot.slane %v753_v32, 2  ;;  %v76_v38 = vld [vmem:[%s5996_s0 + $0x1] sm:$0x1]  ;;  %4244 = vmatprep.subr.bf16.mxu0 %v4243_v27  ;;  %v4247_v58 = vpack.c.bf16 %v5175_v29, %v5173_v28 }
  0x87   :  { %v784_v39 = vld [vmem:[#allocation5 + $0x68] sm:$0xff]  ;;  %627 = vst [vmem:[#allocation5 + $0x90] sm:$0x3] %v625_v33  ;;  %671 = vst [vmem:[#allocation5 + $0x90] sm:$0xc] %v669_v34  ;;  %v758_v40 = vrot.slane %v754_v36, 1 }
  0x88   :  { %v77_v41 = vld [vmem:[%s5996_s0 + $0x29] sm:$0x1]  ;;  %v118_v42 = vld [vmem:[%s5996_s0 + $0x3] sm:$0x1]  ;;  %v5197_v43 = vld [vmem:[#allocation8 + $0x4a0] sm:$0xff]  ;;  %1128 = vmatprep.mubr.f32.mxu0 %v784_v39  ;;  %v714_v45 = vsel %vm160_vm2, %v713_v35, %v712_v31 }
  0x89   :  { %v5199_v44 = vld [vmem:[#allocation8 + $0x4b0] sm:$0xff]  ;;  %v80_v46 = vrot.slane %v77_v41, 7  ;;  %v119_v47 = vld [vmem:[%s5996_s0 + $0x2b] sm:$0x1]  ;;  %v122_v48 = vrot.slane %v118_v42, 6  ;;  %v5210_v51 = vld [vmem:[#allocation8 + $0x4c8] sm:$0xff]  ;;  %v759_v53 = vsel %vm206_vm3, %v758_v40, %v757_v37  ;;  %4246 = vmatpush1.bf16.msra.mxu0 %v4245_v50 }
  0x8a   :  { %v164_v49 = vld [vmem:[%s5996_s0 + $0x5] sm:$0x1]  ;;  %v5212_v52 = vld [vmem:[#allocation8 + $0x4d8] sm:$0xff]  ;;  %716 = vst [vmem:[#allocation5 + $0x90] sm:$0x30] %v714_v45  ;;  %v123_v54 = vrot.slane %v119_v47, 5  ;;  %v4249_v12 = vpack.c.bf16 %v5199_v44, %v5197_v43  ;;  %4248 = vmatprep.subr.bf16.mxu0 %v4247_v58 }
  0x8b   :  { %v165_v55 = vld [vmem:[%s5996_s0 + $0x2d] sm:$0x1]  ;;  %v168_v56 = vrot.slane %v164_v49, 4  ;;  %v210_v57 = vld [vmem:[%s5996_s0 + $0x7] sm:$0x1]  ;;  %v81_v59 = vsel %vm72_vm0, %v80_v46, %v76_v38  ;;  %v5237_v5 = vld [vmem:[#allocation8 + $0x4c0] sm:$0xff]  ;;  %v4251_v20 = vpack.c.bf16 %v5212_v52, %v5210_v51 }
  0x8c   :  { %761 = vst [vmem:[#allocation5 + $0x90] sm:$0xc0] %v759_v53  ;;  %v169_v60 = vrot.slane %v165_v55, 3  ;;  %v211_v61 = vld [vmem:[%s5996_s0 + $0x2f] sm:$0x1]  ;;  %v214_v62 = vrot.slane %v210_v57, 2  ;;  %v124_v1 = vsel %vm114_vm1, %v123_v54, %v122_v48 }
  0x8d   :  { %v612_v63 = vld [vmem:[%s5996_s0 + $0x1a] sm:$0x1]  ;;  %v783_v0 = vld [vmem:[#allocation5 + $0x60] sm:$0xff]  ;;  %83 = vst [vmem:[#allocation5 + $0x8] sm:$0x3] %v81_v59  ;;  %v215_v2 = vrot.slane %v211_v61, 1  ;;  %4250 = vmatpush1.bf16.msra.mxu0 %v4249_v12 }
  0x8e   :  { %v613_v3 = vld [vmem:[%s5996_s0 + $0x42] sm:$0x1]  ;;  %v654_v4 = vld [vmem:[%s5996_s0 + $0x1c] sm:$0x1]  ;;  %1129 = vmatmul.mubr.f32.gmra.mrb[4].mxu0 %v783_v0  ;;  %126 = vst [vmem:[#allocation5 + $0x8] sm:$0xc] %v124_v1  ;;  %v170_v7 = vsel %vm160_vm2, %v169_v60, %v168_v56  ;;  %4252 = vmatprep.subr.bf16.mxu0 %v4251_v20 }
  0x8f   :  { %v5239_v6 = vld [vmem:[#allocation8 + $0x4d0] sm:$0xff]  ;;  %v616_v8 = vrot.slane %v613_v3, 7  ;;  %v658_v10 = vrot.slane %v654_v4, 6  ;;  %v699_v11 = vld [vmem:[%s5996_s0 + $0x1e] sm:$0x1]  ;;  %v216_v13 = vsel %vm206_vm3, %v215_v2, %v214_v62  ;;  %v950_v19 = vld [vmem:[#allocation8 + $0x4f8] sm:$0xff] }
  0x90   :  { %v655_v9 = vld [vmem:[%s5996_s0 + $0x44] sm:$0x1]  ;;  %172 = vst [vmem:[#allocation5 + $0x8] sm:$0x30] %v170_v7  ;;  %v700_v15 = vld [vmem:[%s5996_s0 + $0x46] sm:$0x1]  ;;  %v4253_v36 = vpack.c.bf16 %v5239_v6, %v5237_v5 }
  0x91   :  { %v659_v14 = vrot.slane %v655_v9, 5  ;;  %v703_v16 = vrot.slane %v699_v11, 4  ;;  %v744_v17 = vld [vmem:[%s5996_s0 + $0x20] sm:$0x1]  ;;  %v948_v18 = vld [vmem:[#allocation8 + $0x4e8] sm:$0xff]  ;;  %v617_v21 = vsel %vm72_vm0, %v616_v8, %v612_v63  ;;  %v704_v22 = vrot.slane %v700_v15, 3 }
  0x92   :  { %218 = vst [vmem:[#allocation5 + $0x8] sm:$0xc0] %v216_v13  ;;  %v745_v23 = vld [vmem:[%s5996_s0 + $0x48] sm:$0x1]  ;;  %v748_v24 = vrot.slane %v744_v17, 2  ;;  %v5273_v30 = vld [vmem:[#allocation8 + $0x4e0] sm:$0xff]  ;;  %v4255_v43 = vpack.c.bf16 %v950_v19, %v948_v18  ;;  %4254 = vmatpush1.bf16.msra.mxu0 %v4253_v36 }
  0x93   :  { %v67_v25 = vld [vmem:[%s5996_s0] sm:$0x1]  ;;  %619 = vst [vmem:[#allocation5 + $0x88] sm:$0x3] %v617_v21  ;;  %v660_v26 = vsel %vm114_vm1, %v659_v14, %v658_v10  ;;  %v749_v27 = vrot.slane %v745_v23, 1  ;;  %v705_v31 = vsel %vm160_vm2, %v704_v22, %v703_v16  ;;  %v789_v37 = vld [vmem:[#allocation5 + $0x90] sm:$0xff] }
  0x94   :  { %v68_v28 = vld [vmem:[%s5996_s0 + $0x28] sm:$0x1]  ;;  %v108_v29 = vld [vmem:[%s5996_s0 + $0x2] sm:$0x1]  ;;  %662 = vst [vmem:[#allocation5 + $0x88] sm:$0xc] %v660_v26  ;;  %1134 = vmatprep.mubr.f32.mxu0 %v789_v37  ;;  %4256 = vmatprep.subr.bf16.mxu0 %v4255_v43 }
  0x95   :  { %v71_v32 = vrot.slane %v68_v28, 7  ;;  %v109_v33 = vld [vmem:[%s5996_s0 + $0x2a] sm:$0x1]  ;;  %v112_v34 = vrot.slane %v108_v29, 6  ;;  %v154_v35 = vld [vmem:[%s5996_s0 + $0x4] sm:$0x1]  ;;  %v750_v38 = vsel %vm206_vm3, %v749_v27, %v748_v24 }
  0x96   :  { %707 = vst [vmem:[#allocation5 + $0x88] sm:$0x30] %v705_v31  ;;  %v113_v39 = vrot.slane %v109_v33, 5  ;;  %v155_v40 = vld [vmem:[%s5996_s0 + $0x2c] sm:$0x1]  ;;  %v158_v41 = vrot.slane %v154_v35, 4 }
  0x97   :  { %v949_v42 = vld [vmem:[#allocation8 + $0x4f0] sm:$0xff]  ;;  %752 = vst [vmem:[#allocation5 + $0x88] sm:$0xc0] %v750_v38  ;;  %v73_v44 = vsel %vm72_vm0, %v71_v32, %v67_v25  ;;  %v159_v45 = vrot.slane %v155_v40, 3  ;;  %v201_v47 = vld [vmem:[%s5996_s0 + $0x2e] sm:$0x1] }
  0x98   :  { %v200_v46 = vld [vmem:[%s5996_s0 + $0x6] sm:$0x1]  ;;  %v2372_v48 = vld [vmem:[#allocation10 + $0x8] sm:$0xff]  ;;  %75 = vst [vmem:[#allocation5] sm:$0x3] %v73_v44  ;;  %v115_v49 = vsel %vm114_vm1, %v113_v39, %v112_v34  ;;  %v205_v51 = vrot.slane %v201_v47, 1  ;;  %v4257_v55 = vpack.c.bf16 %v949_v42, %v5273_v30 }
  0x99   :  { %v204_v50 = vrot.slane %v200_v46, 2  ;;  %v254_v52 = vld [vmem:[%s5996_s0 + $0x9] sm:$0x1]  ;;  %v255_v53 = vld [vmem:[%s5996_s0 + $0x31] sm:$0x1]  ;;  %v161_v54 = vsel %vm160_vm2, %v159_v45, %v158_v41  ;;  %v2373_v7 = vld [vmem:[#allocation10 + $0x10] sm:$0xff] }
  0x9a   :  { %117 = vst [vmem:[#allocation5] sm:$0xc] %v115_v49  ;;  %v258_v56 = vrot.slane %v255_v53, 7  ;;  %v295_v57 = vld [vmem:[%s5996_s0 + $0xb] sm:$0x1]  ;;  %v5321_v6 = vld [vmem:[#allocation10] sm:$0xff]  ;;  %4258 = vmatpush1.bf16.msra.mxu0 %v4257_v55 }
  0x9b   :  { %v296_v58 = vld [vmem:[%s5996_s0 + $0x33] sm:$0x1]  ;;  %v2374_v59 = vld [vmem:[#allocation10 + $0x18] sm:$0xff]  ;;  %163 = vst [vmem:[#allocation5] sm:$0x30] %v161_v54  ;;  %v207_v61 = vsel %vm206_vm3, %v205_v51, %v204_v50  ;;  %v299_v62 = vrot.slane %v295_v57, 6  ;;  %v4261_v33 = vpack.c.bf16 %v2373_v7, %v5321_v6 }
  0x9c   :  { %v772_v60 = vld [vmem:[#allocation5 + $0x8] sm:$0xff]  ;;  %v300_v63 = vrot.slane %v296_v58, 5  ;;  %v4259_v1 = vpack.c.bf16 %v2374_v59, %v2372_v48  ;;  %209 = vst [vmem:[#allocation5] sm:$0xc0] %v207_v61  ;;  %v259_v2 = vsel %vm72_vm0, %v258_v56, %v254_v52  ;;  %v341_v3 = vld [vmem:[%s5996_s0 + $0x35] sm:$0x1] }
  0x9d   :  { %v340_v0 = vld [vmem:[%s5996_s0 + $0xd] sm:$0x1]  ;;  %1027 = vmatprep.mubr.f32.mxu1 %v772_v60  ;;  %v385_v5 = vld [vmem:[%s5996_s0 + $0xf] sm:$0x1]  ;;  %261 = vst [vmem:[#allocation5 + $0x30] sm:$0x3] %v259_v2 }
  0x9e   :  { %v344_v4 = vrot.slane %v340_v0, 4  ;;  %v301_v8 = vsel %vm114_vm1, %v300_v63, %v299_v62  ;;  %v345_v9 = vrot.slane %v341_v3, 3  ;;  %v386_v10 = vld [vmem:[%s5996_s0 + $0x37] sm:$0x1]  ;;  %v389_v11 = vrot.slane %v385_v5, 2  ;;  %4260 = vmatprep.subr.bf16.mxu1 %v4259_v1  ;;  %v2376_v16 = vld [vmem:[#allocation10 + $0x28] sm:$0xff] }
  0x9f   :  { %v100_v12 = vld [vmem:[%s5996_s0 + $0x4] sm:$0x1]  ;;  %303 = vst [vmem:[#allocation5 + $0x30] sm:$0xc] %v301_v8  ;;  %v390_v13 = vrot.slane %v386_v10, 1  ;;  %v788_v17 = vld [vmem:[#allocation5 + $0x88] sm:$0xff] }
  0xa0   :  { %v101_v14 = vld [vmem:[%s5996_s0 + $0x2c] sm:$0x1]  ;;  %v145_v15 = vld [vmem:[%s5996_s0 + $0x6] sm:$0x1]  ;;  %v346_v18 = vsel %vm160_vm2, %v345_v9, %v344_v4  ;;  %v146_v20 = vld [vmem:[%s5996_s0 + $0x2e] sm:$0x1]  ;;  %1135 = vmatmul.mubr.f32.gmra.mrb[6].mxu0 %v788_v17 }
  0xa1   :  { %v104_v19 = vrot.slane %v101_v14, 7  ;;  %v149_v21 = vrot.slane %v145_v15, 6  ;;  %v2378_v22 = vld [vmem:[#allocation10 + $0x38] sm:$0xff]  ;;  %348 = vst [vmem:[#allocation5 + $0x30] sm:$0x30] %v346_v18  ;;  %v391_v23 = vsel %vm206_vm3, %v390_v13, %v389_v11  ;;  %v150_v24 = vrot.slane %v146_v20, 5 }
  0xa2   :  { %v191_v25 = vld [vmem:[%s5996_s0 + $0x8] sm:$0x1]  ;;  %v192_v26 = vld [vmem:[%s5996_s0 + $0x30] sm:$0x1]  ;;  %v5347_v27 = vld [vmem:[#allocation2] sm:$0xff]  ;;  %v4263_v39 = vpack.c.bf16 %v2378_v22, %v2376_v16 }
  0xa3   :  { %1205 = vmatprep.mubr.f32.mxu0 %v5347_v27  ;;  %393 = vst [vmem:[#allocation5 + $0x30] sm:$0xc0] %v391_v23  ;;  %v105_v28 = vsel %vm72_vm0, %v104_v19, %v100_v12  ;;  %v195_v29 = vrot.slane %v191_v25, 4  ;;  %v196_v30 = vrot.slane %v192_v26, 3  ;;  %v237_v31 = vld [vmem:[%s5996_s0 + $0xa] sm:$0x1]  ;;  %v151_v34 = vsel %vm114_vm1, %v150_v24, %v149_v21 }
  0xa4   :  { %v238_v32 = vld [vmem:[%s5996_s0 + $0x32] sm:$0x1]  ;;  %107 = vst [vmem:[#allocation5 + $0x20] sm:$0x3] %v105_v28  ;;  %v241_v35 = vrot.slane %v237_v31, 2  ;;  %v771_v40 = vld [vmem:[#allocation5] sm:$0xff] }
  0xa5   :  { %v242_v36 = vrot.slane %v238_v32, 1  ;;  %v246_v37 = vld [vmem:[%s5996_s0 + $0x8] sm:$0x1]  ;;  %v247_v38 = vld [vmem:[%s5996_s0 + $0x30] sm:$0x1]  ;;  %v197_v41 = vsel %vm160_vm2, %v196_v30, %v195_v29  ;;  %1028 = vmatmul.mubr.f32.vlgmr.msra.gmra.mrb[0].mxu1 %v771_v40  ;;  %v2377_v1 = vld [vmem:[#allocation10 + $0x30] sm:$0xff] }
  0xa6   :  { %153 = vst [vmem:[#allocation5 + $0x20] sm:$0xc] %v151_v34  ;;  %v250_v42 = vrot.slane %v247_v38, 7  ;;  %v286_v43 = vld [vmem:[%s5996_s0 + $0xa] sm:$0x1]  ;;  %v2375_v45 = vld [vmem:[#allocation10 + $0x20] sm:$0xff]  ;;  %4262 = vmatpush1.bf16.msra.mxu1 %v4261_v33 }
  0xa7   :  { %v287_v44 = vld [vmem:[%s5996_s0 + $0x32] sm:$0x1]  ;;  %199 = vst [vmem:[#allocation5 + $0x20] sm:$0x30] %v197_v41  ;;  %v243_v46 = vsel %vm206_vm3, %v242_v36, %v241_v35  ;;  %v290_v47 = vrot.slane %v286_v43, 6  ;;  %4264 = vmatprep.subr.bf16.mxu1 %v4263_v39  ;;  %v4265_v7 = vpack.c.bf16 %v2377_v1, %v2375_v45  ;;  %v2380_v8 = vld [vmem:[#allocation10 + $0x48] sm:$0xff] }
  0xa8   :  { %v291_v48 = vrot.slane %v287_v44, 5  ;;  %v331_v49 = vld [vmem:[%s5996_s0 + $0xc] sm:$0x1]  ;;  %v332_v50 = vld [vmem:[%s5996_s0 + $0x34] sm:$0x1]  ;;  %v251_v51 = vsel %vm72_vm0, %v250_v42, %v246_v37  ;;  %v2381_v30 = vld [vmem:[#allocation10 + $0x50] sm:$0xff] }
  0xa9   :  { %245 = vst [vmem:[#allocation5 + $0x20] sm:$0xc0] %v243_v46  ;;  %v335_v52 = vrot.slane %v331_v49, 4  ;;  %v336_v53 = vrot.slane %v332_v50, 3  ;;  %v376_v54 = vld [vmem:[%s5996_s0 + $0xe] sm:$0x1] }
  0xaa   :  { %v377_v55 = vld [vmem:[%s5996_s0 + $0x36] sm:$0x1]  ;;  %253 = vst [vmem:[#allocation5 + $0x28] sm:$0x3] %v251_v51  ;;  %v292_v56 = vsel %vm114_vm1, %v291_v48, %v290_v47  ;;  %v380_v57 = vrot.slane %v376_v54, 2  ;;  %v2382_v13 = vld [vmem:[#allocation10 + $0x58] sm:$0xff]  ;;  %4266 = vmatpush1.bf16.msra.mxu1 %v4265_v7 }
  0xab   :  { %v381_v58 = vrot.slane %v377_v55, 1  ;;  %v278_v59 = vld [vmem:[%s5996_s0 + $0xc] sm:$0x1]  ;;  %v279_v60 = vld [vmem:[%s5996_s0 + $0x34] sm:$0x1]  ;;  %v337_v61 = vsel %vm160_vm2, %v336_v53, %v335_v52  ;;  %v4267_v19 = vpack.c.bf16 %v2382_v13, %v2380_v8  ;;  %v2384_v51 = vld [vmem:[#allocation10 + $0x68] sm:$0xff] }
  0xac   :  { %294 = vst [vmem:[#allocation5 + $0x28] sm:$0xc] %v292_v56  ;;  %v282_v62 = vrot.slane %v279_v60, 7  ;;  %v322_v63 = vld [vmem:[%s5996_s0 + $0xe] sm:$0x1]  ;;  %v777_v2 = vld [vmem:[#allocation5 + $0x30] sm:$0xff] }
  0xad   :  { %v323_v0 = vld [vmem:[%s5996_s0 + $0x36] sm:$0x1]  ;;  %339 = vst [vmem:[#allocation5 + $0x28] sm:$0x30] %v337_v61  ;;  %v382_v3 = vsel %vm206_vm3, %v381_v58, %v380_v57  ;;  %v326_v4 = vrot.slane %v322_v63, 6  ;;  %1033 = vmatprep.mubr.f32.mxu1 %v777_v2  ;;  %4268 = vmatprep.subr.bf16.mxu1 %v4267_v19  ;;  %v2386_v7 = vld [vmem:[#allocation10 + $0x78] sm:$0xff] }
  0xae   :  { %v327_v5 = vrot.slane %v323_v0, 5  ;;  %v367_v6 = vld [vmem:[%s5996_s0 + $0x10] sm:$0x1]  ;;  %384 = vst [vmem:[#allocation5 + $0x28] sm:$0xc0] %v382_v3  ;;  %v283_v9 = vsel %vm72_vm0, %v282_v62, %v278_v59  ;;  %v4271_v13 = vpack.c.bf16 %v2386_v7, %v2384_v51  ;;  %v2385_v19 = vld [vmem:[#allocation10 + $0x70] sm:$0xff] }
  0xaf   :  { %v368_v10 = vld [vmem:[%s5996_s0 + $0x38] sm:$0x1]  ;;  %v371_v11 = vrot.slane %v367_v6, 4  ;;  %v412_v12 = vld [vmem:[%s5996_s0 + $0x12] sm:$0x1] }
  0xb0   :  { %285 = vst [vmem:[#allocation5 + $0x48] sm:$0x3] %v283_v9  ;;  %v328_v14 = vsel %vm114_vm1, %v327_v5, %v326_v4  ;;  %v372_v15 = vrot.slane %v368_v10, 3  ;;  %v413_v16 = vld [vmem:[%s5996_s0 + $0x3a] sm:$0x1]  ;;  %v416_v17 = vrot.slane %v412_v12, 2 }
  0xb1   :  { %v429_v18 = vld [vmem:[%s5996_s0 + $0x11] sm:$0x1]  ;;  %330 = vst [vmem:[#allocation5 + $0x48] sm:$0xc] %v328_v14  ;;  %v417_v20 = vrot.slane %v413_v16, 1  ;;  %v775_v24 = vld [vmem:[#allocation5 + $0x20] sm:$0xff] }
  0xb2   :  { %v430_v21 = vld [vmem:[%s5996_s0 + $0x39] sm:$0x1]  ;;  %v470_v22 = vld [vmem:[%s5996_s0 + $0x13] sm:$0x1]  ;;  %v373_v25 = vsel %vm160_vm2, %v372_v15, %v371_v11  ;;  %v471_v28 = vld [vmem:[%s5996_s0 + $0x3b] sm:$0x1]  ;;  %1206 = vmatmul.mubr.f32.vlgmr.msra.gmra.mrb[0].mxu0 %v775_v24 }
  0xb3   :  { %v2379_v23 = vld [vmem:[#allocation10 + $0x40] sm:$0xff]  ;;  %v433_v26 = vrot.slane %v430_v21, 7  ;;  %v474_v29 = vrot.slane %v470_v22, 6  ;;  %375 = vst [vmem:[#allocation5 + $0x48] sm:$0x30] %v373_v25  ;;  %v418_v31 = vsel %vm206_vm3, %v417_v20, %v416_v17  ;;  %v475_v32 = vrot.slane %v471_v28, 5  ;;  %1211 = vmatprep.mubr.f32.mxu0 %v5347_v27 }
  0xb4   :  { %v515_v33 = vld [vmem:[%s5996_s0 + $0x15] sm:$0x1]  ;;  %v516_v34 = vld [vmem:[%s5996_s0 + $0x3d] sm:$0x1]  ;;  %v4269_v35 = vpack.c.bf16 %v2381_v30, %v2379_v23  ;;  %420 = vst [vmem:[#allocation5 + $0x48] sm:$0xc0] %v418_v31 }
  0xb5   :  { %v434_v36 = vsel %vm72_vm0, %v433_v26, %v429_v18  ;;  %v519_v37 = vrot.slane %v515_v33, 4  ;;  %v520_v38 = vrot.slane %v516_v34, 3  ;;  %v560_v39 = vld [vmem:[%s5996_s0 + $0x17] sm:$0x1]  ;;  %v561_v40 = vld [vmem:[%s5996_s0 + $0x3f] sm:$0x1]  ;;  %v476_v41 = vsel %vm114_vm1, %v475_v32, %v474_v29 }
  0xb6   :  { %436 = vst [vmem:[#allocation5 + $0x58] sm:$0x3] %v434_v36  ;;  %v564_v42 = vrot.slane %v560_v39, 2  ;;  %v565_v43 = vrot.slane %v561_v40, 1  ;;  %v421_v44 = vld [vmem:[%s5996_s0 + $0x10] sm:$0x1]  ;;  %4270 = vmatpush1.bf16.msra.mxu1 %v4269_v35 }
  0xb7   :  { %v422_v45 = vld [vmem:[%s5996_s0 + $0x38] sm:$0x1]  ;;  %v776_v46 = vld [vmem:[#allocation5 + $0x28] sm:$0xff]  ;;  %478 = vst [vmem:[#allocation5 + $0x58] sm:$0xc] %v476_v41  ;;  %v521_v47 = vsel %vm160_vm2, %v520_v38, %v519_v37  ;;  %v2383_v14 = vld [vmem:[#allocation10 + $0x60] sm:$0xff]  ;;  %4272 = vmatprep.subr.bf16.mxu1 %v4271_v13 }
  0xb8   :  { %v425_v48 = vrot.slane %v422_v45, 7  ;;  %v461_v49 = vld [vmem:[%s5996_s0 + $0x12] sm:$0x1]  ;;  %v462_v50 = vld [vmem:[%s5996_s0 + $0x3a] sm:$0x1]  ;;  %1034 = vmatmul.mubr.f32.gmra.mrb[2].mxu1 %v776_v46  ;;  %v566_v52 = vsel %vm206_vm3, %v565_v43, %v564_v42  ;;  %v4273_v25 = vpack.c.bf16 %v2385_v19, %v2383_v14 }
  0xb9   :  { %523 = vst [vmem:[#allocation5 + $0x58] sm:$0x30] %v521_v47  ;;  %v465_v53 = vrot.slane %v461_v49, 6  ;;  %v466_v54 = vrot.slane %v462_v50, 5  ;;  %v506_v55 = vld [vmem:[%s5996_s0 + $0x14] sm:$0x1] }
  0xba   :  { %v507_v56 = vld [vmem:[%s5996_s0 + $0x3c] sm:$0x1]  ;;  %568 = vst [vmem:[#allocation5 + $0x58] sm:$0xc0] %v566_v52  ;;  %v426_v57 = vsel %vm72_vm0, %v425_v48, %v421_v44  ;;  %v510_v58 = vrot.slane %v506_v55, 4  ;;  %4274 = vmatpush1.bf16.msra.mxu1 %v4273_v25 }
  0xbb   :  { %v511_v59 = vrot.slane %v507_v56, 3  ;;  %v551_v60 = vld [vmem:[%s5996_s0 + $0x16] sm:$0x1]  ;;  %v552_v61 = vld [vmem:[%s5996_s0 + $0x3e] sm:$0x1]  ;;  %v467_v62 = vsel %vm114_vm1, %v466_v54, %v465_v53  ;;  %v780_v8 = vld [vmem:[#allocation5 + $0x48] sm:$0xff] }
  0xbc   :  { %428 = vst [vmem:[#allocation5 + $0x50] sm:$0x3] %v426_v57  ;;  %v555_v63 = vrot.slane %v551_v60, 2  ;;  %v556_v0 = vrot.slane %v552_v61, 1  ;;  %v453_v1 = vld [vmem:[%s5996_s0 + $0x14] sm:$0x1]  ;;  %1212 = vmatmul.mubr.f32.gmra.mrb[2].mxu0 %v780_v8 }
  0xbd   :  { %v454_v2 = vld [vmem:[%s5996_s0 + $0x3c] sm:$0x1]  ;;  %469 = vst [vmem:[#allocation5 + $0x50] sm:$0xc] %v467_v62  ;;  %v512_v3 = vsel %vm160_vm2, %v511_v59, %v510_v58  ;;  %v497_v5 = vld [vmem:[%s5996_s0 + $0x16] sm:$0x1]  ;;  %1217 = vmatprep.mubr.f32.mxu0 %v5347_v27 }
  0xbe   :  { %v457_v4 = vrot.slane %v454_v2, 7  ;;  %v498_v6 = vld [vmem:[%s5996_s0 + $0x3e] sm:$0x1]  ;;  %514 = vst [vmem:[#allocation5 + $0x50] sm:$0x30] %v512_v3  ;;  %v557_v9 = vsel %vm206_vm3, %v556_v0, %v555_v63  ;;  %v501_v10 = vrot.slane %v497_v5, 6 }
  0xbf   :  { %v502_v11 = vrot.slane %v498_v6, 5  ;;  %v542_v12 = vld [vmem:[%s5996_s0 + $0x18] sm:$0x1]  ;;  %559 = vst [vmem:[#allocation5 + $0x50] sm:$0xc0] %v557_v9 }
  0xc0   :  { %v458_v15 = vsel %vm72_vm0, %v457_v4, %v453_v1  ;;  %v543_v16 = vld [vmem:[%s5996_s0 + $0x40] sm:$0x1]  ;;  %v546_v17 = vrot.slane %v542_v12, 4  ;;  %v587_v18 = vld [vmem:[%s5996_s0 + $0x1a] sm:$0x1] }
  0xc1   :  { %460 = vst [vmem:[#allocation5 + $0x70] sm:$0x3] %v458_v15  ;;  %v503_v20 = vsel %vm114_vm1, %v502_v11, %v501_v10  ;;  %v547_v21 = vrot.slane %v543_v16, 3  ;;  %v588_v22 = vld [vmem:[%s5996_s0 + $0x42] sm:$0x1]  ;;  %v591_v23 = vrot.slane %v587_v18, 2 }
  0xc2   :  { %v604_v24 = vld [vmem:[%s5996_s0 + $0x19] sm:$0x1]  ;;  %505 = vst [vmem:[#allocation5 + $0x70] sm:$0xc] %v503_v20  ;;  %v592_v26 = vrot.slane %v588_v22, 1 }
  0xc3   :  { %v605_v28 = vld [vmem:[%s5996_s0 + $0x41] sm:$0x1]  ;;  %v645_v29 = vld [vmem:[%s5996_s0 + $0x1b] sm:$0x1]  ;;  %v548_v31 = vsel %vm160_vm2, %v547_v21, %v546_v17  ;;  %v646_v33 = vld [vmem:[%s5996_s0 + $0x43] sm:$0x1] }
  0xc4   :  { %v782_v30 = vld [vmem:[#allocation5 + $0x58] sm:$0xff]  ;;  %v608_v32 = vrot.slane %v605_v28, 7  ;;  %v649_v34 = vrot.slane %v645_v29, 6  ;;  %550 = vst [vmem:[#allocation5 + $0x70] sm:$0x30] %v548_v31  ;;  %v593_v35 = vsel %vm206_vm3, %v592_v26, %v591_v23  ;;  %v650_v36 = vrot.slane %v646_v33, 5 }
  0xc5   :  { %1039 = vmatprep.mubr.f32.mxu1 %v782_v30  ;;  %v690_v37 = vld [vmem:[%s5996_s0 + $0x1d] sm:$0x1]  ;;  %v691_v38 = vld [vmem:[%s5996_s0 + $0x45] sm:$0x1]  ;;  %595 = vst [vmem:[#allocation5 + $0x70] sm:$0xc0] %v593_v35 }
  0xc6   :  { %v609_v39 = vsel %vm72_vm0, %v608_v32, %v604_v24  ;;  %v694_v40 = vrot.slane %v690_v37, 4  ;;  %v695_v41 = vrot.slane %v691_v38, 3  ;;  %v735_v42 = vld [vmem:[%s5996_s0 + $0x1f] sm:$0x1]  ;;  %v736_v43 = vld [vmem:[%s5996_s0 + $0x47] sm:$0x1]  ;;  %v651_v44 = vsel %vm114_vm1, %v650_v36, %v649_v34 }
  0xc7   :  { %611 = vst [vmem:[#allocation5 + $0x80] sm:$0x3] %v609_v39  ;;  %v739_v45 = vrot.slane %v735_v42, 2  ;;  %v740_v46 = vrot.slane %v736_v43, 1  ;;  %v596_v47 = vld [vmem:[%s5996_s0 + $0x18] sm:$0x1] }
  0xc8   :  { %v597_v48 = vld [vmem:[%s5996_s0 + $0x40] sm:$0x1]  ;;  %v781_v49 = vld [vmem:[#allocation5 + $0x50] sm:$0xff]  ;;  %653 = vst [vmem:[#allocation5 + $0x80] sm:$0xc] %v651_v44  ;;  %v696_v50 = vsel %vm160_vm2, %v695_v41, %v694_v40  ;;  %v2388_v28 = vld [vmem:[#allocation10 + $0x88] sm:$0xff] }
  0xc9   :  { %v600_v51 = vrot.slane %v597_v48, 7  ;;  %v636_v52 = vld [vmem:[%s5996_s0 + $0x1a] sm:$0x1]  ;;  %v637_v53 = vld [vmem:[%s5996_s0 + $0x42] sm:$0x1]  ;;  %1040 = vmatmul.mubr.f32.gmra.mrb[4].mxu1 %v781_v49  ;;  %v741_v54 = vsel %vm206_vm3, %v740_v46, %v739_v45  ;;  %v2390_v29 = vld [vmem:[#allocation10 + $0x98] sm:$0xff] }
  0xca   :  { %698 = vst [vmem:[#allocation5 + $0x80] sm:$0x30] %v696_v50  ;;  %v640_v55 = vrot.slane %v636_v52, 6  ;;  %v641_v56 = vrot.slane %v637_v53, 5  ;;  %v681_v57 = vld [vmem:[%s5996_s0 + $0x1c] sm:$0x1]  ;;  %v4275_v30 = vpack.c.bf16 %v2390_v29, %v2388_v28 }
  0xcb   :  { %v682_v58 = vld [vmem:[%s5996_s0 + $0x44] sm:$0x1]  ;;  %743 = vst [vmem:[#allocation5 + $0x80] sm:$0xc0] %v741_v54  ;;  %v601_v59 = vsel %vm72_vm0, %v600_v51, %v596_v47  ;;  %v685_v60 = vrot.slane %v681_v57, 4  ;;  %v2387_v31 = vld [vmem:[#allocation10 + $0x80] sm:$0xff] }
  0xcc   :  { %v686_v61 = vrot.slane %v682_v58, 3  ;;  %v726_v62 = vld [vmem:[%s5996_s0 + $0x1e] sm:$0x1]  ;;  %v727_v63 = vld [vmem:[%s5996_s0 + $0x46] sm:$0x1]  ;;  %v642_v0 = vsel %vm114_vm1, %v641_v56, %v640_v55  ;;  %v785_v9 = vld [vmem:[#allocation5 + $0x70] sm:$0xff]  ;;  %4276 = vmatprep.subr.bf16.mxu1 %v4275_v30 }
  0xcd   :  { %603 = vst [vmem:[#allocation5 + $0x78] sm:$0x3] %v601_v59  ;;  %v730_v1 = vrot.slane %v726_v62, 2  ;;  %v731_v2 = vrot.slane %v727_v63, 1  ;;  %v628_v3 = vld [vmem:[%s5996_s0 + $0x1c] sm:$0x1]  ;;  %1218 = vmatmul.mubr.f32.gmra.mrb[4].mxu0 %v785_v9 }
  0xce   :  { %v629_v4 = vld [vmem:[%s5996_s0 + $0x44] sm:$0x1]  ;;  %644 = vst [vmem:[#allocation5 + $0x78] sm:$0xc] %v642_v0  ;;  %v687_v5 = vsel %vm160_vm2, %v686_v61, %v685_v60  ;;  %v672_v7 = vld [vmem:[%s5996_s0 + $0x1e] sm:$0x1]  ;;  %1223 = vmatprep.mubr.f32.mxu0 %v5347_v27 }
  0xcf   :  { %v632_v6 = vrot.slane %v629_v4, 7  ;;  %v673_v8 = vld [vmem:[%s5996_s0 + $0x46] sm:$0x1]  ;;  %689 = vst [vmem:[#allocation5 + $0x78] sm:$0x30] %v687_v5  ;;  %v732_v10 = vsel %vm206_vm3, %v731_v2, %v730_v1  ;;  %v676_v11 = vrot.slane %v672_v7, 6 }
  0xd0   :  { %v677_v12 = vrot.slane %v673_v8, 5  ;;  %v717_v13 = vld [vmem:[%s5996_s0 + $0x20] sm:$0x1]  ;;  %734 = vst [vmem:[#allocation5 + $0x78] sm:$0xc0] %v732_v10  ;;  %v2392_v34 = vld [vmem:[#allocation10 + $0xa8] sm:$0xff] }
  0xd1   :  { %v633_v14 = vsel %vm72_vm0, %v632_v6, %v628_v3  ;;  %v718_v15 = vld [vmem:[%s5996_s0 + $0x48] sm:$0x1]  ;;  %v721_v16 = vrot.slane %v717_v13, 4  ;;  %v762_v17 = vld [vmem:[%s5996_s0 + $0x22] sm:$0x1]  ;;  %v2391_v36 = vld [vmem:[#allocation10 + $0xa0] sm:$0xff] }
  0xd2   :  { %635 = vst [vmem:[#allocation5 + $0x98] sm:$0x3] %v633_v14  ;;  %v678_v18 = vsel %vm114_vm1, %v677_v12, %v676_v11  ;;  %v722_v19 = vrot.slane %v718_v15, 3  ;;  %v763_v20 = vld [vmem:[%s5996_s0 + $0x4a] sm:$0x1]  ;;  %v766_v21 = vrot.slane %v762_v17, 2 }
  0xd3   :  { %680 = vst [vmem:[#allocation5 + $0x98] sm:$0xc] %v678_v18  ;;  %v767_v22 = vrot.slane %v763_v20, 1  ;;  %v787_v23 = vld [vmem:[#allocation5 + $0x80] sm:$0xff]  ;;  %v2394_v35 = vld [vmem:[#allocation10 + $0xb8] sm:$0xff]  ;;  %v2396_v40 = vld [vmem:[#allocation10 + $0xc8] sm:$0xff] }
  0xd4   :  { %v723_v24 = vsel %vm160_vm2, %v722_v19, %v721_v16  ;;  %1045 = vmatprep.mubr.f32.mxu1 %v787_v23  ;;  %v2389_v32 = vld [vmem:[#allocation10 + $0x90] sm:$0xff]  ;;  %v4279_v37 = vpack.c.bf16 %v2394_v35, %v2392_v34  ;;  %v2398_v41 = vld [vmem:[#allocation10 + $0xd8] sm:$0xff]  ;;  %v2395_v42 = vld [vmem:[#allocation10 + $0xc0] sm:$0xff]  ;;  %v4771_v12 = vmov 1966171168   ;;  %v953_v16 = vlaneseq }
  0xd5   :  { %725 = vst [vmem:[#allocation5 + $0x98] sm:$0x30] %v723_v24  ;;  %v768_v25 = vsel %vm206_vm3, %v767_v22, %v766_v21  ;;  %v4277_v33 = vpack.c.bf16 %v2389_v32, %v2387_v31  ;;  %v2393_v38 = vld [vmem:[#allocation10 + $0xb0] sm:$0xff]  ;;  %v4283_v43 = vpack.c.bf16 %v2398_v41, %v2396_v40  ;;  %v2400_v46 = vld [vmem:[#allocation10 + $0xe8] sm:$0xff]  ;;  %v2402_v47 = vld [vmem:[#allocation10 + $0xf8] sm:$0xff]  ;;  %v1254_v13 = vunpack.c.l.s4 %v4771_v12 }
  0xd6   :  { %770 = vst [vmem:[#allocation5 + $0x98] sm:$0xc0] %v768_v25  ;;  %v4281_v39 = vpack.c.bf16 %v2393_v38, %v2391_v36  ;;  %v2397_v44 = vld [vmem:[#allocation10 + $0xd0] sm:$0xff]  ;;  %v4287_v48 = vpack.c.bf16 %v2402_v47, %v2400_v46  ;;  %v2399_v49 = vld [vmem:[#allocation10 + $0xe0] sm:$0xff]  ;;  %v2404_v52 = vld [vmem:[#allocation10 + $0x108] sm:$0xff]  ;;  %v5589_v31 = vshrl.u32 %v953_v16, 7 }
  0xd7   :  { %v786_v27 = vld [vmem:[#allocation5 + $0x78] sm:$0xff]  ;;  %4278 = vmatpush1.bf16.msra.mxu1 %v4277_v33  ;;  %v4285_v45 = vpack.c.bf16 %v2397_v44, %v2395_v42  ;;  %v2401_v50 = vld [vmem:[#allocation10 + $0xf0] sm:$0xff]  ;;  %v2406_v53 = vld [vmem:[#allocation10 + $0x118] sm:$0xff]  ;;  %v1255_v24 = vunpack.c.0.s8 %v1254_v13  ;;  %vm5617_vm4 = vcmp.lt.s32.totalorder %v953_v16, 256 }
  0xd8   :  { %1046 = vmatmul.mubr.f32.gmra.mrb[6].mxu1 %v786_v27  ;;  %4280 = vmatprep.subr.bf16.mxu1 %v4279_v37  ;;  %v4289_v51 = vpack.c.bf16 %v2401_v50, %v2399_v49  ;;  %v4291_v54 = vpack.c.bf16 %v2406_v53, %v2404_v52  ;;  %v2403_v55 = vld [vmem:[#allocation10 + $0x100] sm:$0xff]  ;;  %v2405_v56 = vld [vmem:[#allocation10 + $0x110] sm:$0xff]  ;;  %v2408_v58 = vld [vmem:[#allocation10 + $0x128] sm:$0xff]  ;;  %v5596_v50 = vsub.s32 0, %v5589_v31  ;;  %v5602_v52 = vsub.s32 1, %v5589_v31 }
  0xd9   :  { %v4293_v57 = vpack.c.bf16 %v2405_v56, %v2403_v55  ;;  %v2410_v59 = vld [vmem:[#allocation10 + $0x138] sm:$0xff]  ;;  %v2407_v61 = vld [vmem:[#allocation10 + $0x120] sm:$0xff]  ;;  %v2409_v62 = vld [vmem:[#allocation10 + $0x130] sm:$0xff]  ;;  %v5592_v38 = vsub.s32 %v1255_v24, %v5589_v31 }
  0xda   :  { %v4295_v60 = vpack.c.bf16 %v2410_v59, %v2408_v58  ;;  %v4297_v63 = vpack.c.bf16 %v2409_v62, %v2407_v61  ;;  %v2412_v0 = vld [vmem:[#allocation10 + $0x148] sm:$0xff]  ;;  %v2414_v1 = vld [vmem:[#allocation10 + $0x158] sm:$0xff]  ;;  %v2411_v3 = vld [vmem:[#allocation10 + $0x140] sm:$0xff] }
  0xdb   :  { %4282 = vmatpush1.bf16.msra.mxu1 %v4281_v39  ;;  %v4299_v2 = vpack.c.bf16 %v2414_v1, %v2412_v0  ;;  %v2413_v4 = vld [vmem:[#allocation10 + $0x150] sm:$0xff]  ;;  %v2416_v6 = vld [vmem:[#allocation10 + $0x168] sm:$0xff]  ;;  %v2418_v7 = vld [vmem:[#allocation10 + $0x178] sm:$0xff] }
  0xdc   :  { %4284 = vmatprep.subr.bf16.mxu1 %v4283_v43  ;;  %v4301_v5 = vpack.c.bf16 %v2413_v4, %v2411_v3  ;;  %v4303_v8 = vpack.c.bf16 %v2418_v7, %v2416_v6  ;;  %v2415_v9 = vld [vmem:[#allocation10 + $0x160] sm:$0xff]  ;;  %v2417_v10 = vld [vmem:[#allocation10 + $0x170] sm:$0xff]  ;;  %v2420_v14 = vld [vmem:[#allocation10 + $0x188] sm:$0xff] }
  0xdd   :  { %v790_v26 = vld [vmem:[#allocation5 + $0x98] sm:$0xff]  ;;  %v4305_v11 = vpack.c.bf16 %v2417_v10, %v2415_v9  ;;  %v2422_v15 = vld [vmem:[#allocation10 + $0x198] sm:$0xff]  ;;  %v2419_v18 = vld [vmem:[#allocation10 + $0x180] sm:$0xff] }
  0xde   :  { %1224 = vmatmul.mubr.f32.gmra.mrb[6].mxu0 %v790_v26  ;;  %v4307_v17 = vpack.c.bf16 %v2422_v15, %v2420_v14  ;;  %v2421_v19 = vld [vmem:[#allocation10 + $0x190] sm:$0xff]  ;;  %v2424_v21 = vld [vmem:[#allocation10 + $0x1a8] sm:$0xff]  ;;  %v2426_v22 = vld [vmem:[#allocation10 + $0x1b8] sm:$0xff] }
  0xdf   :  { %4286 = vmatpush1.bf16.msra.mxu1 %v4285_v45  ;;  %v4309_v20 = vpack.c.bf16 %v2421_v19, %v2419_v18  ;;  %v2423_v23 = vld [vmem:[#allocation10 + $0x1a0] sm:$0xff]  ;;  %v4311_v25 = vpack.c.bf16 %v2426_v22, %v2424_v21  ;;  %v2425_v27 = vld [vmem:[#allocation10 + $0x1b0] sm:$0xff]  ;;  %v2428_v26 = vld [vmem:[#allocation10 + $0x1c8] sm:$0xff] }
  0xe0   :  { %4288 = vmatprep.subr.bf16.mxu1 %v4287_v48  ;;  %v2430_v28 = vld [vmem:[#allocation10 + $0x1d8] sm:$0xff]  ;;  %v4313_v29 = vpack.c.bf16 %v2425_v27, %v2423_v23  ;;  %v2427_v30 = vld [vmem:[#allocation10 + $0x1c0] sm:$0xff]  ;;  %v2429_v33 = vld [vmem:[#allocation10 + $0x1d0] sm:$0xff] }
  0xe1   :  { %v4315_v32 = vpack.c.bf16 %v2430_v28, %v2428_v26  ;;  %v2432_v34 = vld [vmem:[#allocation10 + $0x1e8] sm:$0xff]  ;;  %v2434_v35 = vld [vmem:[#allocation10 + $0x1f8] sm:$0xff]  ;;  %v4317_v40 = vpack.c.bf16 %v2429_v33, %v2427_v30  ;;  %v2431_v42 = vld [vmem:[#allocation10 + $0x1e0] sm:$0xff] }
  0xe2   :  { %v1590_v36 = vld [vmem:[#allocation2] ss:$8 sm:$0x3]  ;;  %v1592_v37 = vld [vmem:[#allocation2 + $0x30] ss:$8 sm:$0x3]  ;;  %v4319_v41 = vpack.c.bf16 %v2434_v35, %v2432_v34 }
  0xe3   :  { %4290 = vmatpush1.bf16.msra.mxu1 %v4289_v51  ;;  %v1595_v39 = vcombine.low %v1590_v36, %v1592_v37  ;;  %v2433_v43 = vld [vmem:[#allocation10 + $0x1f0] sm:$0xff]  ;;  %v2436_v45 = vld [vmem:[#allocation10 + $0x208] sm:$0xff]  ;;  %v2438_v46 = vld [vmem:[#allocation10 + $0x218] sm:$0xff] }
  0xe4   :  { %4292 = vmatprep.subr.bf16.mxu1 %v4291_v54  ;;  %v4321_v48 = vpack.c.bf16 %v2433_v43, %v2431_v42  ;;  %v4323_v49 = vpack.c.bf16 %v2438_v46, %v2436_v45  ;;  %v951_v51 = vld [vmem:[%s5998_s2] sm:$0x3] }
  0xe5   :  { %v1602_v44 = vrot.slane %v1595_v39, %v5592_v38  ;;  %v5605_v55 = vrot.slane %v951_v51, %v5596_v50  ;;  %v5608_v56 = vrot.slane %v951_v51, %v5602_v52 }
  0xe7   :  { %4294 = vmatpush1.bf16.msra.mxu1 %v4293_v57  ;;  %v1603_v47 = vcombine.high %v1602_v44, %v1602_v44  ;;  %4063 = vst.sshfl [vmem:[#allocation6] sm:$0x5 pattern:$0x73625140] %v1602_v44 }
  0xe8   :  { %4296 = vmatprep.subr.bf16.mxu1 %v4295_v60 }
  0xe9   :  { %4064 = vst.sshfl [vmem:[#allocation6 + $0x8] sm:$0x5 pattern:$0x73625140] %v1603_v47 }
  0xeb   :  { %4298 = vmatpush1.bf16.msra.mxu1 %v4297_v63 }
  0xec   :  { %4300 = vmatprep.subr.bf16.mxu1 %v4299_v2 }
  0xef   :  { %4302 = vmatpush1.bf16.msra.mxu1 %v4301_v5 }
  0xf0   :  { %4304 = vmatprep.subr.bf16.mxu1 %v4303_v8 }
  0xf3   :  { %4306 = vmatpush1.bf16.msra.mxu1 %v4305_v11 }
  0xf4   :  { %4308 = vmatprep.subr.bf16.mxu1 %v4307_v17 }
  0xf7   :  { %4310 = vmatpush1.bf16.msra.mxu1 %v4309_v20 }
  0xf8   :  { %4312 = vmatprep.subr.bf16.mxu1 %v4311_v25 }
  0xfb   :  { %4314 = vmatpush1.bf16.msra.mxu1 %v4313_v29 }
  0xfc   :  { %4316 = vmatprep.subr.bf16.mxu1 %v4315_v32 }
  0xff   :  { %4318 = vmatpush1.bf16.msra.mxu1 %v4317_v40 }
 0x100   :  { %4320 = vmatprep.subr.bf16.mxu1 %v4319_v41 }
 0x103   :  { %4322 = vmatpush1.bf16.msra.mxu1 %v4321_v48 }
 0x104   :  { %4324 = vmatprep.subr.bf16.mxu1 %v4323_v49 }
 0x178   :  { %v1029_v53 = vpop.f32.mrb[0].mxu1 }
 0x179   :  { %v1031_v54 = vpop.f32.mrb[1].mxu1  ;;  %v1030_v57 = vadd.f32 %v1029_v53, %v5605_v55 }
 0x17a   :  { %v1032_v58 = vadd.f32 %v1031_v54, %v5608_v56 }
 0x185   :  { %v1207_v59 = vpop.f32.mrb[0].mxu0 }
 0x186   :  { %v4644_v60 = vadd.f32 %v1207_v59, %v1030_v57  ;;  %v1209_v61 = vpop.f32.mrb[1].mxu0 }
 0x187   :  { %v4646_v62 = vadd.f32 %v1209_v61, %v1032_v58 }
 0x188   :  { %v1230_v63 = vmax.f32 %v4644_v60, 0.0 }
 0x189   :  { %v1231_v1 = vmax.f32 %v4646_v62, 0.0 }
 0x18b   :  { %v1035_v0 = vpop.f32.mrb[2].mxu1  ;;  %v1252_v3 = vcombine.low %v1230_v63, %v1231_v1  ;;  %v1297_v4 = vcombine.high %v1230_v63, %v1231_v1 }
 0x18c   :  { %v1037_v2 = vpop.f32.mrb[3].mxu1  ;;  %v1036_v5 = vadd.f32 %v1035_v0, %v5605_v55 }
 0x18d   :  { %v1038_v6 = vadd.f32 %v1037_v2, %v5608_v56  ;;  %v1259_v7 = vrot.slane %v1252_v3, %v5592_v38  ;;  %v1304_v8 = vrot.slane %v1297_v4, %v5592_v38 }
 0x18f   :  { %v1213_v10 = vpop.f32.mrb[2].mxu0  ;;  %v1260_v11 = vcombine.high %v1259_v7, %v1259_v7  ;;  %v1267_v12 = vrot.slane %v1259_v7, %v5592_v38  ;;  %v1305_v13 = vcombine.high %v1304_v8, %v1304_v8  ;;  %v1312_v14 = vrot.slane %v1304_v8, %v5592_v38 }
 0x190   :  { %v1215_v15 = vpop.f32.mrb[3].mxu0  ;;  %v4648_v17 = vadd.f32 %v1213_v10, %v1036_v5 }
 0x191   :  { %v4650_v18 = vadd.f32 %v1215_v15, %v1038_v6  ;;  %v1274_v19 = vrot.slane %v1260_v11, %v5592_v38  ;;  %1282 = vst.msk [vmem:[#allocation2 + $0x1] ss:$8 sm:$0x3] %vm5617_vm4, %v1267_v12  ;;  %v1287_v20 = vcombine.high %v1267_v12, %v1267_v12  ;;  %v1319_v16 = vrot.slane %v1305_v13, %v5592_v38 }
 0x192   :  { %1323 = vst.msk [vmem:[#allocation2 + $0x3] ss:$8 sm:$0x3] %vm5617_vm4, %v1312_v14  ;;  %v1328_v21 = vcombine.high %v1312_v14, %v1312_v14  ;;  %v1232_v22 = vmax.f32 %v4648_v17, 0.0 }
 0x193   :  { %v1233_v23 = vmax.f32 %v4650_v18, 0.0  ;;  %1285 = vst.msk [vmem:[#allocation2 + $0x31] ss:$8 sm:$0x3] %vm5617_vm4, %v1274_v19  ;;  %v1288_v24 = vcombine.high %v1274_v19, %v1274_v19  ;;  %v1329_v25 = vcombine.high %v1319_v16, %v1319_v16 }
 0x194   :  { %1292 = vst.msk [vmem:[#allocation2 + $0x2] ss:$8 sm:$0x3] %vm5617_vm4, %v1287_v20  ;;  %1326 = vst.msk [vmem:[#allocation2 + $0x33] ss:$8 sm:$0x3] %vm5617_vm4, %v1319_v16 }
 0x195   :  { %1333 = vst.msk [vmem:[#allocation2 + $0x4] ss:$8 sm:$0x3] %vm5617_vm4, %v1328_v21  ;;  %v1340_v27 = vcombine.low %v1232_v22, %v1233_v23  ;;  %v1381_v26 = vcombine.high %v1232_v22, %v1233_v23  ;;  %1295 = vst.msk [vmem:[#allocation2 + $0x32] ss:$8 sm:$0x3] %vm5617_vm4, %v1288_v24 }
 0x196   :  { %1336 = vst.msk [vmem:[#allocation2 + $0x34] ss:$8 sm:$0x3] %vm5617_vm4, %v1329_v25 }
 0x197   :  { %v1347_v28 = vrot.slane %v1340_v27, %v5592_v38  ;;  %v1388_v29 = vrot.slane %v1381_v26, %v5592_v38 }
 0x198   :  { %v1622_v45 = vld [vmem:[#allocation2 + $0x1] ss:$8 sm:$0x3] }
 0x199   :  { %v1348_v34 = vcombine.high %v1347_v28, %v1347_v28  ;;  %v1355_v35 = vrot.slane %v1347_v28, %v5592_v38  ;;  %v1389_v36 = vcombine.high %v1388_v29, %v1388_v29  ;;  %v1396_v37 = vrot.slane %v1388_v29, %v5592_v38  ;;  %v1715_v49 = vld [vmem:[#allocation2 + $0x3] ss:$8 sm:$0x3] }
 0x19a   :  { %v1623_v48 = vld [vmem:[#allocation2 + $0x31] ss:$8 sm:$0x3] }
 0x19b   :  { %v1362_v40 = vrot.slane %v1348_v34, %v5592_v38  ;;  %1366 = vst.msk [vmem:[#allocation2 + $0x5] ss:$8 sm:$0x3] %vm5617_vm4, %v1355_v35  ;;  %v1371_v41 = vcombine.high %v1355_v35, %v1355_v35  ;;  %v1403_v42 = vrot.slane %v1389_v36, %v5592_v38  ;;  %1407 = vst.msk [vmem:[#allocation2 + $0x7] ss:$8 sm:$0x3] %vm5617_vm4, %v1396_v37 }
 0x19c   :  { %v1041_v30 = vpop.f32.mrb[4].mxu1  ;;  %v1412_v43 = vcombine.high %v1396_v37, %v1396_v37  ;;  %v1684_v44 = vld [vmem:[#allocation2 + $0x2] ss:$8 sm:$0x3]  ;;  %v1626_v59 = vcombine.low %v1622_v45, %v1623_v48 }
 0x19d   :  { %v1042_v32 = vadd.f32 %v1041_v30, %v5605_v55  ;;  %v1043_v33 = vpop.f32.mrb[5].mxu1  ;;  %v1777_v47 = vld [vmem:[#allocation2 + $0x4] ss:$8 sm:$0x3]  ;;  %v1372_v51 = vcombine.high %v1362_v40, %v1362_v40  ;;  %v1413_v53 = vcombine.high %v1403_v42, %v1403_v42 }
 0x19e   :  { %v1044_v39 = vadd.f32 %v1043_v33, %v5608_v56  ;;  %1369 = vst.msk [vmem:[#allocation2 + $0x35] ss:$8 sm:$0x3] %vm5617_vm4, %v1362_v40  ;;  %1376 = vst.msk [vmem:[#allocation2 + $0x6] ss:$8 sm:$0x3] %vm5617_vm4, %v1371_v41  ;;  %v1633_v2 = vrot.slane %v1626_v59, %v5592_v38 }
 0x19f   :  { %1410 = vst.msk [vmem:[#allocation2 + $0x37] ss:$8 sm:$0x3] %vm5617_vm4, %v1403_v42  ;;  %1417 = vst.msk [vmem:[#allocation2 + $0x10] ss:$8 sm:$0x3] %vm5617_vm4, %v1412_v43 }
 0x1a0   :  { %v1219_v46 = vpop.f32.mrb[4].mxu0  ;;  %v1685_v58 = vld [vmem:[#allocation2 + $0x32] ss:$8 sm:$0x3]  ;;  %v1634_v10 = vcombine.high %v1633_v2, %v1633_v2 }
 0x1a1   :  { %v4652_v54 = vadd.f32 %v1219_v46, %v1042_v32  ;;  %v1221_v57 = vpop.f32.mrb[5].mxu0  ;;  %v1688_v61 = vcombine.low %v1684_v44, %v1685_v58  ;;  %v1778_v62 = vld [vmem:[#allocation2 + $0x34] ss:$8 sm:$0x3] }
 0x1a2   :  { %v4654_v60 = vadd.f32 %v1221_v57, %v1044_v39  ;;  %v1716_v63 = vld [vmem:[#allocation2 + $0x33] ss:$8 sm:$0x3]  ;;  %1379 = vst.msk [vmem:[#allocation2 + $0x36] ss:$8 sm:$0x3] %vm5617_vm4, %v1372_v51  ;;  %v1781_v1 = vcombine.low %v1777_v47, %v1778_v62 }
 0x1a3   :  { %1420 = vst.msk [vmem:[#allocation2 + $0x40] ss:$8 sm:$0x3] %vm5617_vm4, %v1413_v53  ;;  %v1234_v0 = vmax.f32 %v4652_v54, 0.0  ;;  %v1719_v3 = vcombine.low %v1715_v49, %v1716_v63  ;;  %v1695_v6 = vrot.slane %v1688_v61, %v5592_v38 }
 0x1a4   :  { %v1653_v4 = vld [vmem:[#allocation2 + $0x2] ss:$8 sm:$0x3]  ;;  %v1235_v5 = vmax.f32 %v4654_v60, 0.0  ;;  %v1788_v8 = vrot.slane %v1781_v1, %v5592_v38 }
 0x1a5   :  { %v1654_v7 = vld [vmem:[#allocation2 + $0x32] ss:$8 sm:$0x3]  ;;  %v1726_v11 = vrot.slane %v1719_v3, %v5592_v38  ;;  %v1746_v13 = vld [vmem:[#allocation2 + $0x4] ss:$8 sm:$0x3]  ;;  %v1696_v18 = vcombine.low %v1695_v6, %v1695_v6 }
 0x1a6   :  { %4065 = vst.sshfl [vmem:[#allocation6 + $0x10] sm:$0x5 pattern:$0x73625140] %v1633_v2  ;;  %v1657_v12 = vcombine.low %v1653_v4, %v1654_v7  ;;  %v1424_v15 = vcombine.low %v1234_v0, %v1235_v5  ;;  %v1465_v17 = vcombine.high %v1234_v0, %v1235_v5  ;;  %v1789_v20 = vcombine.high %v1788_v8, %v1788_v8 }
 0x1a7   :  { %v1747_v14 = vld [vmem:[#allocation2 + $0x34] ss:$8 sm:$0x3]  ;;  %v1796_v16 = vrot.slane %v1788_v8, %v5592_v38  ;;  %v1727_v21 = vcombine.low %v1726_v11, %v1726_v11  ;;  %v1876_v27 = vld [vmem:[#allocation2 + $0x6] ss:$8 sm:$0x3] }
 0x1a8   :  { %4070 = vst.sshfl [vmem:[#allocation6 + $0x8] sm:$0x50 pattern:$0x73625140] %v1695_v6  ;;  %v1750_v19 = vcombine.low %v1746_v13, %v1747_v14  ;;  %v1664_v22 = vrot.slane %v1657_v12, %v5592_v38  ;;  %v1431_v23 = vrot.slane %v1424_v15, %v5592_v38  ;;  %v1472_v24 = vrot.slane %v1465_v17, %v5592_v38 }
 0x1a9   :  { %4066 = vst.sshfl [vmem:[#allocation6 + $0x18] sm:$0x5 pattern:$0x73625140] %v1634_v10  ;;  %v1803_v30 = vrot.slane %v1789_v20, %v5592_v38  ;;  %v1804_v32 = vcombine.low %v1796_v16, %v1796_v16  ;;  %v5703_v20 = vld [vmem:[#allocation10 + $0x200] sm:$0xff]  ;;  %v5705_v16 = vld [vmem:[#allocation10 + $0x210] sm:$0xff] }
 0x1aa   :  { %4072 = vst.sshfl [vmem:[#allocation6 + $0x18] sm:$0x50 pattern:$0x73625140] %v1726_v11  ;;  %v1757_v26 = vrot.slane %v1750_v19, %v5592_v38  ;;  %v1665_v34 = vcombine.high %v1664_v22, %v1664_v22  ;;  %v1432_v35 = vcombine.high %v1431_v23, %v1431_v23  ;;  %v1439_v36 = vrot.slane %v1431_v23, %v5592_v38 }
 0x1ab   :  { %v1047_v25 = vpop.f32.mrb[6].mxu1  ;;  %4069 = vst.sshfl [vmem:[#allocation6] sm:$0x50 pattern:$0x73625140] %v1696_v18  ;;  %v1473_v37 = vcombine.high %v1472_v24, %v1472_v24  ;;  %v1480_v39 = vrot.slane %v1472_v24, %v5592_v38 }
 0x1ac   :  { %v1048_v28 = vadd.f32 %v1047_v25, %v5605_v55  ;;  %v1049_v29 = vpop.f32.mrb[7].mxu1  ;;  %v1975_v33 = vld [vmem:[#allocation2 + $0x10] ss:$8 sm:$0x3]  ;;  %v1805_v55 = vcombine.low %v1803_v30, %v1803_v30  ;;  %1808 = vst [vmem:[#allocation6] sm:$0x30] %v1804_v32  ;;  %v1446_v47 = vrot.slane %v1432_v35, %v5592_v38  ;;  %v1455_v48 = vcombine.high %v1439_v36, %v1439_v36 }
 0x1ad   :  { %4071 = vst.sshfl [vmem:[#allocation6 + $0x10] sm:$0x50 pattern:$0x73625140] %v1727_v21  ;;  %v1050_v42 = vadd.f32 %v1049_v29, %v5608_v56  ;;  %v1487_v49 = vrot.slane %v1473_v37, %v5592_v38  ;;  %v1496_v51 = vcombine.high %v1480_v39, %v1480_v39  ;;  %v1758_v2 = vcombine.low %v1757_v26, %v1757_v26 }
 0x1ae   :  { %4067 = vst.sshfl [vmem:[#allocation6 + $0x20] sm:$0x5 pattern:$0x73625140] %v1664_v22  ;;  %1809 = vst [vmem:[#allocation6 + $0x8] sm:$0x30] %v1805_v55  ;;  %v1456_v62 = vcombine.high %v1446_v47, %v1446_v47 }
 0x1af   :  { %v1877_v40 = vld [vmem:[#allocation2 + $0x36] ss:$8 sm:$0x3]  ;;  %v1976_v41 = vld [vmem:[#allocation2 + $0x40] ss:$8 sm:$0x3]  ;;  %v1497_v63 = vcombine.high %v1487_v49, %v1487_v49 }
 0x1b0   :  { %4074 = vst.sshfl [vmem:[#allocation6 + $0x28] sm:$0x50 pattern:$0x73625140] %v1757_v26  ;;  %v1880_v43 = vcombine.low %v1876_v27, %v1877_v40  ;;  %v1979_v44 = vcombine.low %v1975_v33, %v1976_v41 }
 0x1b1   :  { %v1811_v45 = vld [vmem:[#allocation2 + $0x35] ss:$8 sm:$0x3]  ;;  %v1910_v46 = vld [vmem:[#allocation2 + $0x37] ss:$8 sm:$0x3] }
 0x1b2   :  { %4068 = vst.sshfl [vmem:[#allocation6 + $0x28] sm:$0x5 pattern:$0x73625140] %v1665_v34  ;;  %v1225_v54 = vpop.f32.mrb[6].mxu0  ;;  %v1887_v57 = vrot.slane %v1880_v43, %v5592_v38  ;;  %v1986_v58 = vrot.slane %v1979_v44, %v5592_v38 }
 0x1b3   :  { %1450 = vst.msk [vmem:[#allocation2 + $0x11] ss:$8 sm:$0x3] %vm5617_vm4, %v1439_v36  ;;  %1491 = vst.msk [vmem:[#allocation2 + $0x13] ss:$8 sm:$0x3] %vm5617_vm4, %v1480_v39  ;;  %v4656_v0 = vadd.f32 %v1225_v54, %v1048_v28  ;;  %v4325_v36 = vpack.c.bf16 %v5705_v16, %v5703_v20 }
 0x1b4   :  { %v1810_v56 = vld [vmem:[#allocation2 + $0x5] ss:$8 sm:$0x3]  ;;  %v1909_v53 = vld [vmem:[#allocation2 + $0x7] ss:$8 sm:$0x3]  ;;  %v1888_v5 = vcombine.low %v1887_v57, %v1887_v57  ;;  %v1902_v6 = vrot.slane %v1887_v57, %v5592_v38  ;;  %v1987_v7 = vcombine.high %v1986_v58, %v1986_v58 }
 0x1b5   :  { %v1814_v59 = vcombine.low %v1810_v56, %v1811_v45  ;;  %v1913_v60 = vcombine.low %v1909_v53, %v1910_v46  ;;  %v1844_v61 = vld [vmem:[#allocation2 + $0x36] ss:$8 sm:$0x3]  ;;  %1453 = vst.msk [vmem:[#allocation2 + $0x41] ss:$8 sm:$0x3] %vm5617_vm4, %v1446_v47 }
 0x1b6   :  { %1460 = vst.msk [vmem:[#allocation2 + $0x12] ss:$8 sm:$0x3] %vm5617_vm4, %v1455_v48  ;;  %1494 = vst.msk [vmem:[#allocation2 + $0x43] ss:$8 sm:$0x3] %vm5617_vm4, %v1487_v49  ;;  %v1904_v17 = vcombine.low %v1902_v6, %v1902_v6  ;;  %v1895_v18 = vrot.slane %v1888_v5, %v5592_v38 }
 0x1b7   :  { %1501 = vst.msk [vmem:[#allocation2 + $0x14] ss:$8 sm:$0x3] %vm5617_vm4, %v1496_v51  ;;  %v1227_v1 = vpop.f32.mrb[7].mxu0  ;;  %v1236_v10 = vmax.f32 %v4656_v0, 0.0  ;;  %v1821_v11 = vrot.slane %v1814_v59, %v5592_v38  ;;  %v1920_v12 = vrot.slane %v1913_v60, %v5592_v38  ;;  %v2440_v54 = vld [vmem:[#allocation10 + $0x228] sm:$0xff] }
 0x1b8   :  { %v1943_v3 = vld [vmem:[#allocation2 + $0x40] ss:$8 sm:$0x3]  ;;  %v4658_v4 = vadd.f32 %v1227_v1, %v1050_v42  ;;  %v1843_v8 = vld [vmem:[#allocation2 + $0x6] ss:$8 sm:$0x3]  ;;  %v1903_v26 = vcombine.low %v1895_v18, %v1895_v18 }
 0x1b9   :  { %4075 = vst.sshfl [vmem:[#allocation6 + $0x30] sm:$0x5 pattern:$0x73625140] %v1986_v58  ;;  %v1847_v13 = vcombine.low %v1843_v8, %v1844_v61  ;;  %v1822_v21 = vcombine.high %v1821_v11, %v1821_v11  ;;  %v1921_v22 = vcombine.low %v1920_v12, %v1920_v12  ;;  %v1935_v23 = vrot.slane %v1920_v12, %v5592_v38  ;;  %v2442_v57 = vld [vmem:[#allocation10 + $0x238] sm:$0xff]  ;;  %v2441_v12 = vld [vmem:[#allocation10 + $0x230] sm:$0xff] }
 0x1ba   :  { %1463 = vst.msk [vmem:[#allocation2 + $0x42] ss:$8 sm:$0x3] %vm5617_vm4, %v1456_v62  ;;  %1504 = vst.msk [vmem:[#allocation2 + $0x44] ss:$8 sm:$0x3] %vm5617_vm4, %v1497_v63  ;;  %v1829_v24 = vrot.slane %v1821_v11, %v5592_v38 }
 0x1bb   :  { %v1942_v14 = vld [vmem:[#allocation2 + $0x10] ss:$8 sm:$0x3]  ;;  %v1237_v15 = vmax.f32 %v4658_v4, 0.0  ;;  %1908 = vst [vmem:[#allocation6 + $0x8] sm:$0xc0] %v1904_v17  ;;  %v5710_v28 = vrot.slane %v1847_v13, %v5592_v38  ;;  %v1836_v29 = vrot.slane %v1822_v21, %v5592_v38  ;;  %v1937_v30 = vcombine.low %v1935_v23, %v1935_v23 }
 0x1bc   :  { %4073 = vst.sshfl [vmem:[#allocation6 + $0x20] sm:$0x50 pattern:$0x73625140] %v1758_v2  ;;  %v1946_v19 = vcombine.low %v1942_v14, %v1943_v3  ;;  %v1837_v32 = vcombine.low %v1829_v24, %v1829_v24  ;;  %v1928_v33 = vrot.slane %v1921_v22, %v5592_v38  ;;  %1907 = vst [vmem:[#allocation6] sm:$0xc0] %v1903_v26 }
 0x1bd   :  { %4076 = vst.sshfl [vmem:[#allocation6 + $0x38] sm:$0x5 pattern:$0x73625140] %v1987_v7  ;;  %v1508_v25 = vcombine.low %v1236_v10, %v1237_v15  ;;  %v1549_v27 = vcombine.high %v1236_v10, %v1237_v15  ;;  %v1838_v42 = vcombine.low %v1836_v29, %v1836_v29  ;;  %1941 = vst [vmem:[#allocation6 + $0x18] sm:$0xc0] %v1937_v30 }
 0x1be   :  { %v2068_v37 = vld [vmem:[#allocation2 + $0x12] ss:$8 sm:$0x3]  ;;  %v2161_v39 = vld [vmem:[#allocation2 + $0x14] ss:$8 sm:$0x3]  ;;  %v1936_v55 = vcombine.low %v1928_v33, %v1928_v33  ;;  %v1855_v45 = vcombine.high %v5710_v28, %v5710_v28  ;;  %v5721_v46 = vrot.slane %v1946_v19, %v5592_v38  ;;  %v4327_v10 = vpack.c.bf16 %v2442_v57, %v2440_v54 }
 0x1bf   :  { %v1515_v34 = vrot.slane %v1508_v25, %v5592_v38  ;;  %v1556_v35 = vrot.slane %v1549_v27, %v5592_v38  ;;  %v2006_v40 = vld [vmem:[#allocation2 + $0x11] ss:$8 sm:$0x3]  ;;  %v2099_v41 = vld [vmem:[#allocation2 + $0x13] ss:$8 sm:$0x3] }
 0x1c0   :  { %1841 = vst [vmem:[#allocation6 + $0x10] sm:$0x30] %v1837_v32  ;;  %v2007_v43 = vld [vmem:[#allocation2 + $0x41] ss:$8 sm:$0x3]  ;;  %v2439_v11 = vld [vmem:[#allocation10 + $0x220] sm:$0xff]  ;;  %v1869_v13 = vrot.slane %v1855_v45, %v5592_v38  ;;  %v1954_v30 = vcombine.low %v5721_v46, %v5721_v46  ;;  %v1968_v32 = vrot.slane %v5721_v46, %v5592_v38 }
 0x1c1   :  { %v2100_v44 = vld [vmem:[#allocation2 + $0x43] ss:$8 sm:$0x3]  ;;  %v1516_v47 = vcombine.high %v1515_v34, %v1515_v34  ;;  %v1523_v48 = vrot.slane %v1515_v34, %v5592_v38  ;;  %v1557_v49 = vcombine.high %v1556_v35, %v1556_v35  ;;  %v1564_v51 = vrot.slane %v1556_v35, %v5592_v38  ;;  %v2069_v56 = vld [vmem:[#allocation2 + $0x42] ss:$8 sm:$0x3] }
 0x1c2   :  { %v2162_v53 = vld [vmem:[#allocation2 + $0x44] ss:$8 sm:$0x3]  ;;  %v2072_v58 = vcombine.low %v2068_v37, %v2069_v56  ;;  %1842 = vst [vmem:[#allocation6 + $0x18] sm:$0x30] %v1838_v42  ;;  %v2010_v60 = vcombine.low %v2006_v40, %v2007_v43  ;;  %v2103_v61 = vcombine.low %v2099_v41, %v2100_v44  ;;  %v2444_v17 = vld [vmem:[#allocation10 + $0x248] sm:$0xff]  ;;  %v1871_v29 = vcombine.low %v1869_v13, %v1869_v13 }
 0x1c3   :  { %v2165_v59 = vcombine.low %v2161_v39, %v2162_v53  ;;  %1940 = vst [vmem:[#allocation6 + $0x10] sm:$0xc0] %v1936_v55  ;;  %v1530_v62 = vrot.slane %v1516_v47, %v5592_v38  ;;  %1534 = vst.msk [vmem:[#allocation2 + $0x15] ss:$8 sm:$0x3] %vm5617_vm4, %v1523_v48  ;;  %v1539_v63 = vcombine.high %v1523_v48, %v1523_v48  ;;  %v2360_v2 = vld [vmem:[#allocation6 + $0x8] sm:$0xff] }
 0x1c4   :  { %v1571_v0 = vrot.slane %v1557_v49, %v5592_v38  ;;  %1575 = vst.msk [vmem:[#allocation2 + $0x17] ss:$8 sm:$0x3] %vm5617_vm4, %v1564_v51  ;;  %v1580_v1 = vcombine.high %v1564_v51, %v1564_v51  ;;  %v2079_v3 = vrot.slane %v2072_v58, %v5592_v38  ;;  %v2017_v5 = vrot.slane %v2010_v60, %v5592_v38  ;;  %v2359_v14 = vld [vmem:[#allocation6] sm:$0xff]  ;;  %v2446_v18 = vld [vmem:[#allocation10 + $0x258] sm:$0xff]  ;;  %v5749_v23 = vld [vmem:[#allocation10 + $0x240] sm:$0xff] }
 0x1c5   :  { %v2172_v4 = vrot.slane %v2165_v59, %v5592_v38  ;;  %v2110_v6 = vrot.slane %v2103_v61, %v5592_v38  ;;  %1537 = vst.msk [vmem:[#allocation2 + $0x45] ss:$8 sm:$0x3] %vm5617_vm4, %v1530_v62  ;;  %v1540_v7 = vcombine.high %v1530_v62, %v1530_v62  ;;  %1544 = vst.msk [vmem:[#allocation2 + $0x16] ss:$8 sm:$0x3] %vm5617_vm4, %v1539_v63  ;;  %2639 = vmatprep.mubr.f32.mxu1 %v2360_v2 }
 0x1c6   :  { %1578 = vst.msk [vmem:[#allocation2 + $0x47] ss:$8 sm:$0x3] %vm5617_vm4, %v1571_v0  ;;  %v1581_v8 = vcombine.high %v1571_v0, %v1571_v0  ;;  %1585 = vst.msk [vmem:[#allocation2 + $0x20] ss:$8 sm:$0x3] %vm5617_vm4, %v1580_v1  ;;  %v2080_v19 = vcombine.low %v2079_v3, %v2079_v3  ;;  %v2018_v22 = vcombine.high %v2017_v5, %v2017_v5  ;;  %2640 = vmatmul.mubr.f32.vlgmr.msra.gmra.mrb[8].mxu1 %v2359_v14 }
 0x1c7   :  { %4082 = vst.sshfl [vmem:[#allocation6 + $0x38] sm:$0x50 pattern:$0x73625140] %v2079_v3  ;;  %v2173_v15 = vcombine.high %v2172_v4, %v2172_v4  ;;  %v2180_v21 = vrot.slane %v2172_v4, %v5592_v38  ;;  %v5751_v24 = vld [vmem:[#allocation10 + $0x250] sm:$0xff]  ;;  %v5753_v25 = vld [vmem:[#allocation10 + $0x268] sm:$0xff]  ;;  %v2111_v26 = vcombine.low %v2110_v6, %v2110_v6  ;;  %4326 = vmatpush1.bf16.msra.mxu1 %v4325_v36 }
 0x1c8   :  { %4084 = vst.sshfl [vmem:[#allocation6 + $0x48] sm:$0x50 pattern:$0x73625140] %v2110_v6  ;;  %v5755_v27 = vld [vmem:[#allocation10 + $0x278] sm:$0xff]  ;;  %v4329_v33 = vpack.c.bf16 %v2441_v12, %v2439_v11  ;;  %4328 = vmatprep.subr.bf16.mxu1 %v4327_v10  ;;  %v4331_v40 = vpack.c.bf16 %v2446_v18, %v2444_v17  ;;  %v5765_v41 = vld [vmem:[#allocation10 + $0x260] sm:$0xff]  ;;  %v1970_v36 = vcombine.low %v1968_v32, %v1968_v32 }
 0x1c9   :  { %4077 = vst.sshfl [vmem:[#allocation6 + $0x40] sm:$0x5 pattern:$0x73625140] %v2017_v5  ;;  %v2187_v34 = vrot.slane %v2173_v15, %v5592_v38  ;;  %v2188_v35 = vcombine.low %v2180_v21, %v2180_v21  ;;  %v5767_v42 = vld [vmem:[#allocation10 + $0x270] sm:$0xff]  ;;  %v5769_v55 = vld [vmem:[#allocation10 + $0x288] sm:$0xff]  ;;  %v1862_v47 = vrot.slane %v5710_v28, %v5592_v38  ;;  %v1961_v53 = vrot.slane %v1954_v30, %v5592_v38 }
 0x1ca   :  { %1547 = vst.msk [vmem:[#allocation2 + $0x46] ss:$8 sm:$0x3] %vm5617_vm4, %v1540_v7  ;;  %1588 = vst.msk [vmem:[#allocation2 + $0x50] ss:$8 sm:$0x3] %vm5617_vm4, %v1581_v8  ;;  %v4333_v61 = vpack.c.bf16 %v5751_v24, %v5749_v23  ;;  %v4335_v28 = vpack.c.bf16 %v5755_v27, %v5753_v25  ;;  %v4337_v10 = vpack.c.bf16 %v5767_v42, %v5765_v41 }
 0x1cb   :  { %4081 = vst.sshfl [vmem:[#allocation6 + $0x30] sm:$0x50 pattern:$0x73625140] %v2080_v19  ;;  %v5771_v43 = vld [vmem:[#allocation10 + $0x298] sm:$0xff]  ;;  %v5773_v20 = vld [vmem:[#allocation10 + $0x280] sm:$0xff]  ;;  %v2189_v45 = vcombine.low %v2187_v34, %v2187_v34  ;;  %4330 = vmatpush1.bf16.msra.mxu1 %v4329_v33  ;;  %v1870_v63 = vcombine.low %v1862_v47, %v1862_v47  ;;  %v1969_v3 = vcombine.low %v1961_v53, %v1961_v53 }
 0x1cc   :  { %4078 = vst.sshfl [vmem:[#allocation6 + $0x48] sm:$0x5 pattern:$0x73625140] %v2018_v22  ;;  %v5775_v16 = vld [vmem:[#allocation10 + $0x290] sm:$0xff]  ;;  %v5779_v49 = vld [vmem:[#allocation10 + $0x2a8] sm:$0xff]  ;;  %4332 = vmatprep.subr.bf16.mxu1 %v4331_v40  ;;  %v4339_v11 = vpack.c.bf16 %v5771_v43, %v5769_v55 }
 0x1cd   :  { %v2038_v37 = vld [vmem:[#allocation2 + $0x42] ss:$8 sm:$0x3]  ;;  %v2131_v39 = vld [vmem:[#allocation2 + $0x44] ss:$8 sm:$0x3]  ;;  %v4341_v12 = vpack.c.bf16 %v5775_v16, %v5773_v20 }
 0x1ce   :  { %4083 = vst.sshfl [vmem:[#allocation6 + $0x40] sm:$0x50 pattern:$0x73625140] %v2111_v26  ;;  %1875 = vst [vmem:[#allocation6 + $0x28] sm:$0x30] %v1871_v29 }
 0x1cf   :  { %v2037_v44 = vld [vmem:[#allocation2 + $0x12] ss:$8 sm:$0x3]  ;;  %2192 = vst [vmem:[#allocation6 + $0x30] sm:$0x30] %v2188_v35  ;;  %v5781_v51 = vld [vmem:[#allocation10 + $0x2b8] sm:$0xff]  ;;  %4334 = vmatpush1.bf16.msra.mxu1 %v4333_v61 }
 0x1d0   :  { %v2194_v46 = vld [vmem:[#allocation2 + $0x15] ss:$8 sm:$0x3]  ;;  %v2130_v48 = vld [vmem:[#allocation2 + $0x14] ss:$8 sm:$0x3]  ;;  %v2041_v54 = vcombine.low %v2037_v44, %v2038_v37  ;;  %v4343_v23 = vpack.c.bf16 %v5781_v51, %v5779_v49  ;;  %4336 = vmatprep.subr.bf16.mxu1 %v4335_v28 }
 0x1d1   :  { %v2293_v56 = vld [vmem:[#allocation2 + $0x17] ss:$8 sm:$0x3]  ;;  %1974 = vst [vmem:[#allocation6 + $0x28] sm:$0xc0] %v1970_v36  ;;  %v2134_v57 = vcombine.low %v2130_v48, %v2131_v39  ;;  %v3380_v59 = vld [vmem:[#allocation12 + $0x18] sm:$0xff] }
 0x1d2   :  { %v3378_v58 = vld [vmem:[#allocation12 + $0x8] sm:$0xff]  ;;  %2193 = vst [vmem:[#allocation6 + $0x38] sm:$0x30] %v2189_v45  ;;  %v2195_v62 = vld [vmem:[#allocation2 + $0x45] ss:$8 sm:$0x3]  ;;  %v2048_v4 = vrot.slane %v2041_v54, %v5592_v38 }
 0x1d3   :  { %v2260_v60 = vld [vmem:[#allocation2 + $0x16] ss:$8 sm:$0x3]  ;;  %v4451_v0 = vpack.c.bf16 %v3380_v59, %v3378_v58  ;;  %v2198_v1 = vcombine.low %v2194_v46, %v2195_v62  ;;  %v2294_v2 = vld [vmem:[#allocation2 + $0x47] ss:$8 sm:$0x3]  ;;  %v2141_v5 = vrot.slane %v2134_v57, %v5592_v38  ;;  %4338 = vmatpush1.bf16.msra.mxu1 %v4337_v10 }
 0x1d4   :  { %v2227_v6 = vld [vmem:[#allocation2 + $0x16] ss:$8 sm:$0x3]  ;;  %v2261_v8 = vld [vmem:[#allocation2 + $0x46] ss:$8 sm:$0x3]  ;;  %v2297_v13 = vcombine.low %v2293_v56, %v2294_v2  ;;  %v2049_v18 = vcombine.high %v2048_v4, %v2048_v4  ;;  %4340 = vmatprep.subr.bf16.mxu1 %v4339_v11 }
 0x1d5   :  { %v5790_v7 = vld [vmem:[#allocation12] sm:$0xff]  ;;  %1874 = vst [vmem:[#allocation6 + $0x20] sm:$0x30] %v1870_v63  ;;  %v2228_v14 = vld [vmem:[#allocation2 + $0x46] ss:$8 sm:$0x3]  ;;  %4452 = vmatprep.subr.bf16.mxu0 %v4451_v0  ;;  %v2264_v15 = vcombine.low %v2260_v60, %v2261_v8  ;;  %v2205_v17 = vrot.slane %v2198_v1, %v5592_v38  ;;  %v2142_v27 = vcombine.low %v2141_v5, %v2141_v5 }
 0x1d6   :  { %1973 = vst [vmem:[#allocation6 + $0x20] sm:$0xc0] %v1969_v3  ;;  %4086 = vst.sshfl [vmem:[#allocation6 + $0x58] sm:$0x50 pattern:$0x73625140] %v2141_v5  ;;  %v2231_v19 = vcombine.low %v2227_v6, %v2228_v14  ;;  %v2304_v24 = vrot.slane %v2297_v13, %v5592_v38 }
 0x1d7   :  { %v2326_v21 = vld [vmem:[#allocation2 + $0x20] ss:$8 sm:$0x3]  ;;  %v2327_v22 = vld [vmem:[#allocation2 + $0x50] ss:$8 sm:$0x3]  ;;  %v2271_v29 = vrot.slane %v2264_v15, %v5592_v38  ;;  %v2206_v30 = vcombine.high %v2205_v17, %v2205_v17  ;;  %v2213_v32 = vrot.slane %v2205_v17, %v5592_v38  ;;  %4342 = vmatpush1.bf16.msra.mxu1 %v4341_v12 }
 0x1d8   :  { %4079 = vst.sshfl [vmem:[#allocation6 + $0x50] sm:$0x5 pattern:$0x73625140] %v2048_v4  ;;  %v2330_v25 = vcombine.low %v2326_v21, %v2327_v22  ;;  %v3379_v26 = vld [vmem:[#allocation12 + $0x10] sm:$0xff]  ;;  %v2238_v33 = vrot.slane %v2231_v19, %v5592_v38  ;;  %v2319_v34 = vrot.slane %v2304_v24, %v5592_v38  ;;  %v2305_v35 = vcombine.low %v2304_v24, %v2304_v24  ;;  %v5809_v42 = vld [vmem:[#allocation10 + $0x2a0] sm:$0xff] }
 0x1d9   :  { %4080 = vst.sshfl [vmem:[#allocation6 + $0x58] sm:$0x5 pattern:$0x73625140] %v2049_v18  ;;  %v4453_v39 = vpack.c.bf16 %v3379_v26, %v5790_v7  ;;  %v2286_v40 = vrot.slane %v2271_v29, %v5592_v38  ;;  %v2272_v41 = vcombine.low %v2271_v29, %v2271_v29  ;;  %v2220_v55 = vrot.slane %v2206_v30, %v5592_v38  ;;  %v3382_v36 = vld [vmem:[#allocation12 + $0x28] sm:$0xff]  ;;  %v3384_v48 = vld [vmem:[#allocation12 + $0x38] sm:$0xff] }
 0x1da   :  { %v2337_v37 = vrot.slane %v2330_v25, %v5592_v38  ;;  %4085 = vst.sshfl [vmem:[#allocation6 + $0x50] sm:$0x50 pattern:$0x73625140] %v2142_v27  ;;  %v2221_v43 = vcombine.low %v2213_v32, %v2213_v32  ;;  %v2321_v44 = vcombine.low %v2319_v34, %v2319_v34  ;;  %v2312_v45 = vrot.slane %v2305_v35, %v5592_v38  ;;  %v3381_v56 = vld [vmem:[#allocation12 + $0x20] sm:$0xff]  ;;  %v3383_v53 = vld [vmem:[#allocation12 + $0x30] sm:$0xff] }
 0x1db   :  { %v2239_v46 = vcombine.high %v2238_v33, %v2238_v33  ;;  %v2288_v54 = vcombine.low %v2286_v40, %v2286_v40  ;;  %v2279_v57 = vrot.slane %v2272_v41, %v5592_v38  ;;  %v2457_v58 = vld [vmem:[#allocation10 + $0x2b0] sm:$0xff]  ;;  %v2222_v59 = vcombine.low %v2220_v55, %v2220_v55  ;;  %v3386_v61 = vld [vmem:[#allocation12 + $0x48] sm:$0xff]  ;;  %v3388_v28 = vld [vmem:[#allocation12 + $0x58] sm:$0xff]  ;;  %4454 = vmatpush1.bf16.msra.mxu0 %v4453_v39 }
 0x1dc   :  { %v2352_v47 = vrot.slane %v2337_v37, %v5592_v38  ;;  %2225 = vst [vmem:[#allocation6 + $0x40] sm:$0x30] %v2221_v43  ;;  %v2246_v60 = vrot.slane %v2238_v33, %v5592_v38  ;;  %v2460_v62 = vld [vmem:[#allocation10 + $0x2c8] sm:$0xff]  ;;  %v2462_v63 = vld [vmem:[#allocation10 + $0x2d8] sm:$0xff]  ;;  %2325 = vst [vmem:[#allocation6 + $0x48] sm:$0xc0] %v2321_v44  ;;  %v2320_v0 = vcombine.low %v2312_v45, %v2312_v45  ;;  %4344 = vmatprep.subr.bf16.mxu1 %v4343_v23 }
 0x1dd   :  { %v2253_v1 = vrot.slane %v2239_v46, %v5592_v38  ;;  %v2338_v3 = vcombine.low %v2337_v37, %v2337_v37  ;;  %2292 = vst [vmem:[#allocation6 + $0x38] sm:$0xc0] %v2288_v54  ;;  %v2287_v4 = vcombine.low %v2279_v57, %v2279_v57  ;;  %2226 = vst [vmem:[#allocation6 + $0x48] sm:$0x30] %v2222_v59  ;;  %v3385_v8 = vld [vmem:[#allocation12 + $0x40] sm:$0xff]  ;;  %v3387_v10 = vld [vmem:[#allocation12 + $0x50] sm:$0xff] }
 0x1de   :  { %v2354_v2 = vcombine.low %v2352_v47, %v2352_v47  ;;  %v2254_v5 = vcombine.low %v2246_v60, %v2246_v60  ;;  %v4455_v6 = vpack.c.bf16 %v3384_v48, %v3382_v36  ;;  %v4457_v7 = vpack.c.bf16 %v3383_v53, %v3381_v56  ;;  %2324 = vst [vmem:[#allocation6 + $0x40] sm:$0xc0] %v2320_v0  ;;  %v3390_v17 = vld [vmem:[#allocation12 + $0x68] sm:$0xff]  ;;  %v3392_v18 = vld [vmem:[#allocation12 + $0x78] sm:$0xff]  ;;  %v2459_v21 = vld [vmem:[#allocation10 + $0x2c0] sm:$0xff] }
 0x1df   :  { %v4345_v11 = vpack.c.bf16 %v2457_v58, %v5809_v42  ;;  %v2255_v13 = vcombine.low %v2253_v1, %v2253_v1  ;;  %v2345_v14 = vrot.slane %v2338_v3, %v5592_v38  ;;  %v4459_v15 = vpack.c.bf16 %v3388_v28, %v3386_v61  ;;  %2291 = vst [vmem:[#allocation6 + $0x30] sm:$0xc0] %v2287_v4  ;;  %v2461_v22 = vld [vmem:[#allocation10 + $0x2d0] sm:$0xff]  ;;  %v2464_v20 = vld [vmem:[#allocation10 + $0x2e8] sm:$0xff]  ;;  %v2466_v16 = vld [vmem:[#allocation10 + $0x2f8] sm:$0xff] }
 0x1e0   :  { %2358 = vst [vmem:[#allocation6 + $0x58] sm:$0xc0] %v2354_v2  ;;  %v4347_v19 = vpack.c.bf16 %v2462_v63, %v2460_v62  ;;  %2258 = vst [vmem:[#allocation6 + $0x50] sm:$0x30] %v2254_v5  ;;  %4456 = vmatprep.subr.bf16.mxu0 %v4455_v6  ;;  %v4461_v24 = vpack.c.bf16 %v3387_v10, %v3385_v8  ;;  %v4463_v25 = vpack.c.bf16 %v3392_v18, %v3390_v17  ;;  %v3389_v27 = vld [vmem:[#allocation12 + $0x60] sm:$0xff]  ;;  %v3391_v26 = vld [vmem:[#allocation12 + $0x70] sm:$0xff] }
 0x1e1   :  { %2259 = vst [vmem:[#allocation6 + $0x58] sm:$0x30] %v2255_v13  ;;  %v2353_v12 = vcombine.low %v2345_v14, %v2345_v14  ;;  %4458 = vmatpush1.bf16.msra.mxu0 %v4457_v7  ;;  %4346 = vmatpush1.bf16.msra.mxu1 %v4345_v11  ;;  %v4349_v29 = vpack.c.bf16 %v2461_v22, %v2459_v21  ;;  %v3394_v49 = vld [vmem:[#allocation12 + $0x88] sm:$0xff]  ;;  %v3396_v51 = vld [vmem:[#allocation12 + $0x98] sm:$0xff]  ;;  %v2463_v30 = vld [vmem:[#allocation10 + $0x2e0] sm:$0xff] }
 0x1e2   :  { %4460 = vmatprep.subr.bf16.mxu0 %v4459_v15  ;;  %4348 = vmatprep.subr.bf16.mxu1 %v4347_v19  ;;  %v4351_v23 = vpack.c.bf16 %v2466_v16, %v2464_v20  ;;  %v2465_v32 = vld [vmem:[#allocation10 + $0x2f0] sm:$0xff]  ;;  %v2468_v34 = vld [vmem:[#allocation10 + $0x308] sm:$0xff]  ;;  %v2470_v35 = vld [vmem:[#allocation10 + $0x318] sm:$0xff]  ;;  %v4465_v37 = vpack.c.bf16 %v3391_v26, %v3389_v27  ;;  %v4467_v39 = vpack.c.bf16 %v3396_v51, %v3394_v49 }
 0x1e3   :  { %2357 = vst [vmem:[#allocation6 + $0x50] sm:$0xc0] %v2353_v12  ;;  %v3393_v40 = vld [vmem:[#allocation12 + $0x80] sm:$0xff]  ;;  %v3395_v41 = vld [vmem:[#allocation12 + $0x90] sm:$0xff]  ;;  %v4353_v55 = vpack.c.bf16 %v2465_v32, %v2463_v30  ;;  %v2362_v43 = vld [vmem:[#allocation6 + $0x18] sm:$0xff]  ;;  %v4355_v36 = vpack.c.bf16 %v2470_v35, %v2468_v34 }
 0x1e4   :  { %v2366_v33 = vld [vmem:[#allocation6 + $0x38] sm:$0xff]  ;;  %v2467_v44 = vld [vmem:[#allocation10 + $0x300] sm:$0xff]  ;;  %v2469_v45 = vld [vmem:[#allocation10 + $0x310] sm:$0xff]  ;;  %v4469_v48 = vpack.c.bf16 %v3395_v41, %v3393_v40 }
 0x1e5   :  { %4462 = vmatpush1.bf16.msra.mxu0 %v4461_v24  ;;  %2645 = vmatprep.mubr.f32.mxu1 %v2366_v33  ;;  %v2472_v46 = vld [vmem:[#allocation10 + $0x328] sm:$0xff]  ;;  %v2474_v47 = vld [vmem:[#allocation10 + $0x338] sm:$0xff]  ;;  %v4357_v56 = vpack.c.bf16 %v2469_v45, %v2467_v44  ;;  %v2471_v54 = vld [vmem:[#allocation10 + $0x320] sm:$0xff] }
 0x1e6   :  { %4464 = vmatprep.subr.bf16.mxu0 %v4463_v25  ;;  %v2365_v42 = vld [vmem:[#allocation6 + $0x30] sm:$0xff]  ;;  %4350 = vmatpush1.bf16.msra.mxu1 %v4349_v29  ;;  %v4359_v53 = vpack.c.bf16 %v2474_v47, %v2472_v46  ;;  %v2473_v57 = vld [vmem:[#allocation10 + $0x330] sm:$0xff]  ;;  %v2476_v58 = vld [vmem:[#allocation10 + $0x348] sm:$0xff] }
 0x1e7   :  { %2646 = vmatmul.mubr.f32.gmra.mrb[10].mxu1 %v2365_v42  ;;  %4352 = vmatprep.subr.bf16.mxu1 %v4351_v23  ;;  %v2478_v59 = vld [vmem:[#allocation10 + $0x358] sm:$0xff]  ;;  %v4361_v60 = vpack.c.bf16 %v2473_v57, %v2471_v54  ;;  %v2475_v28 = vld [vmem:[#allocation10 + $0x340] sm:$0xff]  ;;  %v2477_v62 = vld [vmem:[#allocation10 + $0x350] sm:$0xff] }
 0x1e8   :  { %2716 = vmatprep.mubr.f32.mxu1 %v2362_v43  ;;  %v4363_v61 = vpack.c.bf16 %v2478_v59, %v2476_v58  ;;  %v2480_v63 = vld [vmem:[#allocation10 + $0x368] sm:$0xff]  ;;  %v2482_v0 = vld [vmem:[#allocation10 + $0x378] sm:$0xff]  ;;  %v4365_v1 = vpack.c.bf16 %v2477_v62, %v2475_v28  ;;  %v2479_v3 = vld [vmem:[#allocation10 + $0x360] sm:$0xff] }
 0x1e9   :  { %4466 = vmatpush1.bf16.msra.mxu0 %v4465_v37  ;;  %v4367_v2 = vpack.c.bf16 %v2482_v0, %v2480_v63  ;;  %v2481_v4 = vld [vmem:[#allocation10 + $0x370] sm:$0xff]  ;;  %v2484_v5 = vld [vmem:[#allocation10 + $0x388] sm:$0xff]  ;;  %v2486_v6 = vld [vmem:[#allocation10 + $0x398] sm:$0xff] }
 0x1ea   :  { %4468 = vmatprep.subr.bf16.mxu0 %v4467_v39  ;;  %4354 = vmatpush1.bf16.msra.mxu1 %v4353_v55  ;;  %v4369_v7 = vpack.c.bf16 %v2481_v4, %v2479_v3  ;;  %v4371_v8 = vpack.c.bf16 %v2486_v6, %v2484_v5  ;;  %v2483_v10 = vld [vmem:[#allocation10 + $0x380] sm:$0xff]  ;;  %v2485_v11 = vld [vmem:[#allocation10 + $0x390] sm:$0xff]  ;;  %v2488_v13 = vld [vmem:[#allocation10 + $0x3a8] sm:$0xff] }
 0x1eb   :  { %4356 = vmatprep.subr.bf16.mxu1 %v4355_v36  ;;  %v2490_v14 = vld [vmem:[#allocation10 + $0x3b8] sm:$0xff]  ;;  %v4373_v15 = vpack.c.bf16 %v2485_v11, %v2483_v10  ;;  %v2487_v18 = vld [vmem:[#allocation10 + $0x3a0] sm:$0xff]  ;;  %v2489_v19 = vld [vmem:[#allocation10 + $0x3b0] sm:$0xff] }
 0x1ec   :  { %v4375_v17 = vpack.c.bf16 %v2490_v14, %v2488_v13  ;;  %v2492_v21 = vld [vmem:[#allocation10 + $0x3c8] sm:$0xff]  ;;  %v2494_v22 = vld [vmem:[#allocation10 + $0x3d8] sm:$0xff]  ;;  %v4377_v20 = vpack.c.bf16 %v2489_v19, %v2487_v18  ;;  %v2491_v12 = vld [vmem:[#allocation10 + $0x3c0] sm:$0xff] }
 0x1ed   :  { %4470 = vmatpush1.bf16.msra.mxu0 %v4469_v48  ;;  %v4379_v16 = vpack.c.bf16 %v2494_v22, %v2492_v21  ;;  %v2493_v24 = vld [vmem:[#allocation10 + $0x3d0] sm:$0xff]  ;;  %v2496_v25 = vld [vmem:[#allocation10 + $0x3e8] sm:$0xff]  ;;  %v2498_v27 = vld [vmem:[#allocation10 + $0x3f8] sm:$0xff] }
 0x1ee   :  { %4358 = vmatpush1.bf16.msra.mxu1 %v4357_v56  ;;  %v4381_v26 = vpack.c.bf16 %v2493_v24, %v2491_v12  ;;  %v4383_v29 = vpack.c.bf16 %v2498_v27, %v2496_v25  ;;  %v2495_v49 = vld [vmem:[#allocation10 + $0x3e0] sm:$0xff]  ;;  %v2497_v51 = vld [vmem:[#allocation10 + $0x3f0] sm:$0xff]  ;;  %v2500_v23 = vld [vmem:[#allocation10 + $0x408] sm:$0xff] }
 0x1ef   :  { %4360 = vmatprep.subr.bf16.mxu1 %v4359_v53  ;;  %v2502_v30 = vld [vmem:[#allocation10 + $0x418] sm:$0xff]  ;;  %v4385_v32 = vpack.c.bf16 %v2497_v51, %v2495_v49  ;;  %v2499_v34 = vld [vmem:[#allocation10 + $0x400] sm:$0xff]  ;;  %v2501_v35 = vld [vmem:[#allocation10 + $0x410] sm:$0xff] }
 0x1f0   :  { %v4387_v33 = vpack.c.bf16 %v2502_v30, %v2500_v23  ;;  %v2504_v37 = vld [vmem:[#allocation10 + $0x428] sm:$0xff]  ;;  %v2506_v39 = vld [vmem:[#allocation10 + $0x438] sm:$0xff]  ;;  %v4389_v40 = vpack.c.bf16 %v2501_v35, %v2499_v34  ;;  %v2503_v42 = vld [vmem:[#allocation10 + $0x420] sm:$0xff] }
 0x1f1   :  { %v4391_v41 = vpack.c.bf16 %v2506_v39, %v2504_v37  ;;  %v2505_v55 = vld [vmem:[#allocation10 + $0x430] sm:$0xff]  ;;  %v2361_v43 = vld [vmem:[#allocation6 + $0x10] sm:$0xff]  ;;  %v2508_v36 = vld [vmem:[#allocation10 + $0x448] sm:$0xff] }
 0x1f2   :  { %4362 = vmatpush1.bf16.msra.mxu1 %v4361_v60  ;;  %v2510_v44 = vld [vmem:[#allocation10 + $0x458] sm:$0xff]  ;;  %v4393_v46 = vpack.c.bf16 %v2505_v55, %v2503_v42  ;;  %v2507_v48 = vld [vmem:[#allocation10 + $0x440] sm:$0xff]  ;;  %v2509_v56 = vld [vmem:[#allocation10 + $0x450] sm:$0xff] }
 0x1f3   :  { %4364 = vmatprep.subr.bf16.mxu1 %v4363_v61  ;;  %v2368_v45 = vld [vmem:[#allocation6 + $0x48] sm:$0xff]  ;;  %v4395_v47 = vpack.c.bf16 %v2510_v44, %v2508_v36  ;;  %v2367_v53 = vld [vmem:[#allocation6 + $0x40] sm:$0xff]  ;;  %v2512_v54 = vld [vmem:[#allocation10 + $0x468] sm:$0xff]  ;;  %v4397_v59 = vpack.c.bf16 %v2509_v56, %v2507_v48 }
 0x1f4   :  { %v2514_v57 = vld [vmem:[#allocation10 + $0x478] sm:$0xff]  ;;  %v2511_v61 = vld [vmem:[#allocation10 + $0x460] sm:$0xff]  ;;  %v2513_v28 = vld [vmem:[#allocation10 + $0x470] sm:$0xff] }
 0x1f5   :  { %v2364_v58 = vld [vmem:[#allocation6 + $0x28] sm:$0xff]  ;;  %v4399_v60 = vpack.c.bf16 %v2514_v57, %v2512_v54  ;;  %v2516_v62 = vld [vmem:[#allocation10 + $0x488] sm:$0xff]  ;;  %v4401_v0 = vpack.c.bf16 %v2513_v28, %v2511_v61  ;;  %v2517_v3 = vld [vmem:[#allocation10 + $0x490] sm:$0xff] }
 0x1f6   :  { %4366 = vmatpush1.bf16.msra.mxu1 %v4365_v1  ;;  %v2518_v63 = vld [vmem:[#allocation10 + $0x498] sm:$0xff]  ;;  %v2520_v4 = vld [vmem:[#allocation10 + $0x4a8] sm:$0xff]  ;;  %v2521_v10 = vld [vmem:[#allocation10 + $0x4b0] sm:$0xff] }
 0x1f7   :  { %4368 = vmatprep.subr.bf16.mxu1 %v4367_v2  ;;  %v4403_v1 = vpack.c.bf16 %v2518_v63, %v2516_v62  ;;  %v2515_v2 = vld [vmem:[#allocation10 + $0x480] sm:$0xff]  ;;  %v2522_v5 = vld [vmem:[#allocation10 + $0x4b8] sm:$0xff]  ;;  %v2524_v11 = vld [vmem:[#allocation10 + $0x4c8] sm:$0xff] }
 0x1f8   :  { %v4405_v6 = vpack.c.bf16 %v2517_v3, %v2515_v2  ;;  %v2526_v13 = vld [vmem:[#allocation10 + $0x4d8] sm:$0xff]  ;;  %v2525_v18 = vld [vmem:[#allocation10 + $0x4d0] sm:$0xff]  ;;  %v2528_v19 = vld [vmem:[#allocation10 + $0x4e8] sm:$0xff] }
 0x1f9   :  { %v2530_v21 = vld [vmem:[#allocation10 + $0x4f8] sm:$0xff]  ;;  %v2529_v12 = vld [vmem:[#allocation10 + $0x4f0] sm:$0xff]  ;;  %v2532_v24 = vld [vmem:[#allocation10 + $0x508] sm:$0xff] }
 0x1fa   :  { %4370 = vmatpush1.bf16.msra.mxu1 %v4369_v7  ;;  %v4407_v7 = vpack.c.bf16 %v2522_v5, %v2520_v4  ;;  %v2534_v25 = vld [vmem:[#allocation10 + $0x518] sm:$0xff]  ;;  %v2533_v49 = vld [vmem:[#allocation10 + $0x510] sm:$0xff]  ;;  %v2536_v51 = vld [vmem:[#allocation10 + $0x528] sm:$0xff] }
 0x1fb   :  { %4372 = vmatprep.subr.bf16.mxu1 %v4371_v8  ;;  %v2519_v8 = vld [vmem:[#allocation10 + $0x4a0] sm:$0xff]  ;;  %v2538_v23 = vld [vmem:[#allocation10 + $0x538] sm:$0xff]  ;;  %v2537_v34 = vld [vmem:[#allocation10 + $0x530] sm:$0xff] }
 0x1fc   :  { %v4409_v14 = vpack.c.bf16 %v2521_v10, %v2519_v8  ;;  %v2540_v35 = vld [vmem:[#allocation10 + $0x548] sm:$0xff]  ;;  %v2542_v37 = vld [vmem:[#allocation10 + $0x558] sm:$0xff]  ;;  %v2541_v42 = vld [vmem:[#allocation10 + $0x550] sm:$0xff] }
 0x1fd   :  { %v2544_v55 = vld [vmem:[#allocation10 + $0x568] sm:$0xff]  ;;  %v2550_v48 = vld [vmem:[#allocation10 + $0x598] sm:$0xff]  ;;  %v2547_v54 = vld [vmem:[#allocation10 + $0x580] sm:$0xff] }
 0x1fe   :  { %4374 = vmatpush1.bf16.msra.mxu1 %v4373_v15  ;;  %v4411_v15 = vpack.c.bf16 %v2526_v13, %v2524_v11  ;;  %v2549_v57 = vld [vmem:[#allocation10 + $0x590] sm:$0xff]  ;;  %v2551_v28 = vld [vmem:[#allocation10 + $0x5a0] sm:$0xff]  ;;  %v2556_v63 = vld [vmem:[#allocation10 + $0x5c8] sm:$0xff] }
 0x1ff   :  { %4376 = vmatprep.subr.bf16.mxu1 %v4375_v17  ;;  %v2523_v17 = vld [vmem:[#allocation10 + $0x4c0] sm:$0xff]  ;;  %v2553_v62 = vld [vmem:[#allocation10 + $0x5b0] sm:$0xff]  ;;  %v2560_v5 = vld [vmem:[#allocation10 + $0x5e8] sm:$0xff] }
 0x200   :  { %v4413_v22 = vpack.c.bf16 %v2525_v18, %v2523_v17  ;;  %v2555_v3 = vld [vmem:[#allocation10 + $0x5c0] sm:$0xff]  ;;  %v2557_v4 = vld [vmem:[#allocation10 + $0x5d0] sm:$0xff]  ;;  %v3398_v18 = vld [vmem:[#allocation12 + $0xa8] sm:$0xff] }
 0x201   :  { %v2559_v10 = vld [vmem:[#allocation10 + $0x5e0] sm:$0xff]  ;;  %v2561_v11 = vld [vmem:[#allocation10 + $0x5f0] sm:$0xff] }
 0x202   :  { %4378 = vmatpush1.bf16.msra.mxu1 %v4377_v20  ;;  %v4415_v20 = vpack.c.bf16 %v2530_v21, %v2528_v19  ;;  %v4449_v13 = vpack.c.bf16 %v2561_v11, %v2559_v10  ;;  %v2369_v17 = vld [vmem:[#allocation6 + $0x50] sm:$0xff]  ;;  %v3400_v19 = vld [vmem:[#allocation12 + $0xb8] sm:$0xff] }
 0x203   :  { %4380 = vmatprep.subr.bf16.mxu1 %v4379_v16  ;;  %v2527_v16 = vld [vmem:[#allocation10 + $0x4e0] sm:$0xff]  ;;  %v3432_v10 = vld [vmem:[#allocation12 + $0x1b8] sm:$0xff] }
 0x204   :  { %v4417_v27 = vpack.c.bf16 %v2529_v12, %v2527_v16  ;;  %v3397_v21 = vld [vmem:[#allocation12 + $0xa0] sm:$0xff]  ;;  %v3402_v12 = vld [vmem:[#allocation12 + $0xc8] sm:$0xff] }
 0x206   :  { %4382 = vmatpush1.bf16.msra.mxu1 %v4381_v26  ;;  %v4419_v26 = vpack.c.bf16 %v2534_v25, %v2532_v24  ;;  %v3404_v24 = vld [vmem:[#allocation12 + $0xd8] sm:$0xff]  ;;  %v3401_v25 = vld [vmem:[#allocation12 + $0xc0] sm:$0xff] }
 0x207   :  { %4384 = vmatprep.subr.bf16.mxu1 %v4383_v29  ;;  %v2531_v29 = vld [vmem:[#allocation10 + $0x500] sm:$0xff] }
 0x208   :  { %v4421_v30 = vpack.c.bf16 %v2533_v49, %v2531_v29  ;;  %v3406_v29 = vld [vmem:[#allocation12 + $0xe8] sm:$0xff]  ;;  %v3408_v49 = vld [vmem:[#allocation12 + $0xf8] sm:$0xff] }
 0x20a   :  { %4386 = vmatpush1.bf16.msra.mxu1 %v4385_v32  ;;  %v4423_v32 = vpack.c.bf16 %v2538_v23, %v2536_v51  ;;  %v4479_v23 = vpack.c.bf16 %v3408_v49, %v3406_v29  ;;  %v3442_v29 = vld [vmem:[#allocation12 + $0x208] sm:$0xff]  ;;  %v3444_v49 = vld [vmem:[#allocation12 + $0x218] sm:$0xff] }
 0x20b   :  { %4388 = vmatprep.subr.bf16.mxu1 %v4387_v33  ;;  %v2535_v33 = vld [vmem:[#allocation10 + $0x520] sm:$0xff] }
 0x20c   :  { %v4425_v39 = vpack.c.bf16 %v2537_v34, %v2535_v33  ;;  %v3410_v33 = vld [vmem:[#allocation12 + $0x108] sm:$0xff]  ;;  %v3412_v34 = vld [vmem:[#allocation12 + $0x118] sm:$0xff] }
 0x20d   :  { %2717 = vmatmul.mubr.f32.vlgmr.msra.gmra.mrb[8].mxu1 %v2361_v43  ;;  %v2546_v43 = vld [vmem:[#allocation10 + $0x578] sm:$0xff] }
 0x20e   :  { %2722 = vmatprep.mubr.f32.mxu1 %v2368_v45  ;;  %4390 = vmatpush1.bf16.msra.mxu1 %v4389_v40  ;;  %v4427_v40 = vpack.c.bf16 %v2542_v37, %v2540_v35  ;;  %v4431_v44 = vpack.c.bf16 %v2546_v43, %v2544_v55  ;;  %v2543_v45 = vld [vmem:[#allocation10 + $0x560] sm:$0xff]  ;;  %v4483_v37 = vpack.c.bf16 %v3412_v34, %v3410_v33 }
 0x20f   :  { %4392 = vmatprep.subr.bf16.mxu1 %v4391_v41  ;;  %v2539_v41 = vld [vmem:[#allocation10 + $0x540] sm:$0xff] }
 0x210   :  { %v4429_v36 = vpack.c.bf16 %v2541_v42, %v2539_v41  ;;  %v3414_v41 = vld [vmem:[#allocation12 + $0x128] sm:$0xff]  ;;  %v3416_v42 = vld [vmem:[#allocation12 + $0x138] sm:$0xff] }
 0x211   :  { %2723 = vmatmul.mubr.f32.gmra.mrb[10].mxu1 %v2367_v53  ;;  %v4487_v43 = vpack.c.bf16 %v3416_v42, %v3414_v41 }
 0x212   :  { %4394 = vmatpush1.bf16.msra.mxu1 %v4393_v46  ;;  %2793 = vmatprep.mubr.f32.mxu1 %v2364_v58  ;;  %v2545_v46 = vld [vmem:[#allocation10 + $0x570] sm:$0xff]  ;;  %v2552_v58 = vld [vmem:[#allocation10 + $0x5a8] sm:$0xff] }
 0x213   :  { %4396 = vmatprep.subr.bf16.mxu1 %v4395_v47  ;;  %v2548_v47 = vld [vmem:[#allocation10 + $0x588] sm:$0xff]  ;;  %v4433_v56 = vpack.c.bf16 %v2545_v46, %v2543_v45  ;;  %v3420_v46 = vld [vmem:[#allocation12 + $0x158] sm:$0xff] }
 0x214   :  { %v4435_v53 = vpack.c.bf16 %v2550_v48, %v2548_v47  ;;  %v3418_v45 = vld [vmem:[#allocation12 + $0x148] sm:$0xff] }
 0x215   :  { %v4491_v48 = vpack.c.bf16 %v3420_v46, %v3418_v45 }
 0x216   :  { %4398 = vmatpush1.bf16.msra.mxu1 %v4397_v59  ;;  %v2554_v59 = vld [vmem:[#allocation10 + $0x5b8] sm:$0xff] }
 0x217   :  { %4400 = vmatprep.subr.bf16.mxu1 %v4399_v60  ;;  %v4437_v60 = vpack.c.bf16 %v2549_v57, %v2547_v54  ;;  %v4439_v61 = vpack.c.bf16 %v2554_v59, %v2552_v58  ;;  %v2986_v54 = vld [vmem:[#allocation3] ss:$8 sm:$0x3]  ;;  %v3422_v57 = vld [vmem:[#allocation12 + $0x168] sm:$0xff] }
 0x218   :  { %v3424_v58 = vld [vmem:[#allocation12 + $0x178] sm:$0xff] }
 0x219   :  { %v2988_v59 = vld [vmem:[#allocation3 + $0x20] ss:$8 sm:$0x3] }
 0x21a   :  { %4402 = vmatpush1.bf16.msra.mxu1 %v4401_v0  ;;  %v2558_v0 = vld [vmem:[#allocation10 + $0x5d8] sm:$0xff] }
 0x21b   :  { %4404 = vmatprep.subr.bf16.mxu1 %v4403_v1  ;;  %v4441_v1 = vpack.c.bf16 %v2553_v62, %v2551_v28  ;;  %v4443_v2 = vpack.c.bf16 %v2558_v0, %v2556_v63  ;;  %v4495_v28 = vpack.c.bf16 %v3424_v58, %v3422_v57  ;;  %v3421_v62 = vld [vmem:[#allocation12 + $0x160] sm:$0xff]  ;;  %v3423_v63 = vld [vmem:[#allocation12 + $0x170] sm:$0xff] }
 0x21e   :  { %4406 = vmatpush1.bf16.msra.mxu1 %v4405_v6  ;;  %v2562_v6 = vld [vmem:[#allocation10 + $0x5f8] sm:$0xff] }
 0x21f   :  { %4408 = vmatprep.subr.bf16.mxu1 %v4407_v7  ;;  %v4445_v7 = vpack.c.bf16 %v2557_v4, %v2555_v3  ;;  %v4447_v8 = vpack.c.bf16 %v2562_v6, %v2560_v5  ;;  %v4497_v4 = vpack.c.bf16 %v3423_v63, %v3421_v62  ;;  %v3425_v6 = vld [vmem:[#allocation12 + $0x180] sm:$0xff] }
 0x222   :  { %4410 = vmatpush1.bf16.msra.mxu1 %v4409_v14  ;;  %v2363_v14 = vld [vmem:[#allocation6 + $0x20] sm:$0xff] }
 0x223   :  { %4412 = vmatprep.subr.bf16.mxu1 %v4411_v15  ;;  %v2370_v15 = vld [vmem:[#allocation6 + $0x58] sm:$0xff] }
 0x226   :  { %4414 = vmatpush1.bf16.msra.mxu1 %v4413_v22  ;;  %v4471_v22 = vpack.c.bf16 %v3400_v19, %v3398_v18  ;;  %v3436_v18 = vld [vmem:[#allocation12 + $0x1d8] sm:$0xff] }
 0x227   :  { %4416 = vmatprep.subr.bf16.mxu1 %v4415_v20  ;;  %v3399_v20 = vld [vmem:[#allocation12 + $0xb0] sm:$0xff] }
 0x228   :  { %v4473_v16 = vpack.c.bf16 %v3399_v20, %v3397_v21  ;;  %4472 = vmatprep.subr.bf16.mxu0 %v4471_v22  ;;  %v3433_v22 = vld [vmem:[#allocation12 + $0x1c0] sm:$0xff]  ;;  %v3435_v20 = vld [vmem:[#allocation12 + $0x1d0] sm:$0xff] }
 0x22a   :  { %4418 = vmatpush1.bf16.msra.mxu1 %v4417_v27  ;;  %4474 = vmatpush1.bf16.msra.mxu0 %v4473_v16  ;;  %v4475_v27 = vpack.c.bf16 %v3404_v24, %v3402_v12  ;;  %v3438_v16 = vld [vmem:[#allocation12 + $0x1e8] sm:$0xff]  ;;  %v3440_v12 = vld [vmem:[#allocation12 + $0x1f8] sm:$0xff]  ;;  %v4509_v24 = vpack.c.bf16 %v3435_v20, %v3433_v22 }
 0x22b   :  { %4420 = vmatprep.subr.bf16.mxu1 %v4419_v26  ;;  %v3403_v26 = vld [vmem:[#allocation12 + $0xd0] sm:$0xff] }
 0x22c   :  { %v4477_v51 = vpack.c.bf16 %v3403_v26, %v3401_v25  ;;  %4476 = vmatprep.subr.bf16.mxu0 %v4475_v27  ;;  %v4511_v25 = vpack.c.bf16 %v3440_v12, %v3438_v16  ;;  %v3437_v27 = vld [vmem:[#allocation12 + $0x1e0] sm:$0xff]  ;;  %v3439_v26 = vld [vmem:[#allocation12 + $0x1f0] sm:$0xff] }
 0x22e   :  { %4422 = vmatpush1.bf16.msra.mxu1 %v4421_v30  ;;  %v3405_v30 = vld [vmem:[#allocation12 + $0xe0] sm:$0xff]  ;;  %4478 = vmatpush1.bf16.msra.mxu0 %v4477_v51  ;;  %v4513_v51 = vpack.c.bf16 %v3439_v26, %v3437_v27 }
 0x22f   :  { %4424 = vmatprep.subr.bf16.mxu1 %v4423_v32  ;;  %v3407_v32 = vld [vmem:[#allocation12 + $0xf0] sm:$0xff]  ;;  %4480 = vmatprep.subr.bf16.mxu0 %v4479_v23  ;;  %v4515_v23 = vpack.c.bf16 %v3444_v49, %v3442_v29 }
 0x230   :  { %v4481_v35 = vpack.c.bf16 %v3407_v32, %v3405_v30  ;;  %v2563_v30 = vld [vmem:[%s6000_s4] sm:$0x3] }
 0x231   :  { %v2568_v32 = vrot.slane %v2563_v30, %v5596_v50  ;;  %v2572_v33 = vrot.slane %v2563_v30, %v5602_v52 }
 0x232   :  { %4426 = vmatpush1.bf16.msra.mxu1 %v4425_v39  ;;  %v3409_v39 = vld [vmem:[#allocation12 + $0x100] sm:$0xff]  ;;  %4482 = vmatpush1.bf16.msra.mxu0 %v4481_v35 }
 0x233   :  { %4428 = vmatprep.subr.bf16.mxu1 %v4427_v40  ;;  %v3411_v40 = vld [vmem:[#allocation12 + $0x110] sm:$0xff]  ;;  %4484 = vmatprep.subr.bf16.mxu0 %v4483_v37 }
 0x234   :  { %v4485_v55 = vpack.c.bf16 %v3411_v40, %v3409_v39 }
 0x236   :  { %4430 = vmatpush1.bf16.msra.mxu1 %v4429_v36  ;;  %v3413_v36 = vld [vmem:[#allocation12 + $0x120] sm:$0xff]  ;;  %4486 = vmatpush1.bf16.msra.mxu0 %v4485_v55 }
 0x237   :  { %4432 = vmatprep.subr.bf16.mxu1 %v4431_v44  ;;  %v3415_v44 = vld [vmem:[#allocation12 + $0x130] sm:$0xff]  ;;  %4488 = vmatprep.subr.bf16.mxu0 %v4487_v43 }
 0x238   :  { %v4489_v47 = vpack.c.bf16 %v3415_v44, %v3413_v36 }
 0x23a   :  { %4434 = vmatpush1.bf16.msra.mxu1 %v4433_v56  ;;  %v3417_v56 = vld [vmem:[#allocation12 + $0x140] sm:$0xff]  ;;  %4490 = vmatpush1.bf16.msra.mxu0 %v4489_v47 }
 0x23b   :  { %4436 = vmatprep.subr.bf16.mxu1 %v4435_v53  ;;  %v3419_v53 = vld [vmem:[#allocation12 + $0x150] sm:$0xff]  ;;  %4492 = vmatprep.subr.bf16.mxu0 %v4491_v48 }
 0x23e   :  { %4438 = vmatpush1.bf16.msra.mxu1 %v4437_v60  ;;  %v2991_v60 = vcombine.low %v2986_v54, %v2988_v59 }
 0x23f   :  { %4440 = vmatprep.subr.bf16.mxu1 %v4439_v61  ;;  %v4493_v61 = vpack.c.bf16 %v3419_v53, %v3417_v56 }
 0x240   :  { %v2998_v0 = vrot.slane %v2991_v60, %v5592_v38 }
 0x241   :  { %4494 = vmatpush1.bf16.msra.mxu0 %v4493_v61 }
 0x242   :  { %4442 = vmatpush1.bf16.msra.mxu1 %v4441_v1  ;;  %v3426_v1 = vld [vmem:[#allocation12 + $0x188] sm:$0xff]  ;;  %v2999_v3 = vcombine.high %v2998_v0, %v2998_v0  ;;  %4087 = vst.sshfl [vmem:[#allocation7] sm:$0x5 pattern:$0x73625140] %v2998_v0  ;;  %4496 = vmatprep.subr.bf16.mxu0 %v4495_v28 }
 0x243   :  { %4444 = vmatprep.subr.bf16.mxu1 %v4443_v2  ;;  %v3428_v2 = vld [vmem:[#allocation12 + $0x198] sm:$0xff] }
 0x244   :  { %v4499_v5 = vpack.c.bf16 %v3428_v2, %v3426_v1  ;;  %4088 = vst.sshfl [vmem:[#allocation7 + $0x8] sm:$0x5 pattern:$0x73625140] %v2999_v3 }
 0x245   :  { %4498 = vmatpush1.bf16.msra.mxu0 %v4497_v4 }
 0x246   :  { %4446 = vmatpush1.bf16.msra.mxu1 %v4445_v7  ;;  %v3427_v7 = vld [vmem:[#allocation12 + $0x190] sm:$0xff]  ;;  %4500 = vmatprep.subr.bf16.mxu0 %v4499_v5 }
 0x247   :  { %4448 = vmatprep.subr.bf16.mxu1 %v4447_v8  ;;  %v3430_v8 = vld [vmem:[#allocation12 + $0x1a8] sm:$0xff]  ;;  %v4501_v11 = vpack.c.bf16 %v3427_v7, %v3425_v6 }
 0x249   :  { %4502 = vmatpush1.bf16.msra.mxu0 %v4501_v11 }
 0x24a   :  { %4450 = vmatpush1.bf16.msra.mxu1 %v4449_v13  ;;  %v4503_v13 = vpack.c.bf16 %v3432_v10, %v3430_v8 }
 0x24c   :  { %4504 = vmatprep.subr.bf16.mxu0 %v4503_v13 }
 0x24d   :  { %2794 = vmatmul.mubr.f32.vlgmr.msra.gmra.mrb[8].mxu1 %v2363_v14  ;;  %v3429_v14 = vld [vmem:[#allocation12 + $0x1a0] sm:$0xff] }
 0x24e   :  { %2799 = vmatprep.mubr.f32.mxu1 %v2370_v15  ;;  %v3431_v15 = vld [vmem:[#allocation12 + $0x1b0] sm:$0xff] }
 0x24f   :  { %v4505_v19 = vpack.c.bf16 %v3431_v15, %v3429_v14 }
 0x251   :  { %2800 = vmatmul.mubr.f32.gmra.mrb[10].mxu1 %v2369_v17  ;;  %v3434_v17 = vld [vmem:[#allocation12 + $0x1c8] sm:$0xff]  ;;  %4506 = vmatpush1.bf16.msra.mxu0 %v4505_v19 }
 0x252   :  { %v4507_v21 = vpack.c.bf16 %v3436_v18, %v3434_v17 }
 0x254   :  { %4508 = vmatprep.subr.bf16.mxu0 %v4507_v21 }
 0x255   :  { %4510 = vmatpush1.bf16.msra.mxu0 %v4509_v24 }
 0x256   :  { %4512 = vmatprep.subr.bf16.mxu0 %v4511_v25 }
 0x259   :  { %4514 = vmatpush1.bf16.msra.mxu0 %v4513_v51 }
 0x25a   :  { %4516 = vmatprep.subr.bf16.mxu0 %v4515_v23 }
 0x320   :  { %v2795_v34 = vpop.f32.mrb[8].mxu1 }
 0x321   :  { %v4659_v35 = vadd.f32 %v2795_v34, %v2568_v32  ;;  %v2797_v37 = vpop.f32.mrb[9].mxu1 }
 0x322   :  { %v4660_v39 = vadd.f32 %v2797_v37, %v2572_v33 }
 0x323   :  { %v2806_v40 = vmax.f32 %v4659_v35, 0.0 }
 0x324   :  { %v2807_v41 = vmax.f32 %v4660_v39, 0.0  ;;  %v2801_v42 = vpop.f32.mrb[10].mxu1 }
 0x325   :  { %v4661_v55 = vadd.f32 %v2801_v42, %v2568_v32  ;;  %v2803_v43 = vpop.f32.mrb[11].mxu1 }
 0x326   :  { %v2820_v36 = vcombine.low %v2806_v40, %v2807_v41  ;;  %v2861_v44 = vcombine.high %v2806_v40, %v2807_v41  ;;  %v4662_v45 = vadd.f32 %v2803_v43, %v2572_v33 }
 0x327   :  { %v2808_v46 = vmax.f32 %v4661_v55, 0.0 }
 0x328   :  { %v2827_v47 = vrot.slane %v2820_v36, %v5592_v38  ;;  %v2868_v48 = vrot.slane %v2861_v44, %v5592_v38  ;;  %v2809_v56 = vmax.f32 %v4662_v45, 0.0 }
 0x32a   :  { %v2828_v53 = vcombine.high %v2827_v47, %v2827_v47  ;;  %v2835_v54 = vrot.slane %v2827_v47, %v5592_v38  ;;  %v2869_v57 = vcombine.high %v2868_v48, %v2868_v48  ;;  %v2876_v58 = vrot.slane %v2868_v48, %v5592_v38 }
 0x32b   :  { %v2904_v59 = vcombine.low %v2808_v46, %v2809_v56  ;;  %v2945_v60 = vcombine.high %v2808_v46, %v2809_v56 }
 0x32c   :  { %v2842_v61 = vrot.slane %v2828_v53, %v5592_v38  ;;  %2846 = vst.msk [vmem:[#allocation3 + $0x1] ss:$8 sm:$0x3] %vm5617_vm4, %v2835_v54  ;;  %v2851_v28 = vcombine.high %v2835_v54, %v2835_v54  ;;  %v2883_v62 = vrot.slane %v2869_v57, %v5592_v38  ;;  %2887 = vst.msk [vmem:[#allocation3 + $0x3] ss:$8 sm:$0x3] %vm5617_vm4, %v2876_v58 }
 0x32d   :  { %v2892_v63 = vcombine.high %v2876_v58, %v2876_v58  ;;  %v2911_v0 = vrot.slane %v2904_v59, %v5592_v38  ;;  %v2952_v1 = vrot.slane %v2945_v60, %v5592_v38 }
 0x32e   :  { %2849 = vst.msk [vmem:[#allocation3 + $0x21] ss:$8 sm:$0x3] %vm5617_vm4, %v2842_v61  ;;  %v2852_v2 = vcombine.high %v2842_v61, %v2842_v61  ;;  %2856 = vst.msk [vmem:[#allocation3 + $0x2] ss:$8 sm:$0x3] %vm5617_vm4, %v2851_v28  ;;  %v2893_v3 = vcombine.high %v2883_v62, %v2883_v62 }
 0x32f   :  { %2890 = vst.msk [vmem:[#allocation3 + $0x23] ss:$8 sm:$0x3] %vm5617_vm4, %v2883_v62  ;;  %2897 = vst.msk [vmem:[#allocation3 + $0x4] ss:$8 sm:$0x3] %vm5617_vm4, %v2892_v63  ;;  %v2912_v4 = vcombine.high %v2911_v0, %v2911_v0  ;;  %v2919_v5 = vrot.slane %v2911_v0, %v5592_v38  ;;  %v2953_v6 = vcombine.high %v2952_v1, %v2952_v1 }
 0x330   :  { %v2960_v7 = vrot.slane %v2952_v1, %v5592_v38  ;;  %2859 = vst.msk [vmem:[#allocation3 + $0x22] ss:$8 sm:$0x3] %vm5617_vm4, %v2852_v2  ;;  %2900 = vst.msk [vmem:[#allocation3 + $0x24] ss:$8 sm:$0x3] %vm5617_vm4, %v2893_v3 }
 0x331   :  { %v2926_v8 = vrot.slane %v2912_v4, %v5592_v38  ;;  %2930 = vst.msk [vmem:[#allocation3 + $0x5] ss:$8 sm:$0x3] %vm5617_vm4, %v2919_v5  ;;  %v2935_v10 = vcombine.high %v2919_v5, %v2919_v5  ;;  %v2967_v11 = vrot.slane %v2953_v6, %v5592_v38 }
 0x332   :  { %2971 = vst.msk [vmem:[#allocation3 + $0x7] ss:$8 sm:$0x3] %vm5617_vm4, %v2960_v7  ;;  %v2976_v13 = vcombine.high %v2960_v7, %v2960_v7 }
 0x333   :  { %2933 = vst.msk [vmem:[#allocation3 + $0x25] ss:$8 sm:$0x3] %vm5617_vm4, %v2926_v8  ;;  %v2936_v14 = vcombine.high %v2926_v8, %v2926_v8  ;;  %2940 = vst.msk [vmem:[#allocation3 + $0x6] ss:$8 sm:$0x3] %vm5617_vm4, %v2935_v10  ;;  %v2977_v15 = vcombine.high %v2967_v11, %v2967_v11 }
 0x334   :  { %2974 = vst.msk [vmem:[#allocation3 + $0x27] ss:$8 sm:$0x3] %vm5617_vm4, %v2967_v11  ;;  %2981 = vst.msk [vmem:[#allocation3 + $0x10] ss:$8 sm:$0x3] %vm5617_vm4, %v2976_v13 }
 0x335   :  { %v3018_v17 = vld [vmem:[#allocation3 + $0x1] ss:$8 sm:$0x3]  ;;  %v3111_v18 = vld [vmem:[#allocation3 + $0x3] ss:$8 sm:$0x3] }
 0x336   :  { %2943 = vst.msk [vmem:[#allocation3 + $0x26] ss:$8 sm:$0x3] %vm5617_vm4, %v2936_v14  ;;  %2984 = vst.msk [vmem:[#allocation3 + $0x30] ss:$8 sm:$0x3] %vm5617_vm4, %v2977_v15 }
 0x337   :  { %v3080_v19 = vld [vmem:[#allocation3 + $0x2] ss:$8 sm:$0x3]  ;;  %v3173_v21 = vld [vmem:[#allocation3 + $0x4] ss:$8 sm:$0x3] }
 0x338   :  { %v3019_v22 = vld [vmem:[#allocation3 + $0x21] ss:$8 sm:$0x3]  ;;  %v3112_v20 = vld [vmem:[#allocation3 + $0x23] ss:$8 sm:$0x3] }
 0x339   :  { %v3081_v16 = vld [vmem:[#allocation3 + $0x22] ss:$8 sm:$0x3]  ;;  %v3174_v12 = vld [vmem:[#allocation3 + $0x24] ss:$8 sm:$0x3]  ;;  %v3022_v24 = vcombine.low %v3018_v17, %v3019_v22  ;;  %v3115_v25 = vcombine.low %v3111_v18, %v3112_v20 }
 0x33a   :  { %v3084_v27 = vcombine.low %v3080_v19, %v3081_v16  ;;  %v3177_v26 = vcombine.low %v3173_v21, %v3174_v12  ;;  %v3206_v29 = vld [vmem:[#allocation3 + $0x5] ss:$8 sm:$0x3]  ;;  %v3305_v23 = vld [vmem:[#allocation3 + $0x7] ss:$8 sm:$0x3] }
 0x33b   :  { %v3029_v49 = vrot.slane %v3022_v24, %v5592_v38  ;;  %v3122_v51 = vrot.slane %v3115_v25, %v5592_v38  ;;  %v3049_v30 = vld [vmem:[#allocation3 + $0x2] ss:$8 sm:$0x3]  ;;  %v3272_v35 = vld [vmem:[#allocation3 + $0x6] ss:$8 sm:$0x3] }
 0x33c   :  { %v3050_v32 = vld [vmem:[#allocation3 + $0x22] ss:$8 sm:$0x3]  ;;  %v3091_v33 = vrot.slane %v3084_v27, %v5592_v38  ;;  %v3184_v34 = vrot.slane %v3177_v26, %v5592_v38  ;;  %v3207_v37 = vld [vmem:[#allocation3 + $0x25] ss:$8 sm:$0x3] }
 0x33d   :  { %v3053_v39 = vcombine.low %v3049_v30, %v3050_v32  ;;  %v3030_v40 = vcombine.high %v3029_v49, %v3029_v49  ;;  %4096 = vst.sshfl [vmem:[#allocation7 + $0x18] sm:$0x50 pattern:$0x73625140] %v3122_v51  ;;  %v3210_v41 = vcombine.low %v3206_v29, %v3207_v37  ;;  %v3123_v55 = vcombine.low %v3122_v51, %v3122_v51  ;;  %v3441_v32 = vld [vmem:[#allocation12 + $0x200] sm:$0xff]  ;;  %v3448_v37 = vld [vmem:[#allocation12 + $0x238] sm:$0xff] }
 0x33e   :  { %v3306_v42 = vld [vmem:[#allocation3 + $0x27] ss:$8 sm:$0x3]  ;;  %v3142_v43 = vld [vmem:[#allocation3 + $0x4] ss:$8 sm:$0x3]  ;;  %v3092_v36 = vcombine.low %v3091_v33, %v3091_v33  ;;  %v3185_v44 = vcombine.high %v3184_v34, %v3184_v34  ;;  %v3192_v46 = vrot.slane %v3184_v34, %v5592_v38 }
 0x33f   :  { %4089 = vst.sshfl [vmem:[#allocation7 + $0x10] sm:$0x5 pattern:$0x73625140] %v3029_v49  ;;  %v3309_v47 = vcombine.low %v3305_v23, %v3306_v42  ;;  %v3217_v53 = vrot.slane %v3210_v41, %v5592_v38  ;;  %v3060_v54 = vrot.slane %v3053_v39, %v5592_v38 }
 0x340   :  { %4094 = vst.sshfl [vmem:[#allocation7 + $0x8] sm:$0x50 pattern:$0x73625140] %v3091_v33  ;;  %v3199_v60 = vrot.slane %v3185_v44, %v5592_v38  ;;  %v3200_v61 = vcombine.low %v3192_v46, %v3192_v46  ;;  %v3443_v33 = vld [vmem:[#allocation12 + $0x210] sm:$0xff]  ;;  %v3452_v46 = vld [vmem:[#allocation12 + $0x258] sm:$0xff] }
 0x341   :  { %v3273_v45 = vld [vmem:[#allocation3 + $0x26] ss:$8 sm:$0x3]  ;;  %v3143_v48 = vld [vmem:[#allocation3 + $0x24] ss:$8 sm:$0x3]  ;;  %v3316_v28 = vrot.slane %v3309_v47, %v5592_v38  ;;  %v3218_v0 = vcombine.high %v3217_v53, %v3217_v53  ;;  %v3225_v1 = vrot.slane %v3217_v53, %v5592_v38  ;;  %v3061_v2 = vcombine.high %v3060_v54, %v3060_v54 }
 0x342   :  { %v3276_v56 = vcombine.low %v3272_v35, %v3273_v45  ;;  %4090 = vst.sshfl [vmem:[#allocation7 + $0x18] sm:$0x5 pattern:$0x73625140] %v3030_v40  ;;  %v3146_v57 = vcombine.low %v3142_v43, %v3143_v48  ;;  %v3201_v4 = vcombine.low %v3199_v60, %v3199_v60  ;;  %3204 = vst [vmem:[#allocation7] sm:$0x30] %v3200_v61 }
 0x343   :  { %4095 = vst.sshfl [vmem:[#allocation7 + $0x10] sm:$0x50 pattern:$0x73625140] %v3123_v55  ;;  %v3331_v5 = vrot.slane %v3316_v28, %v5592_v38  ;;  %v3317_v6 = vcombine.low %v3316_v28, %v3316_v28  ;;  %v3232_v11 = vrot.slane %v3218_v0, %v5592_v38  ;;  %v3233_v13 = vcombine.low %v3225_v1, %v3225_v1  ;;  %v3446_v35 = vld [vmem:[#allocation12 + $0x228] sm:$0xff]  ;;  %v3445_v43 = vld [vmem:[#allocation12 + $0x220] sm:$0xff] }
 0x344   :  { %v3239_v58 = vld [vmem:[#allocation3 + $0x6] ss:$8 sm:$0x3]  ;;  %v3283_v63 = vrot.slane %v3276_v56, %v5592_v38  ;;  %v3339_v3 = vld [vmem:[#allocation3 + $0x30] ss:$8 sm:$0x3]  ;;  %v3153_v7 = vrot.slane %v3146_v57, %v5592_v38  ;;  %v4517_v41 = vpack.c.bf16 %v3443_v33, %v3441_v32  ;;  %v4519_v55 = vpack.c.bf16 %v3448_v37, %v3446_v35 }
 0x345   :  { %v3240_v59 = vld [vmem:[#allocation3 + $0x26] ss:$8 sm:$0x3]  ;;  %v3338_v14 = vld [vmem:[#allocation3 + $0x10] ss:$8 sm:$0x3]  ;;  %v3333_v15 = vcombine.low %v3331_v5, %v3331_v5  ;;  %v3324_v17 = vrot.slane %v3317_v6, %v5592_v38  ;;  %v3234_v20 = vcombine.low %v3232_v11, %v3232_v11 }
 0x346   :  { %4093 = vst.sshfl [vmem:[#allocation7] sm:$0x50 pattern:$0x73625140] %v3092_v36  ;;  %v3243_v62 = vcombine.low %v3239_v58, %v3240_v59  ;;  %v3284_v8 = vcombine.low %v3283_v63, %v3283_v63  ;;  %v3298_v10 = vrot.slane %v3283_v63, %v5592_v38  ;;  %3205 = vst [vmem:[#allocation7 + $0x8] sm:$0x30] %v3201_v4 }
 0x347   :  { %4091 = vst.sshfl [vmem:[#allocation7 + $0x20] sm:$0x5 pattern:$0x73625140] %v3060_v54  ;;  %v3342_v19 = vcombine.low %v3338_v14, %v3339_v3  ;;  %3237 = vst [vmem:[#allocation7 + $0x10] sm:$0x30] %v3233_v13  ;;  %v3332_v16 = vcombine.low %v3324_v17, %v3324_v17  ;;  %v3154_v29 = vcombine.low %v3153_v7, %v3153_v7 }
 0x348   :  { %4092 = vst.sshfl [vmem:[#allocation7 + $0x28] sm:$0x5 pattern:$0x73625140] %v3061_v2  ;;  %v3250_v18 = vrot.slane %v3243_v62, %v5592_v38  ;;  %v3300_v21 = vcombine.low %v3298_v10, %v3298_v10  ;;  %v3291_v22 = vrot.slane %v3284_v8, %v5592_v38  ;;  %3337 = vst [vmem:[#allocation7 + $0x18] sm:$0xc0] %v3333_v15 }
 0x349   :  { %4098 = vst.sshfl [vmem:[#allocation7 + $0x28] sm:$0x50 pattern:$0x73625140] %v3153_v7  ;;  %v3349_v24 = vrot.slane %v3342_v19, %v5592_v38  ;;  %3238 = vst [vmem:[#allocation7 + $0x18] sm:$0x30] %v3234_v20 }
 0x34a   :  { %v3251_v12 = vcombine.high %v3250_v18, %v3250_v18  ;;  %3304 = vst [vmem:[#allocation7 + $0x8] sm:$0xc0] %v3300_v21  ;;  %v3299_v25 = vcombine.low %v3291_v22, %v3291_v22  ;;  %3336 = vst [vmem:[#allocation7 + $0x10] sm:$0xc0] %v3332_v16  ;;  %v3258_v49 = vrot.slane %v3250_v18, %v5592_v38  ;;  %v3447_v36 = vld [vmem:[#allocation12 + $0x230] sm:$0xff]  ;;  %v3450_v45 = vld [vmem:[#allocation12 + $0x248] sm:$0xff] }
 0x34b   :  { %v3364_v26 = vrot.slane %v3349_v24, %v5592_v38  ;;  %v3350_v30 = vcombine.low %v3349_v24, %v3349_v24  ;;  %4097 = vst.sshfl [vmem:[#allocation7 + $0x20] sm:$0x50 pattern:$0x73625140] %v3154_v29  ;;  %v4521_v48 = vpack.c.bf16 %v3447_v36, %v3445_v43  ;;  %v4523_v56 = vpack.c.bf16 %v3452_v46, %v3450_v45  ;;  %v3449_v53 = vld [vmem:[#allocation12 + $0x240] sm:$0xff]  ;;  %v3451_v54 = vld [vmem:[#allocation12 + $0x250] sm:$0xff] }
 0x34c   :  { %v3265_v27 = vrot.slane %v3251_v12, %v5592_v38  ;;  %3303 = vst [vmem:[#allocation7] sm:$0xc0] %v3299_v25  ;;  %v3266_v34 = vcombine.low %v3258_v49, %v3258_v49  ;;  %v3454_v57 = vld [vmem:[#allocation12 + $0x268] sm:$0xff]  ;;  %v3456_v58 = vld [vmem:[#allocation12 + $0x278] sm:$0xff]  ;;  %v4525_v59 = vpack.c.bf16 %v3451_v54, %v3449_v53  ;;  %v3453_v61 = vld [vmem:[#allocation12 + $0x260] sm:$0xff] }
 0x34d   :  { %v3366_v23 = vcombine.low %v3364_v26, %v3364_v26  ;;  %v3357_v39 = vrot.slane %v3350_v30, %v5592_v38  ;;  %v4527_v60 = vpack.c.bf16 %v3456_v58, %v3454_v57  ;;  %v3455_v28 = vld [vmem:[#allocation12 + $0x270] sm:$0xff]  ;;  %v3458_v62 = vld [vmem:[#allocation12 + $0x288] sm:$0xff]  ;;  %v3460_v63 = vld [vmem:[#allocation12 + $0x298] sm:$0xff] }
 0x34e   :  { %v3267_v51 = vcombine.low %v3265_v27, %v3265_v27  ;;  %3270 = vst [vmem:[#allocation7 + $0x20] sm:$0x30] %v3266_v34  ;;  %v4529_v0 = vpack.c.bf16 %v3455_v28, %v3453_v61  ;;  %v4531_v1 = vpack.c.bf16 %v3460_v63, %v3458_v62  ;;  %v3457_v2 = vld [vmem:[#allocation12 + $0x280] sm:$0xff]  ;;  %v3459_v3 = vld [vmem:[#allocation12 + $0x290] sm:$0xff]  ;;  %v3462_v4 = vld [vmem:[#allocation12 + $0x2a8] sm:$0xff] }
 0x34f   :  { %3370 = vst [vmem:[#allocation7 + $0x28] sm:$0xc0] %v3366_v23  ;;  %v3365_v42 = vcombine.low %v3357_v39, %v3357_v39  ;;  %v3464_v5 = vld [vmem:[#allocation12 + $0x2b8] sm:$0xff]  ;;  %v4533_v6 = vpack.c.bf16 %v3459_v3, %v3457_v2  ;;  %v3461_v8 = vld [vmem:[#allocation12 + $0x2a0] sm:$0xff]  ;;  %v3463_v10 = vld [vmem:[#allocation12 + $0x2b0] sm:$0xff] }
 0x350   :  { %3271 = vst [vmem:[#allocation7 + $0x28] sm:$0x30] %v3267_v51  ;;  %v3374_v47 = vld [vmem:[#allocation7 + $0x18] sm:$0xff]  ;;  %v4535_v7 = vpack.c.bf16 %v3464_v5, %v3462_v4  ;;  %v3468_v13 = vld [vmem:[#allocation12 + $0x2d8] sm:$0xff]  ;;  %v4537_v14 = vpack.c.bf16 %v3463_v10, %v3461_v8  ;;  %v3465_v17 = vld [vmem:[#allocation12 + $0x2c0] sm:$0xff] }
 0x351   :  { %v3372_v40 = vld [vmem:[#allocation7 + $0x8] sm:$0xff]  ;;  %3369 = vst [vmem:[#allocation7 + $0x20] sm:$0xc0] %v3365_v42  ;;  %v3466_v11 = vld [vmem:[#allocation12 + $0x2c8] sm:$0xff]  ;;  %v3467_v18 = vld [vmem:[#allocation12 + $0x2d0] sm:$0xff] }
 0x352   :  { %3645 = vmatprep.mubr.f32.mxu0 %v3372_v40  ;;  %v4539_v15 = vpack.c.bf16 %v3468_v13, %v3466_v11  ;;  %v3470_v19 = vld [vmem:[#allocation12 + $0x2e8] sm:$0xff]  ;;  %v3472_v21 = vld [vmem:[#allocation12 + $0x2f8] sm:$0xff]  ;;  %v4541_v22 = vpack.c.bf16 %v3467_v18, %v3465_v17  ;;  %v3469_v16 = vld [vmem:[#allocation12 + $0x2e0] sm:$0xff] }
 0x353   :  { %v3371_v44 = vld [vmem:[#allocation7] sm:$0xff]  ;;  %v4543_v20 = vpack.c.bf16 %v3472_v21, %v3470_v19  ;;  %v3474_v24 = vld [vmem:[#allocation12 + $0x308] sm:$0xff]  ;;  %v3476_v25 = vld [vmem:[#allocation12 + $0x318] sm:$0xff] }
 0x354   :  { %3646 = vmatmul.mubr.f32.vlgmr.msra.gmra.mrb[8].mxu0 %v3371_v44  ;;  %v3471_v12 = vld [vmem:[#allocation12 + $0x2f0] sm:$0xff]  ;;  %v4547_v26 = vpack.c.bf16 %v3476_v25, %v3474_v24  ;;  %v3473_v29 = vld [vmem:[#allocation12 + $0x300] sm:$0xff]  ;;  %v3478_v51 = vld [vmem:[#allocation12 + $0x328] sm:$0xff] }
 0x355   :  { %4518 = vmatpush1.bf16.msra.mxu0 %v4517_v41  ;;  %3716 = vmatprep.mubr.f32.mxu0 %v3374_v47  ;;  %v4545_v27 = vpack.c.bf16 %v3471_v12, %v3469_v16  ;;  %v3475_v49 = vld [vmem:[#allocation12 + $0x310] sm:$0xff]  ;;  %v3480_v23 = vld [vmem:[#allocation12 + $0x338] sm:$0xff]  ;;  %v3477_v33 = vld [vmem:[#allocation12 + $0x320] sm:$0xff] }
 0x356   :  { %4520 = vmatprep.subr.bf16.mxu0 %v4519_v55  ;;  %v4549_v30 = vpack.c.bf16 %v3475_v49, %v3473_v29  ;;  %v4551_v32 = vpack.c.bf16 %v3480_v23, %v3478_v51  ;;  %v3479_v34 = vld [vmem:[#allocation12 + $0x330] sm:$0xff]  ;;  %v3482_v35 = vld [vmem:[#allocation12 + $0x348] sm:$0xff]  ;;  %v3484_v37 = vld [vmem:[#allocation12 + $0x358] sm:$0xff] }
 0x357   :  { %v4553_v39 = vpack.c.bf16 %v3479_v34, %v3477_v33  ;;  %v4555_v40 = vpack.c.bf16 %v3484_v37, %v3482_v35  ;;  %v3481_v41 = vld [vmem:[#allocation12 + $0x340] sm:$0xff]  ;;  %v3483_v42 = vld [vmem:[#allocation12 + $0x350] sm:$0xff]  ;;  %v3486_v55 = vld [vmem:[#allocation12 + $0x368] sm:$0xff] }
 0x358   :  { %v3488_v43 = vld [vmem:[#allocation12 + $0x378] sm:$0xff]  ;;  %v4557_v36 = vpack.c.bf16 %v3483_v42, %v3481_v41  ;;  %v3485_v45 = vld [vmem:[#allocation12 + $0x360] sm:$0xff]  ;;  %v3487_v46 = vld [vmem:[#allocation12 + $0x370] sm:$0xff] }
 0x359   :  { %4522 = vmatpush1.bf16.msra.mxu0 %v4521_v48  ;;  %v4559_v44 = vpack.c.bf16 %v3488_v43, %v3486_v55  ;;  %v3490_v47 = vld [vmem:[#allocation12 + $0x388] sm:$0xff]  ;;  %v3492_v48 = vld [vmem:[#allocation12 + $0x398] sm:$0xff]  ;;  %v3489_v54 = vld [vmem:[#allocation12 + $0x380] sm:$0xff] }
 0x35a   :  { %4524 = vmatprep.subr.bf16.mxu0 %v4523_v56  ;;  %v4561_v56 = vpack.c.bf16 %v3487_v46, %v3485_v45  ;;  %v4563_v53 = vpack.c.bf16 %v3492_v48, %v3490_v47  ;;  %v3491_v57 = vld [vmem:[#allocation12 + $0x390] sm:$0xff]  ;;  %v3494_v58 = vld [vmem:[#allocation12 + $0x3a8] sm:$0xff]  ;;  %v3493_v28 = vld [vmem:[#allocation12 + $0x3a0] sm:$0xff] }
 0x35b   :  { %v3495_v62 = vld [vmem:[#allocation12 + $0x3b0] sm:$0xff]  ;;  %v3498_v63 = vld [vmem:[#allocation12 + $0x3c8] sm:$0xff]  ;;  %v3497_v3 = vld [vmem:[#allocation12 + $0x3c0] sm:$0xff] }
 0x35c   :  { %v3499_v4 = vld [vmem:[#allocation12 + $0x3d0] sm:$0xff]  ;;  %v3502_v5 = vld [vmem:[#allocation12 + $0x3e8] sm:$0xff]  ;;  %v3501_v10 = vld [vmem:[#allocation12 + $0x3e0] sm:$0xff] }
 0x35d   :  { %4526 = vmatpush1.bf16.msra.mxu0 %v4525_v59  ;;  %v3496_v59 = vld [vmem:[#allocation12 + $0x3b8] sm:$0xff]  ;;  %v3503_v11 = vld [vmem:[#allocation12 + $0x3f0] sm:$0xff]  ;;  %v3506_v13 = vld [vmem:[#allocation12 + $0x408] sm:$0xff] }
 0x35e   :  { %4528 = vmatprep.subr.bf16.mxu0 %v4527_v60  ;;  %v4565_v60 = vpack.c.bf16 %v3491_v57, %v3489_v54  ;;  %v4567_v61 = vpack.c.bf16 %v3496_v59, %v3494_v58  ;;  %v3505_v18 = vld [vmem:[#allocation12 + $0x400] sm:$0xff]  ;;  %v3507_v19 = vld [vmem:[#allocation12 + $0x410] sm:$0xff]  ;;  %v3510_v21 = vld [vmem:[#allocation12 + $0x428] sm:$0xff] }
 0x35f   :  { %v3509_v12 = vld [vmem:[#allocation12 + $0x420] sm:$0xff]  ;;  %v3511_v24 = vld [vmem:[#allocation12 + $0x430] sm:$0xff]  ;;  %v3376_v29 = vld [vmem:[#allocation7 + $0x28] sm:$0xff] }
 0x360   :  { %v3373_v25 = vld [vmem:[#allocation7 + $0x10] sm:$0xff]  ;;  %v4585_v49 = vpack.c.bf16 %v3511_v24, %v3509_v12  ;;  %v3520_v33 = vld [vmem:[#allocation12 + $0x478] sm:$0xff] }
 0x361   :  { %4530 = vmatpush1.bf16.msra.mxu0 %v4529_v0  ;;  %v3500_v0 = vld [vmem:[#allocation12 + $0x3d8] sm:$0xff]  ;;  %v3513_v23 = vld [vmem:[#allocation12 + $0x440] sm:$0xff] }
 0x362   :  { %4532 = vmatprep.subr.bf16.mxu0 %v4531_v1  ;;  %v4569_v1 = vpack.c.bf16 %v3495_v62, %v3493_v28  ;;  %v4571_v2 = vpack.c.bf16 %v3500_v0, %v3498_v63  ;;  %v3517_v37 = vld [vmem:[#allocation12 + $0x460] sm:$0xff]  ;;  %v3524_v41 = vld [vmem:[#allocation12 + $0x498] sm:$0xff] }
 0x363   :  { %v3521_v43 = vld [vmem:[#allocation12 + $0x480] sm:$0xff]  ;;  %v3528_v45 = vld [vmem:[#allocation12 + $0x4b8] sm:$0xff] }
 0x364   :  { %v3525_v48 = vld [vmem:[#allocation12 + $0x4a0] sm:$0xff]  ;;  %v3532_v54 = vld [vmem:[#allocation12 + $0x4d8] sm:$0xff] }
 0x365   :  { %4534 = vmatpush1.bf16.msra.mxu0 %v4533_v6  ;;  %v3504_v6 = vld [vmem:[#allocation12 + $0x3f8] sm:$0xff]  ;;  %v3529_v59 = vld [vmem:[#allocation12 + $0x4c0] sm:$0xff] }
 0x366   :  { %4536 = vmatprep.subr.bf16.mxu0 %v4535_v7  ;;  %v4573_v7 = vpack.c.bf16 %v3499_v4, %v3497_v3  ;;  %v4575_v8 = vpack.c.bf16 %v3504_v6, %v3502_v5  ;;  %v3536_v28 = vld [vmem:[#allocation12 + $0x4f8] sm:$0xff]  ;;  %v3533_v0 = vld [vmem:[#allocation12 + $0x4e0] sm:$0xff] }
 0x367   :  { %v3540_v3 = vld [vmem:[#allocation12 + $0x518] sm:$0xff]  ;;  %v3537_v6 = vld [vmem:[#allocation12 + $0x500] sm:$0xff] }
 0x368   :  { %v3552_v12 = vld [vmem:[#allocation12 + $0x578] sm:$0xff] }
 0x369   :  { %4538 = vmatpush1.bf16.msra.mxu0 %v4537_v14  ;;  %v3508_v14 = vld [vmem:[#allocation12 + $0x418] sm:$0xff] }
 0x36a   :  { %4540 = vmatprep.subr.bf16.mxu0 %v4539_v15  ;;  %v4577_v15 = vpack.c.bf16 %v3503_v11, %v3501_v10  ;;  %v4579_v17 = vpack.c.bf16 %v3508_v14, %v3506_v13  ;;  %v3544_v10 = vld [vmem:[#allocation12 + $0x538] sm:$0xff]  ;;  %v3541_v14 = vld [vmem:[#allocation12 + $0x520] sm:$0xff] }
 0x36d   :  { %4542 = vmatpush1.bf16.msra.mxu0 %v4541_v22  ;;  %v3512_v22 = vld [vmem:[#allocation12 + $0x438] sm:$0xff] }
 0x36e   :  { %4544 = vmatprep.subr.bf16.mxu0 %v4543_v20  ;;  %v4581_v20 = vpack.c.bf16 %v3507_v19, %v3505_v18  ;;  %v4583_v16 = vpack.c.bf16 %v3512_v22, %v3510_v21  ;;  %v3548_v18 = vld [vmem:[#allocation12 + $0x558] sm:$0xff]  ;;  %v3545_v22 = vld [vmem:[#allocation12 + $0x540] sm:$0xff] }
 0x371   :  { %4546 = vmatpush1.bf16.msra.mxu0 %v4545_v27  ;;  %v3514_v27 = vld [vmem:[#allocation12 + $0x448] sm:$0xff] }
 0x372   :  { %4548 = vmatprep.subr.bf16.mxu0 %v4547_v26  ;;  %v3516_v26 = vld [vmem:[#allocation12 + $0x458] sm:$0xff] }
 0x373   :  { %v4587_v51 = vpack.c.bf16 %v3516_v26, %v3514_v27  ;;  %v3549_v27 = vld [vmem:[#allocation12 + $0x560] sm:$0xff]  ;;  %v3551_v26 = vld [vmem:[#allocation12 + $0x570] sm:$0xff] }
 0x375   :  { %4550 = vmatpush1.bf16.msra.mxu0 %v4549_v30  ;;  %v3515_v30 = vld [vmem:[#allocation12 + $0x450] sm:$0xff] }
 0x376   :  { %4552 = vmatprep.subr.bf16.mxu0 %v4551_v32  ;;  %v3518_v32 = vld [vmem:[#allocation12 + $0x468] sm:$0xff]  ;;  %v4589_v34 = vpack.c.bf16 %v3515_v30, %v3513_v23  ;;  %v3553_v30 = vld [vmem:[#allocation12 + $0x580] sm:$0xff] }
 0x377   :  { %v4591_v35 = vpack.c.bf16 %v3520_v33, %v3518_v32  ;;  %v3555_v32 = vld [vmem:[#allocation12 + $0x590] sm:$0xff]  ;;  %v3558_v33 = vld [vmem:[#allocation12 + $0x5a8] sm:$0xff] }
 0x379   :  { %4554 = vmatpush1.bf16.msra.mxu0 %v4553_v39  ;;  %v3519_v39 = vld [vmem:[#allocation12 + $0x470] sm:$0xff] }
 0x37a   :  { %4556 = vmatprep.subr.bf16.mxu0 %v4555_v40  ;;  %v3522_v40 = vld [vmem:[#allocation12 + $0x488] sm:$0xff]  ;;  %v4593_v42 = vpack.c.bf16 %v3519_v39, %v3517_v37  ;;  %v3557_v39 = vld [vmem:[#allocation12 + $0x5a0] sm:$0xff] }
 0x37b   :  { %v4595_v55 = vpack.c.bf16 %v3524_v41, %v3522_v40  ;;  %v3559_v40 = vld [vmem:[#allocation12 + $0x5b0] sm:$0xff]  ;;  %v3562_v41 = vld [vmem:[#allocation12 + $0x5c8] sm:$0xff] }
 0x37d   :  { %4558 = vmatpush1.bf16.msra.mxu0 %v4557_v36  ;;  %v3523_v36 = vld [vmem:[#allocation12 + $0x490] sm:$0xff] }
 0x37e   :  { %4560 = vmatprep.subr.bf16.mxu0 %v4559_v44  ;;  %v3526_v44 = vld [vmem:[#allocation12 + $0x4a8] sm:$0xff]  ;;  %v4597_v46 = vpack.c.bf16 %v3523_v36, %v3521_v43  ;;  %v3561_v36 = vld [vmem:[#allocation12 + $0x5c0] sm:$0xff] }
 0x37f   :  { %v4599_v47 = vpack.c.bf16 %v3528_v45, %v3526_v44  ;;  %v3563_v44 = vld [vmem:[#allocation12 + $0x5d0] sm:$0xff]  ;;  %v3566_v45 = vld [vmem:[#allocation12 + $0x5e8] sm:$0xff] }
 0x381   :  { %4562 = vmatpush1.bf16.msra.mxu0 %v4561_v56  ;;  %v3527_v56 = vld [vmem:[#allocation12 + $0x4b0] sm:$0xff] }
 0x382   :  { %4564 = vmatprep.subr.bf16.mxu0 %v4563_v53  ;;  %v3530_v53 = vld [vmem:[#allocation12 + $0x4c8] sm:$0xff]  ;;  %v4601_v57 = vpack.c.bf16 %v3527_v56, %v3525_v48  ;;  %v3565_v56 = vld [vmem:[#allocation12 + $0x5e0] sm:$0xff] }
 0x383   :  { %v4603_v58 = vpack.c.bf16 %v3532_v54, %v3530_v53  ;;  %v3567_v53 = vld [vmem:[#allocation12 + $0x5f0] sm:$0xff] }
 0x384   :  { %v4641_v54 = vpack.c.bf16 %v3567_v53, %v3565_v56 }
 0x385   :  { %4566 = vmatpush1.bf16.msra.mxu0 %v4565_v60  ;;  %v3531_v60 = vld [vmem:[#allocation12 + $0x4d0] sm:$0xff] }
 0x386   :  { %4568 = vmatprep.subr.bf16.mxu0 %v4567_v61  ;;  %v3534_v61 = vld [vmem:[#allocation12 + $0x4e8] sm:$0xff]  ;;  %v4605_v62 = vpack.c.bf16 %v3531_v60, %v3529_v59 }
 0x387   :  { %v4607_v63 = vpack.c.bf16 %v3536_v28, %v3534_v61 }
 0x389   :  { %4570 = vmatpush1.bf16.msra.mxu0 %v4569_v1  ;;  %v3535_v1 = vld [vmem:[#allocation12 + $0x4f0] sm:$0xff] }
 0x38a   :  { %4572 = vmatprep.subr.bf16.mxu0 %v4571_v2  ;;  %v3538_v2 = vld [vmem:[#allocation12 + $0x508] sm:$0xff]  ;;  %v4609_v4 = vpack.c.bf16 %v3535_v1, %v3533_v0 }
 0x38b   :  { %v4611_v5 = vpack.c.bf16 %v3540_v3, %v3538_v2 }
 0x38d   :  { %4574 = vmatpush1.bf16.msra.mxu0 %v4573_v7  ;;  %v3539_v7 = vld [vmem:[#allocation12 + $0x510] sm:$0xff] }
 0x38e   :  { %4576 = vmatprep.subr.bf16.mxu0 %v4575_v8  ;;  %v3542_v8 = vld [vmem:[#allocation12 + $0x528] sm:$0xff]  ;;  %v4613_v11 = vpack.c.bf16 %v3539_v7, %v3537_v6 }
 0x38f   :  { %v4615_v13 = vpack.c.bf16 %v3544_v10, %v3542_v8 }
 0x391   :  { %4578 = vmatpush1.bf16.msra.mxu0 %v4577_v15  ;;  %v3543_v15 = vld [vmem:[#allocation12 + $0x530] sm:$0xff] }
 0x392   :  { %4580 = vmatprep.subr.bf16.mxu0 %v4579_v17  ;;  %v3546_v17 = vld [vmem:[#allocation12 + $0x548] sm:$0xff]  ;;  %v4617_v19 = vpack.c.bf16 %v3543_v15, %v3541_v14 }
 0x393   :  { %v4619_v21 = vpack.c.bf16 %v3548_v18, %v3546_v17 }
 0x394   :  { %3717 = vmatmul.mubr.f32.vlgmr.msra.gmra.mrb[8].mxu0 %v3373_v25 }
 0x395   :  { %4582 = vmatpush1.bf16.msra.mxu0 %v4581_v20  ;;  %3787 = vmatprep.mubr.f32.mxu0 %v3376_v29  ;;  %v3547_v20 = vld [vmem:[#allocation12 + $0x550] sm:$0xff]  ;;  %v3554_v29 = vld [vmem:[#allocation12 + $0x588] sm:$0xff] }
 0x396   :  { %4584 = vmatprep.subr.bf16.mxu0 %v4583_v16  ;;  %v3550_v16 = vld [vmem:[#allocation12 + $0x568] sm:$0xff]  ;;  %v4621_v24 = vpack.c.bf16 %v3547_v20, %v3545_v22 }
 0x397   :  { %v4623_v25 = vpack.c.bf16 %v3552_v12, %v3550_v16  ;;  %v4773_v16 = vmov 1935823168  }
 0x398   :  { %v3918_v12 = vunpack.c.l.s4 %v4773_v16 }
 0x399   :  { %4586 = vmatpush1.bf16.msra.mxu0 %v4585_v49  ;;  %v3556_v49 = vld [vmem:[#allocation12 + $0x598] sm:$0xff] }
 0x39a   :  { %4588 = vmatprep.subr.bf16.mxu0 %v4587_v51  ;;  %v4625_v51 = vpack.c.bf16 %v3551_v26, %v3549_v27  ;;  %v4627_v23 = vpack.c.bf16 %v3556_v49, %v3554_v29  ;;  %v3919_v29 = vunpack.c.0.s8 %v3918_v12 }
 0x39d   :  { %4590 = vmatpush1.bf16.msra.mxu0 %v4589_v34  ;;  %v3560_v34 = vld [vmem:[#allocation12 + $0x5b8] sm:$0xff] }
 0x39e   :  { %4592 = vmatprep.subr.bf16.mxu0 %v4591_v35  ;;  %v4629_v35 = vpack.c.bf16 %v3555_v32, %v3553_v30  ;;  %v4631_v37 = vpack.c.bf16 %v3560_v34, %v3558_v33 }
 0x3a1   :  { %4594 = vmatpush1.bf16.msra.mxu0 %v4593_v42  ;;  %v3564_v42 = vld [vmem:[#allocation12 + $0x5d8] sm:$0xff] }
 0x3a2   :  { %4596 = vmatprep.subr.bf16.mxu0 %v4595_v55  ;;  %v4633_v55 = vpack.c.bf16 %v3559_v40, %v3557_v39  ;;  %v4635_v43 = vpack.c.bf16 %v3564_v42, %v3562_v41 }
 0x3a5   :  { %4598 = vmatpush1.bf16.msra.mxu0 %v4597_v46  ;;  %v3568_v46 = vld [vmem:[#allocation12 + $0x5f8] sm:$0xff] }
 0x3a6   :  { %4600 = vmatprep.subr.bf16.mxu0 %v4599_v47  ;;  %v4637_v47 = vpack.c.bf16 %v3563_v44, %v3561_v36  ;;  %v4639_v48 = vpack.c.bf16 %v3568_v46, %v3566_v45  ;;  %v5951_v36 = vsub.s32 %v3919_v29, %v5589_v31 }
 0x3a9   :  { %4602 = vmatpush1.bf16.msra.mxu0 %v4601_v57  ;;  %v3375_v57 = vld [vmem:[#allocation7 + $0x20] sm:$0xff] }
 0x3aa   :  { %4604 = vmatprep.subr.bf16.mxu0 %v4603_v58  ;;  %v3569_v58 = vld [vmem:[%s6002_s6] sm:$0x3]  ;;  %s4772_s6 = smov 64  }
 0x3ab   :  { %v3574_v59 = vrot.slane %v3569_v58, %v5596_v50  ;;  %v3578_v60 = vrot.slane %v3569_v58, %v5602_v52 }
 0x3ad   :  { %4606 = vmatpush1.bf16.msra.mxu0 %v4605_v62 }
 0x3ae   :  { %4608 = vmatprep.subr.bf16.mxu0 %v4607_v63 }
 0x3b1   :  { %4610 = vmatpush1.bf16.msra.mxu0 %v4609_v4 }
 0x3b2   :  { %4612 = vmatprep.subr.bf16.mxu0 %v4611_v5 }
 0x3b5   :  { %4614 = vmatpush1.bf16.msra.mxu0 %v4613_v11 }
 0x3b6   :  { %4616 = vmatprep.subr.bf16.mxu0 %v4615_v13 }
 0x3b9   :  { %4618 = vmatpush1.bf16.msra.mxu0 %v4617_v19 }
 0x3ba   :  { %4620 = vmatprep.subr.bf16.mxu0 %v4619_v21 }
 0x3bd   :  { %4622 = vmatpush1.bf16.msra.mxu0 %v4621_v24 }
 0x3be   :  { %4624 = vmatprep.subr.bf16.mxu0 %v4623_v25 }
 0x3c1   :  { %4626 = vmatpush1.bf16.msra.mxu0 %v4625_v51 }
 0x3c2   :  { %4628 = vmatprep.subr.bf16.mxu0 %v4627_v23 }
 0x3c5   :  { %4630 = vmatpush1.bf16.msra.mxu0 %v4629_v35 }
 0x3c6   :  { %4632 = vmatprep.subr.bf16.mxu0 %v4631_v37 }
 0x3c9   :  { %4634 = vmatpush1.bf16.msra.mxu0 %v4633_v55 }
 0x3ca   :  { %4636 = vmatprep.subr.bf16.mxu0 %v4635_v43 }
 0x3cd   :  { %4638 = vmatpush1.bf16.msra.mxu0 %v4637_v47 }
 0x3ce   :  { %4640 = vmatprep.subr.bf16.mxu0 %v4639_v48 }
 0x3d1   :  { %4642 = vmatpush1.bf16.msra.mxu0 %v4641_v54 }
 0x3d4   :  { %3788 = vmatmul.mubr.f32.vlgmr.msra.gmra.mrb[8].mxu0 %v3375_v57 }
 0x4a7   :  { %v3789_v61 = vpop.f32.mrb[8].mxu0 }
 0x4a8   :  { %v4663_v28 = vadd.f32 %v3789_v61, %v3574_v59  ;;  %v3791_v62 = vpop.f32.mrb[9].mxu0 }
 0x4a9   :  { %v4664_v63 = vadd.f32 %v3791_v62, %v3578_v60 }
 0x4aa   :  { %v3794_v0 = vmax.f32 %v4663_v28, 0.0 }
 0x4ab   :  { %v3795_v1 = vmax.f32 %v4664_v63, 0.0 }
 0x4ad   :  { %v3802_v2 = vcombine.low %v3794_v0, %v3795_v1  ;;  %v3843_v3 = vcombine.high %v3794_v0, %v3795_v1 }
 0x4af   :  { %v3809_v4 = vrot.slane %v3802_v2, %v5592_v38  ;;  %v3850_v5 = vrot.slane %v3843_v3, %v5592_v38 }
 0x4b1   :  { %v3810_v6 = vcombine.high %v3809_v4, %v3809_v4  ;;  %v3817_v7 = vrot.slane %v3809_v4, %v5592_v38  ;;  %v3851_v8 = vcombine.high %v3850_v5, %v3850_v5  ;;  %v3858_v50 = vrot.slane %v3850_v5, %v5592_v38 }
 0x4b3   :  { %v3824_v52 = vrot.slane %v3810_v6, %v5592_v38  ;;  %3828 = vst.msk [vmem:[#allocation4 + $0x1] ss:$8 sm:$0x3] %vm5617_vm4, %v3817_v7  ;;  %v3833_v10 = vcombine.high %v3817_v7, %v3817_v7  ;;  %v3865_v11 = vrot.slane %v3851_v8, %v5592_v38  ;;  %3869 = vst.msk [vmem:[#allocation4 + $0x3] ss:$8 sm:$0x3] %vm5617_vm4, %v3858_v50 }
 0x4b4   :  { %v3874_v13 = vcombine.high %v3858_v50, %v3858_v50 }
 0x4b5   :  { %3831 = vst.msk [vmem:[#allocation4 + $0x11] ss:$8 sm:$0x3] %vm5617_vm4, %v3824_v52  ;;  %v3834_v14 = vcombine.high %v3824_v52, %v3824_v52  ;;  %3838 = vst.msk [vmem:[#allocation4 + $0x2] ss:$8 sm:$0x3] %vm5617_vm4, %v3833_v10  ;;  %v3875_v15 = vcombine.high %v3865_v11, %v3865_v11 }
 0x4b6   :  { %3872 = vst.msk [vmem:[#allocation4 + $0x13] ss:$8 sm:$0x3] %vm5617_vm4, %v3865_v11  ;;  %3879 = vst.msk [vmem:[#allocation4 + $0x4] ss:$8 sm:$0x3] %vm5617_vm4, %v3874_v13 }
 0x4b7   :  { %3841 = vst.msk [vmem:[#allocation4 + $0x12] ss:$8 sm:$0x3] %vm5617_vm4, %v3834_v14  ;;  %3882 = vst.msk [vmem:[#allocation4 + $0x14] ss:$8 sm:$0x3] %vm5617_vm4, %v3875_v15 }
 0x4ba   :  { %v3884_v38 = vld [vmem:[#allocation4 + $0x1] ss:$8 sm:$0x3]  ;;  %v5934_v22 = vld [vmem:[#allocation4 + $0x3] ss:$8 sm:$0x3] }
 0x4bb   :  { %3894 = vrot.lane.b32.xlu1 %v3884_v38, %s4772_s6  ;;  %v3936_v49 = vrot.slane %v3884_v38, 1  ;;  %v4023_v30 = vrot.slane %v5934_v22, 1 }
 0x4bc   :  { %v5925_v17 = vld [vmem:[#allocation4 + $0x2] ss:$8 sm:$0x3]  ;;  %v3885_v18 = vld [vmem:[#allocation4 + $0x11] ss:$8 sm:$0x3] }
 0x4bd   :  { %3906 = vrot.lane.b32.xlu0 %v5925_v17, %s4772_s6  ;;  %v5931_v21 = vld [vmem:[#allocation4 + $0x13] ss:$8 sm:$0x3]  ;;  %v5940_v20 = vld [vmem:[#allocation4 + $0x4] ss:$8 sm:$0x3] }
 0x4be   :  { %v5928_v19 = vld [vmem:[#allocation4 + $0x12] ss:$8 sm:$0x3]  ;;  %v5937_v9 = vld [vmem:[#allocation4 + $0x14] ss:$8 sm:$0x3] }
 0x4bf   :  { %3896 = vrot.lane.b32.xlu1 %v3885_v18, %s4772_s6  ;;  %v3937_v37 = vrot.slane %v3885_v18, 1  ;;  %v3952_v55 = vrot.slane %v5925_v17, 1  ;;  %v3953_v62 = vrot.slane %v5928_v19, 1  ;;  %v4024_v13 = vrot.slane %v5931_v21, 1 }
 0x4c1   :  { %3908 = vrot.lane.b32.xlu0 %v5928_v19, %s4772_s6 }
 0x4c3   :  { %3979 = vrot.lane.b32.xlu1 %v5931_v21, %s4772_s6 }
 0x4c5   :  { %3977 = vrot.lane.b32.xlu0 %v5934_v22, %s4772_s6 }
 0x4c7   :  { %3991 = vrot.lane.b32.xlu1 %v5937_v9, %s4772_s6 }
 0x4c9   :  { %3989 = vrot.lane.b32.xlu0 %v5940_v20, %s4772_s6 }
 0x52d   :  { %v3895_v24 = vpop.permute.xlu1 %3894 }
 0x52e   :  { %v3900_v25 = vmax.f32 %v3884_v38, %v3895_v24  ;;  %v3927_v27 = vrot.slane %v3895_v24, 1 }
 0x52f   :  { %v3907_v26 = vpop.permute.xlu0 %3906 }
 0x530   :  { %v3930_v51 = vsel %vm3929_vm5, %v3895_v24, %v3927_v27  ;;  %v3944_v23 = vrot.slane %v3907_v26, 1  ;;  %v3902_v32 = vmax.f32 %v3900_v25, %v5925_v17  ;;  %v3971_v34 = vmax.f32 %v5925_v17, %v3907_v26 }
 0x531   :  { %v3934_v33 = vmax.f32 %v3884_v38, %v3930_v51  ;;  %v3897_v35 = vpop.permute.xlu1 %3896 }
 0x532   :  { %v3946_v39 = vsel %vm3929_vm5, %v3907_v26, %v3944_v23  ;;  %v3901_v40 = vmax.f32 %v3885_v18, %v3897_v35  ;;  %v3928_v41 = vrot.slane %v3897_v35, 1  ;;  %v3912_v53 = vmax.f32 %v3902_v32, %v3907_v26 }
 0x533   :  { %v3940_v42 = vmax.f32 %v3934_v33, %v3936_v49  ;;  %v4009_v43 = vmax.f32 %v5925_v17, %v3946_v39  ;;  %v3909_v44 = vpop.permute.xlu0 %3908  ;;  %v3973_v58 = vmax.f32 %v3971_v34, %v5934_v22 }
 0x534   :  { %v3903_v45 = vmax.f32 %v3901_v40, %v5928_v19  ;;  %v3931_v46 = vsel %vm3929_vm5, %v3897_v35, %v3928_v41  ;;  %v3945_v47 = vrot.slane %v3909_v44, 1  ;;  %v3972_v48 = vmax.f32 %v5928_v19, %v3909_v44 }
 0x535   :  { %v3942_v56 = vmax.f32 %v3940_v42, %v5925_v17  ;;  %v3935_v54 = vmax.f32 %v3885_v18, %v3931_v46  ;;  %v3980_v57 = vpop.permute.xlu1 %3979  ;;  %v4011_v61 = vmax.f32 %v4009_v43, %v3952_v55  ;;  %v4040_v40 = vrot.slane %v5937_v9, 1 }
 0x536   :  { %v3913_v59 = vmax.f32 %v3903_v45, %v3909_v44  ;;  %v3947_v60 = vsel %vm3929_vm5, %v3909_v44, %v3945_v47  ;;  %v3974_v31 = vmax.f32 %v3972_v48, %v5931_v21  ;;  %v4016_v3 = vrot.slane %v3980_v57, 1 }
 0x537   :  { %v3941_v28 = vmax.f32 %v3935_v54, %v3937_v37  ;;  %v4010_v63 = vmax.f32 %v5928_v19, %v3947_v60  ;;  %v3978_v0 = vpop.permute.xlu0 %3977  ;;  %v3950_v5 = vmax.f32 %v3942_v56, %v3946_v39  ;;  %v4013_v52 = vmax.f32 %v4011_v61, %v5934_v22 }
 0x538   :  { %v3916_v1 = vcombine.low %v3912_v53, %v3913_v59  ;;  %v3984_v2 = vmax.f32 %v3974_v31, %v3980_v57  ;;  %v3983_v4 = vmax.f32 %v3973_v58, %v3978_v0  ;;  %v4015_v8 = vrot.slane %v3978_v0, 1 }
 0x539   :  { %v3943_v6 = vmax.f32 %v3941_v28, %v5928_v19  ;;  %v4012_v7 = vmax.f32 %v4010_v63, %v3953_v62  ;;  %v3992_v17 = vpop.permute.xlu1 %3991  ;;  %v4018_v19 = vsel %vm3929_vm5, %v3980_v57, %v4016_v3  ;;  %v3956_v24 = vmax.f32 %v3950_v5, %v3952_v55 }
 0x53a   :  { %v3923_v50 = vrot.slane %v3916_v1, %v5951_v36  ;;  %v3986_v10 = vmax.f32 %v3984_v2, %v5937_v9  ;;  %v3985_v11 = vmax.f32 %v3983_v4, %v5940_v20  ;;  %v4017_v38 = vsel %vm3929_vm5, %v3978_v0, %v4015_v8 }
 0x53b   :  { %v3951_v14 = vmax.f32 %v3943_v6, %v3947_v60  ;;  %v4014_v15 = vmax.f32 %v4012_v7, %v5931_v21  ;;  %v3990_v18 = vpop.permute.xlu0 %3989  ;;  %v4021_v16 = vmax.f32 %v4013_v52, %v4017_v38  ;;  %v4032_v21 = vrot.slane %v3992_v17, 1 }
 0x53c   :  { %v3996_v12 = vmax.f32 %v3986_v10, %v3992_v17  ;;  %3926 = vst.msk [vmem:[%s6003_s7] sm:$0x3] %vm3925_vm6, %v3923_v50  ;;  %v3995_v22 = vmax.f32 %v3985_v11, %v3990_v18  ;;  %v4031_v26 = vrot.slane %v3990_v18, 1  ;;  %v4039_v42 = vrot.slane %v5940_v20, 1 }
 0x53d   :  { %v3957_v25 = vmax.f32 %v3951_v14, %v3953_v62  ;;  %v4022_v27 = vmax.f32 %v4014_v15, %v4018_v19  ;;  %v4027_v29 = vmax.f32 %v4021_v16, %v4023_v30  ;;  %v4034_v39 = vsel %vm3929_vm5, %v3992_v17, %v4032_v21 }
 0x53e   :  { %v3999_v49 = vcombine.low %v3995_v22, %v3996_v12  ;;  %v4033_v37 = vsel %vm3929_vm5, %v3990_v18, %v4031_v26 }
 0x53f   :  { %v3960_v51 = vcombine.low %v3956_v24, %v3957_v25  ;;  %v4028_v23 = vmax.f32 %v4022_v27, %v4024_v13  ;;  %v4029_v32 = vmax.f32 %v4027_v29, %v5940_v20 }
 0x540   :  { %v4006_v33 = vrot.slane %v3999_v49, %v5951_v36 }
 0x541   :  { %v3967_v34 = vrot.slane %v3960_v51, %v5951_v36  ;;  %v4030_v35 = vmax.f32 %v4028_v23, %v5937_v9  ;;  %v4037_v30 = vmax.f32 %v4029_v32, %v4033_v37 }
 0x542   :  { %4008 = vst.msk [vmem:[%s6003_s7 + $0x2] sm:$0x3] %vm3925_vm6, %v4006_v33 }
 0x543   :  { %v4038_v41 = vmax.f32 %v4030_v35, %v4034_v39  ;;  %3970 = vst.msk [vmem:[%s6003_s7] sm:$0x3] %vm3969_vm7, %v3967_v34  ;;  %v4043_v43 = vmax.f32 %v4037_v30, %v4039_v42 }
 0x545   :  { %v4044_v55 = vmax.f32 %v4038_v41, %v4040_v40 }
 0x547   :  { %v4047_v44 = vcombine.low %v4043_v43, %v4044_v55 }
 0x549   :  { %v4054_v45 = vrot.slane %v4047_v44, %v5951_v36 }
 0x54b   :  { %4056 = vst.msk [vmem:[%s6003_s7 + $0x2] sm:$0x3] %vm3969_vm7, %v4054_v45 }
 0x54c   :  { %4061 = vsyncpa [#allocation9], 1 }
 0x54d   :  { %4062 = vsyncpa [#allocation11], 1 }

</bundles_post_ra>
